<compile_context>
chip_gen: v7x
topology: tpu7x:2x2x1
jax: 0.10.0
libtpu: 0.0.40
codegen_flags: <defaults>
</compile_context>

<pallas_src>
import functools

import jax
import jax.numpy as jnp
from jax.experimental import pallas as pl
from jax.experimental.pallas import tpu as pltpu


# ---------------------------------------------------------------------------
# Pallas kernel: single-shot GEMM with fused bias add and optional ReLU.
# Each invocation computes its full (tm, N) output tile: no K reduction loop,
# no accumulator scratch, fp32 accumulation on the MXU.
# ---------------------------------------------------------------------------
def _gemm_bias_kernel(x_ref, w_ref, b_ref, o_ref, *, apply_relu):
    acc = jnp.dot(x_ref[...], w_ref[...], preferred_element_type=jnp.float32)
    acc = acc + b_ref[...]                      # (tm, N) + (1, N) broadcast
    if apply_relu:
        acc = jnp.maximum(acc, 0.0)
    o_ref[...] = acc.astype(o_ref.dtype)


def gemm_bias(x, w, b, *, relu, out_dtype=jnp.float32, m_blocks=1):
    """y = relu?(x @ w + b); x:(M,K) bf16, w:(K,N) bf16, b:(1,N) f32 -> (M,N)."""
    M, K = x.shape
    Kw, N = w.shape
    assert K == Kw
    kernel = functools.partial(_gemm_bias_kernel, apply_relu=relu)
    out_shape = jax.ShapeDtypeStruct((M, N), out_dtype)

    # Optional M split (used only for conv1) -> 2 independent "parallel" blocks
    # so a 2-TC chip (v7x) can shard the largest GEMM; weights/bias blocks are
    # grid-invariant so they stay resident in VMEM across steps.
    if m_blocks > 1 and M % m_blocks == 0 and (M // m_blocks) % 8 == 0:
        tm = M // m_blocks
        return pl.pallas_call(
            kernel,
            out_shape=out_shape,
            grid=(m_blocks,),
            in_specs=[
                pl.BlockSpec((tm, K), lambda i: (i, 0)),
                pl.BlockSpec((K, N), lambda i: (0, 0)),
                pl.BlockSpec((1, N), lambda i: (0, 0)),
            ],
            out_specs=pl.BlockSpec((tm, N), lambda i: (i, 0)),
            compiler_params=pltpu.CompilerParams(
                dimension_semantics=("parallel",)
            ),
        )(x, w, b)

    # Whole problem in VMEM, single kernel invocation (no grid).
    return pl.pallas_call(
        kernel,
        out_shape=out_shape,
        in_specs=[pl.BlockSpec(memory_space=pltpu.MemorySpace.VMEM)] * 3,
        out_specs=pl.BlockSpec(memory_space=pltpu.MemorySpace.VMEM),
    )(x, w, b)


# ---------------------------------------------------------------------------
# Pallas kernel: fused FC head  3136 -> 512 -> 256 -> A.
# All three weight matrices live in VMEM (~3.5 MB bf16); the (B,512)/(B,256)
# intermediates never leave the kernel.  One launch instead of three.
# ---------------------------------------------------------------------------
def _fused_mlp_kernel(x_ref, w1_ref, b1_ref, w2_ref, b2_ref, w3_ref, b3_ref, o_ref):
    h = jnp.dot(x_ref[...], w1_ref[...], preferred_element_type=jnp.float32)
    h = jnp.maximum(h + b1_ref[...], 0.0).astype(w2_ref.dtype)
    h = jnp.dot(h, w2_ref[...], preferred_element_type=jnp.float32)
    h = jnp.maximum(h + b2_ref[...], 0.0).astype(w3_ref.dtype)
    h = jnp.dot(h, w3_ref[...], preferred_element_type=jnp.float32) + b3_ref[...]
    o_ref[...] = h.astype(o_ref.dtype)


def fused_mlp(x, fw1, fb1, fw2, fb2, fw3, fb3):
    B = x.shape[0]
    A = fw3.shape[1]
    return pl.pallas_call(
        _fused_mlp_kernel,
        out_shape=jax.ShapeDtypeStruct((B, A), jnp.float32),
        in_specs=[pl.BlockSpec(memory_space=pltpu.MemorySpace.VMEM)] * 7,
        out_specs=pl.BlockSpec(memory_space=pltpu.MemorySpace.VMEM),
    )(x, fw1, fb1, fw2, fb2, fw3, fb3)


# ---------------------------------------------------------------------------
# Conv2d (valid padding, stride s) = im2col (XLA glue, bf16) + Pallas GEMM.
# TODO(synk): patch extraction stays in XLA (no clean small-shape Pallas gather).
# ---------------------------------------------------------------------------
def _im2col(x_nhwc, kh, kw, stride):
    B, H, W, C = x_nhwc.shape
    oh = (H - kh) // stride + 1
    ow = (W - kw) // stride + 1
    patches = []
    for i in range(kh):
        for j in range(kw):
            patches.append(
                x_nhwc[:, i : i + stride * oh : stride, j : j + stride * ow : stride, :]
            )
    p = jnp.stack(patches, axis=3)                  # (B, oh, ow, kh*kw, C)
    return p.reshape(B * oh * ow, kh * kw * C), oh, ow


def conv2d_relu(x_nhwc, w_mat, b, *, kh, kw, stride, m_blocks=1):
    """x:(B,H,W,Cin) bf16, w_mat:(kh*kw*Cin, Cout) bf16, b:(1,Cout) f32."""
    B = x_nhwc.shape[0]
    patches, oh, ow = _im2col(x_nhwc, kh, kw, stride)
    cout = w_mat.shape[1]
    y = gemm_bias(patches, w_mat, b, relu=True,
                  out_dtype=jnp.bfloat16, m_blocks=m_blocks)
    return y.reshape(B, oh, ow, cout)


# ---------------------------------------------------------------------------
# Parameters: generated in PyTorch-convention shapes, then transformed ONCE at
# init into the kernel-friendly layout:
#   conv weights  (Cout,Cin,KH,KW) -> (KH*KW*Cin, Cout)  bf16
#   fc   weights  (out,in)         -> (in, out)           bf16
#   biases                         -> (1, N)              f32
# ---------------------------------------------------------------------------
def init_params(key, c_in, num_actions):
    ks = jax.random.split(key, 12)

    def w(k, shape, fan_in):
        return jax.random.normal(k, shape, jnp.float32) * (1.0 / jnp.sqrt(fan_in))

    w1 = w(ks[0], (32, c_in, 8, 8), c_in * 64)
    b1 = w(ks[1], (32,), c_in * 64)
    w2 = w(ks[2], (64, 32, 4, 4), 32 * 16)
    b2 = w(ks[3], (64,), 32 * 16)
    w3 = w(ks[4], (64, 64, 3, 3), 64 * 9)
    b3 = w(ks[5], (64,), 64 * 9)
    fw1 = w(ks[6], (512, 3136), 3136)
    fb1 = w(ks[7], (512,), 3136)
    fw2 = w(ks[8], (256, 512), 512)
    fb2 = w(ks[9], (256,), 512)
    fw3 = w(ks[10], (num_actions, 256), 256)
    fb3 = w(ks[11], (num_actions,), 256)

    def conv_w(w_oihw):
        co, ci, kh, kw = w_oihw.shape
        # (kh, kw, cin) -> cout ordering matches the im2col patch layout.
        return (jnp.transpose(w_oihw, (2, 3, 1, 0))
                .reshape(kh * kw * ci, co).astype(jnp.bfloat16))

    return {
        "w1": conv_w(w1), "b1": b1.reshape(1, -1),
        "w2": conv_w(w2), "b2": b2.reshape(1, -1),
        "w3": conv_w(w3), "b3": b3.reshape(1, -1),
        "fw1": fw1.T.astype(jnp.bfloat16), "fb1": fb1.reshape(1, -1),
        "fw2": fw2.T.astype(jnp.bfloat16), "fb2": fb2.reshape(1, -1),
        "fw3": fw3.T.astype(jnp.bfloat16), "fb3": fb3.reshape(1, -1),
    }


# ---------------------------------------------------------------------------
# Forward pass (matches PyTorch DQNNetworkVisual.forward semantics).
# ---------------------------------------------------------------------------
@jax.jit
def dqn_forward(x_nchw, params):
    B = x_nchw.shape[0]
    x = jnp.transpose(x_nchw, (0, 2, 3, 1)).astype(jnp.bfloat16)      # NCHW -> NHWC
    x = conv2d_relu(x, params["w1"], params["b1"],
                    kh=8, kw=8, stride=4, m_blocks=2)                 # (B,20,20,32)
    x = conv2d_relu(x, params["w2"], params["b2"],
                    kh=4, kw=4, stride=2)                             # (B, 9, 9,64)
    x = conv2d_relu(x, params["w3"], params["b3"],
                    kh=3, kw=3, stride=1)                             # (B, 7, 7,64)
    # nn.Flatten on NCHW: flatten in (C, H, W) order
    x = jnp.transpose(x, (0, 3, 1, 2)).reshape(B, -1)                 # (B, 3136) bf16
    return fused_mlp(x, params["fw1"], params["fb1"],
                     params["fw2"], params["fb2"],
                     params["fw3"], params["fb3"])                    # (B, A) f32


if __name__ == "__main__":
    # The Linear(3136, 512) layer pins the conv output to 7x7x64, which forces
    # 84x84 spatial input (standard Atari).  Keep batch / channels small.
    B, C_IN, H, W = 2, 4, 84, 84
    NUM_ACTIONS = 6

    key = jax.random.PRNGKey(0)
    k_x, k_p = jax.random.split(key)
    x = jax.random.normal(k_x, (B, C_IN, H, W), jnp.float32)
    params = init_params(k_p, C_IN, NUM_ACTIONS)

    q_values = dqn_forward(x, params)
    q_values = jax.block_until_ready(q_values)

    assert q_values.shape == (B, NUM_ACTIONS), q_values.shape
    assert q_values.dtype == jnp.float32
    assert bool(jnp.all(jnp.isfinite(q_values)))
    print("KERNEL_OK")
</pallas_src>

<mosaic_0001>
module attributes {stable_mosaic.version = 11 : i64} {
  func.func @_gemm_bias_kernel(%arg0: i32, %arg1: memref<400x256xbf16, #tpu.memory_space<vmem>>, %arg2: memref<256x32xbf16, #tpu.memory_space<vmem>>, %arg3: memref<1x32xf32, #tpu.memory_space<vmem>>, %arg4: memref<400x32xbf16, #tpu.memory_space<vmem>>) attributes {dimension_semantics = [#tpu.dimension_semantics<parallel>], iteration_bounds = array<i64: 2>, scalar_prefetch = 0 : i64, scratch_operands = 0 : i64, tpu.core_type = #tpu.core_type<tc>, window_params = [{transform_indices = @transform_0, window_bounds = array<i64: 400, 256>}, {pipeline_mode = #tpu.pipeline_mode<synchronous>, transform_indices = @transform_1, window_bounds = array<i64: 256, 32>}, {pipeline_mode = #tpu.pipeline_mode<synchronous>, transform_indices = @transform_2, window_bounds = array<i64: 1, 32>}, {transform_indices = @transform_3, window_bounds = array<i64: 400, 32>}]} {
    %c0 = arith.constant 0 : index
    %c0_0 = arith.constant 0 : index
    %0 = vector.load %arg1[%c0, %c0_0] : memref<400x256xbf16, #tpu.memory_space<vmem>>, vector<400x256xbf16>
    %c0_1 = arith.constant 0 : index
    %c0_2 = arith.constant 0 : index
    %1 = vector.load %arg2[%c0_1, %c0_2] : memref<256x32xbf16, #tpu.memory_space<vmem>>, vector<256x32xbf16>
    %cst = arith.constant dense<0.000000e+00> : vector<400x32xf32>
    %2 = tpu.matmul %0, %1, %cst {dimension_numbers = #tpu.dot_dimension_numbers<[1], [0], [0], [1], [0, 0, 1, 1], [], []>} : vector<400x256xbf16>, vector<256x32xbf16>, vector<400x32xf32> -> vector<400x32xf32>
    %c0_3 = arith.constant 0 : index
    %c0_4 = arith.constant 0 : index
    %3 = vector.load %arg3[%c0_3, %c0_4] : memref<1x32xf32, #tpu.memory_space<vmem>>, vector<1x32xf32>
    %4 = vector.broadcast %3 : vector<1x32xf32> to vector<400x32xf32>
    %5 = arith.addf %2, %4 : vector<400x32xf32>
    %cst_5 = arith.constant 0.000000e+00 : f32
    %6 = vector.broadcast %cst_5 : f32 to vector<400x32xf32>
    %7 = arith.maximumf %5, %6 : vector<400x32xf32>
    %8 = arith.truncf %7 : vector<400x32xf32> to vector<400x32xbf16>
    %c0_6 = arith.constant 0 : index
    %c0_7 = arith.constant 0 : index
    %9 = vector.load %arg4[%c0_6, %c0_7] : memref<400x32xbf16, #tpu.memory_space<vmem>>, vector<400x32xbf16>
    tpu.vector_store %arg4[%c0_6, %c0_7], %8 {strides = array<i32>} : memref<400x32xbf16, #tpu.memory_space<vmem>>, vector<400x32xbf16>,
    return
  }
  func.func @transform_0(%arg0: i32) -> (i32, i32) {
    %c0_i32 = arith.constant 0 : i32
    %c0_i32_0 = arith.constant 0 : i32
    return %arg0, %c0_i32 : i32, i32
  }
  func.func @transform_1(%arg0: i32) -> (i32, i32) {
    %c0_i32 = arith.constant 0 : i32
    %c0_i32_0 = arith.constant 0 : i32
    %c0_i32_1 = arith.constant 0 : i32
    return %c0_i32, %c0_i32_0 : i32, i32
  }
  func.func @transform_2(%arg0: i32) -> (i32, i32) {
    %c0_i32 = arith.constant 0 : i32
    %c0_i32_0 = arith.constant 0 : i32
    %c0_i32_1 = arith.constant 0 : i32
    return %c0_i32, %c0_i32_0 : i32, i32
  }
  func.func @transform_3(%arg0: i32) -> (i32, i32) {
    %c0_i32 = arith.constant 0 : i32
    %c0_i32_0 = arith.constant 0 : i32
    return %arg0, %c0_i32 : i32, i32
  }
}

module attributes {stable_mosaic.version = 11 : i64} {
  func.func @_gemm_bias_kernel(%arg0: memref<162x512xbf16, #tpu.memory_space<vmem>>, %arg1: memref<512x64xbf16, #tpu.memory_space<vmem>>, %arg2: memref<1x64xf32, #tpu.memory_space<vmem>>, %arg3: memref<162x64xbf16, #tpu.memory_space<vmem>>) attributes {dimension_semantics = [], scalar_prefetch = 0 : i64, scratch_operands = 0 : i64, tpu.core_type = #tpu.core_type<tc>} {
    %c0 = arith.constant 0 : index
    %c0_0 = arith.constant 0 : index
    %0 = vector.load %arg0[%c0, %c0_0] : memref<162x512xbf16, #tpu.memory_space<vmem>>, vector<162x512xbf16>
    %c0_1 = arith.constant 0 : index
    %c0_2 = arith.constant 0 : index
    %1 = vector.load %arg1[%c0_1, %c0_2] : memref<512x64xbf16, #tpu.memory_space<vmem>>, vector<512x64xbf16>
    %cst = arith.constant dense<0.000000e+00> : vector<162x64xf32>
    %2 = tpu.matmul %0, %1, %cst {dimension_numbers = #tpu.dot_dimension_numbers<[1], [0], [0], [1], [0, 0, 1, 1], [], []>} : vector<162x512xbf16>, vector<512x64xbf16>, vector<162x64xf32> -> vector<162x64xf32>
    %c0_3 = arith.constant 0 : index
    %c0_4 = arith.constant 0 : index
    %3 = vector.load %arg2[%c0_3, %c0_4] : memref<1x64xf32, #tpu.memory_space<vmem>>, vector<1x64xf32>
    %4 = vector.broadcast %3 : vector<1x64xf32> to vector<162x64xf32>
    %5 = arith.addf %2, %4 : vector<162x64xf32>
    %cst_5 = arith.constant 0.000000e+00 : f32
    %6 = vector.broadcast %cst_5 : f32 to vector<162x64xf32>
    %7 = arith.maximumf %5, %6 : vector<162x64xf32>
    %8 = arith.truncf %7 : vector<162x64xf32> to vector<162x64xbf16>
    %c0_6 = arith.constant 0 : index
    %c0_7 = arith.constant 0 : index
    %9 = vector.load %arg3[%c0_6, %c0_7] : memref<162x64xbf16, #tpu.memory_space<vmem>>, vector<162x64xbf16>
    tpu.vector_store %arg3[%c0_6, %c0_7], %8 {strides = array<i32>} : memref<162x64xbf16, #tpu.memory_space<vmem>>, vector<162x64xbf16>,
    return
  }
}

module attributes {stable_mosaic.version = 11 : i64} {
  func.func @_gemm_bias_kernel(%arg0: memref<98x576xbf16, #tpu.memory_space<vmem>>, %arg1: memref<576x64xbf16, #tpu.memory_space<vmem>>, %arg2: memref<1x64xf32, #tpu.memory_space<vmem>>, %arg3: memref<98x64xbf16, #tpu.memory_space<vmem>>) attributes {dimension_semantics = [], scalar_prefetch = 0 : i64, scratch_operands = 0 : i64, tpu.core_type = #tpu.core_type<tc>} {
    %c0 = arith.constant 0 : index
    %c0_0 = arith.constant 0 : index
    %0 = vector.load %arg0[%c0, %c0_0] : memref<98x576xbf16, #tpu.memory_space<vmem>>, vector<98x576xbf16>
    %c0_1 = arith.constant 0 : index
    %c0_2 = arith.constant 0 : index
    %1 = vector.load %arg1[%c0_1, %c0_2] : memref<576x64xbf16, #tpu.memory_space<vmem>>, vector<576x64xbf16>
    %cst = arith.constant dense<0.000000e+00> : vector<98x64xf32>
    %2 = tpu.matmul %0, %1, %cst {dimension_numbers = #tpu.dot_dimension_numbers<[1], [0], [0], [1], [0, 0, 1, 1], [], []>} : vector<98x576xbf16>, vector<576x64xbf16>, vector<98x64xf32> -> vector<98x64xf32>
    %c0_3 = arith.constant 0 : index
    %c0_4 = arith.constant 0 : index
    %3 = vector.load %arg2[%c0_3, %c0_4] : memref<1x64xf32, #tpu.memory_space<vmem>>, vector<1x64xf32>
    %4 = vector.broadcast %3 : vector<1x64xf32> to vector<98x64xf32>
    %5 = arith.addf %2, %4 : vector<98x64xf32>
    %cst_5 = arith.constant 0.000000e+00 : f32
    %6 = vector.broadcast %cst_5 : f32 to vector<98x64xf32>
    %7 = arith.maximumf %5, %6 : vector<98x64xf32>
    %8 = arith.truncf %7 : vector<98x64xf32> to vector<98x64xbf16>
    %c0_6 = arith.constant 0 : index
    %c0_7 = arith.constant 0 : index
    %9 = vector.load %arg3[%c0_6, %c0_7] : memref<98x64xbf16, #tpu.memory_space<vmem>>, vector<98x64xbf16>
    tpu.vector_store %arg3[%c0_6, %c0_7], %8 {strides = array<i32>} : memref<98x64xbf16, #tpu.memory_space<vmem>>, vector<98x64xbf16>,
    return
  }
}

module attributes {stable_mosaic.version = 11 : i64} {
  func.func @_fused_mlp_kernel(%arg0: memref<2x3136xbf16, #tpu.memory_space<vmem>>, %arg1: memref<3136x512xbf16, #tpu.memory_space<vmem>>, %arg2: memref<1x512xf32, #tpu.memory_space<vmem>>, %arg3: memref<512x256xbf16, #tpu.memory_space<vmem>>, %arg4: memref<1x256xf32, #tpu.memory_space<vmem>>, %arg5: memref<256x6xbf16, #tpu.memory_space<vmem>>, %arg6: memref<1x6xf32, #tpu.memory_space<vmem>>, %arg7: memref<2x6xf32, #tpu.memory_space<vmem>>) attributes {dimension_semantics = [], scalar_prefetch = 0 : i64, scratch_operands = 0 : i64, tpu.core_type = #tpu.core_type<tc>} {
    %c0 = arith.constant 0 : index
    %c0_0 = arith.constant 0 : index
    %0 = vector.load %arg0[%c0, %c0_0] : memref<2x3136xbf16, #tpu.memory_space<vmem>>, vector<2x3136xbf16>
    %c0_1 = arith.constant 0 : index
    %c0_2 = arith.constant 0 : index
    %1 = vector.load %arg1[%c0_1, %c0_2] : memref<3136x512xbf16, #tpu.memory_space<vmem>>, vector<3136x512xbf16>
    %cst = arith.constant dense<0.000000e+00> : vector<2x512xf32>
    %2 = tpu.matmul %0, %1, %cst {dimension_numbers = #tpu.dot_dimension_numbers<[1], [0], [0], [1], [0, 0, 1, 1], [], []>} : vector<2x3136xbf16>, vector<3136x512xbf16>, vector<2x512xf32> -> vector<2x512xf32>
    %c0_3 = arith.constant 0 : index
    %c0_4 = arith.constant 0 : index
    %3 = vector.load %arg2[%c0_3, %c0_4] : memref<1x512xf32, #tpu.memory_space<vmem>>, vector<1x512xf32>
    %4 = vector.broadcast %3 : vector<1x512xf32> to vector<2x512xf32>
    %5 = arith.addf %2, %4 : vector<2x512xf32>
    %cst_5 = arith.constant 0.000000e+00 : f32
    %6 = vector.broadcast %cst_5 : f32 to vector<2x512xf32>
    %7 = arith.maximumf %5, %6 : vector<2x512xf32>
    %8 = arith.truncf %7 : vector<2x512xf32> to vector<2x512xbf16>
    %c0_6 = arith.constant 0 : index
    %c0_7 = arith.constant 0 : index
    %9 = vector.load %arg3[%c0_6, %c0_7] : memref<512x256xbf16, #tpu.memory_space<vmem>>, vector<512x256xbf16>
    %cst_8 = arith.constant dense<0.000000e+00> : vector<2x256xf32>
    %10 = tpu.matmul %8, %9, %cst_8 {dimension_numbers = #tpu.dot_dimension_numbers<[1], [0], [0], [1], [0, 0, 1, 1], [], []>} : vector<2x512xbf16>, vector<512x256xbf16>, vector<2x256xf32> -> vector<2x256xf32>
    %c0_9 = arith.constant 0 : index
    %c0_10 = arith.constant 0 : index
    %11 = vector.load %arg4[%c0_9, %c0_10] : memref<1x256xf32, #tpu.memory_space<vmem>>, vector<1x256xf32>
    %12 = vector.broadcast %11 : vector<1x256xf32> to vector<2x256xf32>
    %13 = arith.addf %10, %12 : vector<2x256xf32>
    %cst_11 = arith.constant 0.000000e+00 : f32
    %14 = vector.broadcast %cst_11 : f32 to vector<2x256xf32>
    %15 = arith.maximumf %13, %14 : vector<2x256xf32>
    %16 = arith.truncf %15 : vector<2x256xf32> to vector<2x256xbf16>
    %c0_12 = arith.constant 0 : index
    %c0_13 = arith.constant 0 : index
    %17 = vector.load %arg5[%c0_12, %c0_13] : memref<256x6xbf16, #tpu.memory_space<vmem>>, vector<256x6xbf16>
    %cst_14 = arith.constant dense<0.000000e+00> : vector<2x6xf32>
    %18 = tpu.matmul %16, %17, %cst_14 {dimension_numbers = #tpu.dot_dimension_numbers<[1], [0], [0], [1], [0, 0, 1, 1], [], []>} : vector<2x256xbf16>, vector<256x6xbf16>, vector<2x6xf32> -> vector<2x6xf32>
    %c0_15 = arith.constant 0 : index
    %c0_16 = arith.constant 0 : index
    %19 = vector.load %arg6[%c0_15, %c0_16] : memref<1x6xf32, #tpu.memory_space<vmem>>, vector<1x6xf32>
    %20 = vector.broadcast %19 : vector<1x6xf32> to vector<2x6xf32>
    %21 = arith.addf %18, %20 : vector<2x6xf32>
    %c0_17 = arith.constant 0 : index
    %c0_18 = arith.constant 0 : index
    %22 = vector.load %arg7[%c0_17, %c0_18] : memref<2x6xf32, #tpu.memory_space<vmem>>, vector<2x6xf32>
    tpu.vector_store %arg7[%c0_17, %c0_18], %21 {strides = array<i32>} : memref<2x6xf32, #tpu.memory_space<vmem>>, vector<2x6xf32>,
    return
  }
}

</mosaic_0001>

<bundles_post_ra>
// kernel: dqn_forward.4
= control target key start
LH: loop header
LB: loop body
LE: loop exit
PB: predicated region body
PF: predicated region fallthrough
CT: control target
= control target key end

     0   :  { %s1542_s12 = smov 0   ;;  %s1852_s0 = inlined_call_operand.vmem [shape: bf16[800,256], index: 0, kind: input, shape index: {}]   ;;  %s1853_s1 = inlined_call_operand.vmem [shape: bf16[256,32], index: 1, kind: input, shape index: {}]   ;;  %s1854_s2 = inlined_call_operand.vmem [shape: f32[1,32], index: 2, kind: input, shape index: {}]   ;;  %s1855_s3 = inlined_call_operand.vmem [shape: bf16[800,32], index: 3, kind: output, shape index: {}]  }
   0x1 LB: > { %s1203_s13 = sadd.s32 4294967295, %s1519_s12   ;;  %p1207_p0 = scmp.ge.s32.totalorder %s1519_s12, 1  ;;  %s1519_s12 = sphi %s1542_s12, %s13_s12  }
   0x2   : > { %p139_p1 = scmp.lt.s32.totalorder %s1519_s12, 3 }
   0x4   : > { %p140_p2 = pnand %p1207_p0, %p139_p1 }
   0x5   : > { %v1422_v0 = vld [vmem:[%s1853_s1] sm:$0xff] (!%p140_p2)   ;;  %v1521_v1 = vmov (!%p140_p2), 0   ;;  %s164_s16 = smul.u32 (!%p140_p2), 50, %s1203_s13  ;;  %v1423_v2 = vld [vmem:[%s1853_s1 + $0x8] sm:$0xff] (!%p140_p2)   ;;  %v1424_v3 = vld [vmem:[%s1853_s1 + $0x10] sm:$0xff] (!%p140_p2)   ;;  %vm1096_vm0 = vcmask (!%p140_p2), 257024  }
   0x6   : > { %143 = sbr.rel (%p140_p2) target bundleno = 387 (0x183), region = 32  ;;  %613 = vmatprep.subr.bf16.mxu0 (!%p140_p2), %v1521_v1  ;;  %1381 = vmatprep.subr.bf16.mxu1 (!%p140_p2), %v1521_v1  ;;  %v1425_v4 = vld [vmem:[%s1853_s1 + $0x18] sm:$0xff] (!%p140_p2)   ;;  %v1426_v5 = vld [vmem:[%s1853_s1 + $0x20] sm:$0xff] (!%p140_p2)   ;;  %v1427_v7 = vld [vmem:[%s1853_s1 + $0x28] sm:$0xff] (!%p140_p2)  }
   0x7   : > { %614 = vmatpush1.bf16.msra.mxu0 (!%p140_p2), %v1422_v0  ;;  %1397 = vmatpush1.bf16.msra.mxu1 (!%p140_p2), %v1422_v0  ;;  %p165_p3 = scmp.lt.s32.totalorder (!%p140_p2), %s164_s16, 99  ;;  %v1428_v9 = vld [vmem:[%s1853_s1 + $0x30] sm:$0xff] (!%p140_p2)   ;;  %v1429_v10 = vld [vmem:[%s1853_s1 + $0x38] sm:$0xff] (!%p140_p2)   ;;  %v1430_v11 = vld [vmem:[%s1853_s1 + $0x40] sm:$0xff] (!%p140_p2)  }
   0x8   : > { %615 = vmatprep.subr.bf16.mxu0 (!%p140_p2), %v1521_v1  ;;  %1382 = vmatprep.subr.bf16.mxu1 (!%p140_p2), %v1521_v1  ;;  %v1431_v12 = vld [vmem:[%s1853_s1 + $0x48] sm:$0xff] (!%p140_p2)   ;;  %v1432_v13 = vld [vmem:[%s1853_s1 + $0x50] sm:$0xff] (!%p140_p2)   ;;  %v1433_v14 = vld [vmem:[%s1853_s1 + $0x58] sm:$0xff] (!%p140_p2)  }
   0x9   : > { %v1434_v15 = vld [vmem:[%s1853_s1 + $0x60] sm:$0xff] (!%p140_p2)   ;;  %v1435_v16 = vld [vmem:[%s1853_s1 + $0x68] sm:$0xff] (!%p140_p2)   ;;  %v1436_v17 = vld [vmem:[%s1853_s1 + $0x70] sm:$0xff] (!%p140_p2)  }
   0xa   : > { %v1437_v18 = vld [vmem:[%s1853_s1 + $0x78] sm:$0xff] (!%p140_p2)  }
   0xb   : > { %616 = vmatpush1.bf16.msra.mxu0 (!%p140_p2), %v1423_v2  ;;  %1398 = vmatpush1.bf16.msra.mxu1 (!%p140_p2), %v1423_v2 }
   0xc   : > { %617 = vmatprep.subr.bf16.mxu0 (!%p140_p2), %v1521_v1  ;;  %1383 = vmatprep.subr.bf16.mxu1 (!%p140_p2), %v1521_v1 }
   0xd   : > { %s1857_s16 = smov (!%p165_p3, %s164_s16), 99 }
   0xe   : > { %s1330_s23 = sshll.u32 %s1857_s16, 3  ;;  %s1210_s29 = sshll.u32 %s1857_s16, 2 }
   0xf   : > { %618 = vmatpush1.bf16.msra.mxu0 %v1424_v3  ;;  %1399 = vmatpush1.bf16.msra.mxu1 %v1424_v3  ;;  %s1579_s28 = scalar_lea.vmem %s1852_s0, %s1330_s23  ;;  %v1691_v3 = vld [vmem:[%s1854_s2] ss:$0 sm:$0xff]  ;;  %s1701_s16 = scalar_lea.vmem %s1855_s3, %s1210_s29 }
  0x10   : > { %619 = vmatprep.subr.bf16.mxu0 %v1521_v1  ;;  %1384 = vmatprep.subr.bf16.mxu1 %v1521_v1  ;;  %v1440_v6 = vld [vmem:[%s1579_s28 + $0x4] ss:$8 sps:$4 sm:$0xff]   ;;  %v1443_v8 = vld [vmem:[%s1579_s28 + $0xd4] ss:$8 sps:$4 sm:$0xff]   ;;  %v1438_v19 = vld [vmem:[%s1579_s28] ss:$8 sps:$4 sm:$0xff]  }
  0x11   : > { %645 = vmatprep.mubr.bf16.mxu0 %v1440_v6  ;;  %749 = vmatprep.mubr.bf16.mxu1 %v1443_v8  ;;  %v1441_v20 = vld [vmem:[%s1579_s28 + $0xd0] ss:$8 sps:$4 sm:$0xff]   ;;  %v1444_v21 = vld [vmem:[%s1579_s28 + $0x14] ss:$8 sps:$4 sm:$0xff]   ;;  %v1447_v22 = vld [vmem:[%s1579_s28 + $0xe4] ss:$8 sps:$4 sm:$0xff]  }
  0x12   : > { %v1446_v23 = vld [vmem:[%s1579_s28 + $0x10] ss:$8 sps:$4 sm:$0xff]   ;;  %v1449_v24 = vld [vmem:[%s1579_s28 + $0xe0] ss:$8 sps:$4 sm:$0xff]   ;;  %v1450_v25 = vld [vmem:[%s1579_s28 + $0x24] ss:$8 sps:$4 sm:$0xff]  }
  0x13   : > { %620 = vmatpush1.bf16.msra.mxu0 %v1425_v4  ;;  %1400 = vmatpush1.bf16.msra.mxu1 %v1425_v4  ;;  %v1453_v26 = vld [vmem:[%s1579_s28 + $0xf4] ss:$8 sps:$4 sm:$0xff]   ;;  %v1452_v27 = vld [vmem:[%s1579_s28 + $0x20] ss:$8 sps:$4 sm:$0xff]   ;;  %v1455_v28 = vld [vmem:[%s1579_s28 + $0xf0] ss:$8 sps:$4 sm:$0xff]  }
  0x14   : > { %621 = vmatprep.subr.bf16.mxu0 %v1521_v1  ;;  %1385 = vmatprep.subr.bf16.mxu1 %v1521_v1  ;;  %v1456_v29 = vld [vmem:[%s1579_s28 + $0x34] ss:$8 sps:$4 sm:$0xff]   ;;  %v1459_v30 = vld [vmem:[%s1579_s28 + $0x104] ss:$8 sps:$4 sm:$0xff]   ;;  %v1458_v31 = vld [vmem:[%s1579_s28 + $0x30] ss:$8 sps:$4 sm:$0xff]  }
  0x15   : > { %v1461_v32 = vld [vmem:[%s1579_s28 + $0x100] ss:$8 sps:$4 sm:$0xff]   ;;  %v1462_v33 = vld [vmem:[%s1579_s28 + $0x44] ss:$8 sps:$4 sm:$0xff]   ;;  %v1465_v34 = vld [vmem:[%s1579_s28 + $0x114] ss:$8 sps:$4 sm:$0xff]  }
  0x16   : > { %v1464_v35 = vld [vmem:[%s1579_s28 + $0x40] ss:$8 sps:$4 sm:$0xff]   ;;  %v1467_v36 = vld [vmem:[%s1579_s28 + $0x110] ss:$8 sps:$4 sm:$0xff]   ;;  %v1468_v37 = vld [vmem:[%s1579_s28 + $0x54] ss:$8 sps:$4 sm:$0xff]  }
  0x17   : > { %622 = vmatpush1.bf16.msra.mxu0 %v1426_v5  ;;  %1401 = vmatpush1.bf16.msra.mxu1 %v1426_v5  ;;  %v1471_v38 = vld [vmem:[%s1579_s28 + $0x124] ss:$8 sps:$4 sm:$0xff]   ;;  %v1470_v39 = vld [vmem:[%s1579_s28 + $0x50] ss:$8 sps:$4 sm:$0xff]   ;;  %v1473_v40 = vld [vmem:[%s1579_s28 + $0x120] ss:$8 sps:$4 sm:$0xff]  }
  0x18   : > { %623 = vmatprep.subr.bf16.mxu0 %v1521_v1  ;;  %1386 = vmatprep.subr.bf16.mxu1 %v1521_v1  ;;  %v1474_v41 = vld [vmem:[%s1579_s28 + $0x64] ss:$8 sps:$4 sm:$0xff]   ;;  %v1477_v42 = vld [vmem:[%s1579_s28 + $0x134] ss:$8 sps:$4 sm:$0xff]   ;;  %v1476_v43 = vld [vmem:[%s1579_s28 + $0x60] ss:$8 sps:$4 sm:$0xff]  }
  0x19   : > { %v1479_v44 = vld [vmem:[%s1579_s28 + $0x130] ss:$8 sps:$4 sm:$0xff]   ;;  %v1480_v45 = vld [vmem:[%s1579_s28 + $0x74] ss:$8 sps:$4 sm:$0xff]   ;;  %v1483_v46 = vld [vmem:[%s1579_s28 + $0x144] ss:$8 sps:$4 sm:$0xff]  }
  0x1a   : > { %v1482_v47 = vld [vmem:[%s1579_s28 + $0x70] ss:$8 sps:$4 sm:$0xff]   ;;  %v1485_v48 = vld [vmem:[%s1579_s28 + $0x140] ss:$8 sps:$4 sm:$0xff]   ;;  %v1486_v49 = vld [vmem:[%s1579_s28 + $0x84] ss:$8 sps:$4 sm:$0xff]  }
  0x1b   : > { %624 = vmatpush1.bf16.msra.mxu0 %v1427_v7  ;;  %1402 = vmatpush1.bf16.msra.mxu1 %v1427_v7  ;;  %v1489_v50 = vld [vmem:[%s1579_s28 + $0x154] ss:$8 sps:$4 sm:$0xff]   ;;  %v1488_v51 = vld [vmem:[%s1579_s28 + $0x80] ss:$8 sps:$4 sm:$0xff]   ;;  %v1491_v52 = vld [vmem:[%s1579_s28 + $0x150] ss:$8 sps:$4 sm:$0xff]  }
  0x1c   : > { %625 = vmatprep.subr.bf16.mxu0 %v1521_v1  ;;  %1387 = vmatprep.subr.bf16.mxu1 %v1521_v1  ;;  %v1492_v53 = vld [vmem:[%s1579_s28 + $0x94] ss:$8 sps:$4 sm:$0xff]   ;;  %v1495_v54 = vld [vmem:[%s1579_s28 + $0x164] ss:$8 sps:$4 sm:$0xff]   ;;  %v1494_v55 = vld [vmem:[%s1579_s28 + $0x90] ss:$8 sps:$4 sm:$0xff]  }
  0x1d   : > { %v1497_v56 = vld [vmem:[%s1579_s28 + $0x160] ss:$8 sps:$4 sm:$0xff]   ;;  %v1498_v57 = vld [vmem:[%s1579_s28 + $0xa4] ss:$8 sps:$4 sm:$0xff]   ;;  %v1501_v58 = vld [vmem:[%s1579_s28 + $0x174] ss:$8 sps:$4 sm:$0xff]  }
  0x1e   : > { %v1500_v59 = vld [vmem:[%s1579_s28 + $0xa0] ss:$8 sps:$4 sm:$0xff]   ;;  %v1503_v60 = vld [vmem:[%s1579_s28 + $0x170] ss:$8 sps:$4 sm:$0xff]   ;;  %v1504_v61 = vld [vmem:[%s1579_s28 + $0xb4] ss:$8 sps:$4 sm:$0xff]  }
  0x1f   : > { %626 = vmatpush1.bf16.msra.mxu0 %v1428_v9  ;;  %1403 = vmatpush1.bf16.msra.mxu1 %v1428_v9  ;;  %v1507_v62 = vld [vmem:[%s1579_s28 + $0x184] ss:$8 sps:$4 sm:$0xff]   ;;  %v1506_v63 = vld [vmem:[%s1579_s28 + $0xb0] ss:$8 sps:$4 sm:$0xff]   ;;  %v1509_v0 = vld [vmem:[%s1579_s28 + $0x180] ss:$8 sps:$4 sm:$0xff]  }
  0x20   : > { %627 = vmatprep.subr.bf16.mxu0 %v1521_v1  ;;  %1388 = vmatprep.subr.bf16.mxu1 %v1521_v1  ;;  %v1512_v2 = vld [vmem:[%s1579_s28 + $0xc0] ss:$8 sps:$4 sm:$0xff]  }
  0x23   : > { %628 = vmatpush1.bf16.msra.mxu0 %v1429_v10  ;;  %1404 = vmatpush1.bf16.msra.mxu1 %v1429_v10 }
  0x24   : > { %629 = vmatprep.subr.bf16.mxu0 %v1521_v1  ;;  %1389 = vmatprep.subr.bf16.mxu1 %v1521_v1 }
  0x27   : > { %630 = vmatpush1.bf16.msra.mxu0 %v1430_v11  ;;  %1405 = vmatpush1.bf16.msra.mxu1 %v1430_v11 }
  0x28   : > { %631 = vmatprep.subr.bf16.mxu0 %v1521_v1  ;;  %1390 = vmatprep.subr.bf16.mxu1 %v1521_v1 }
  0x2b   : > { %632 = vmatpush1.bf16.msra.mxu0 %v1431_v12  ;;  %1406 = vmatpush1.bf16.msra.mxu1 %v1431_v12 }
  0x2c   : > { %633 = vmatprep.subr.bf16.mxu0 %v1521_v1  ;;  %1391 = vmatprep.subr.bf16.mxu1 %v1521_v1 }
  0x2f   : > { %634 = vmatpush1.bf16.msra.mxu0 %v1432_v13  ;;  %1407 = vmatpush1.bf16.msra.mxu1 %v1432_v13 }
  0x30   : > { %635 = vmatprep.subr.bf16.mxu0 %v1521_v1  ;;  %1392 = vmatprep.subr.bf16.mxu1 %v1521_v1 }
  0x33   : > { %636 = vmatpush1.bf16.msra.mxu0 %v1433_v14  ;;  %1408 = vmatpush1.bf16.msra.mxu1 %v1433_v14 }
  0x34   : > { %637 = vmatprep.subr.bf16.mxu0 %v1521_v1  ;;  %1393 = vmatprep.subr.bf16.mxu1 %v1521_v1 }
  0x37   : > { %638 = vmatpush1.bf16.msra.mxu0 %v1434_v15  ;;  %1409 = vmatpush1.bf16.msra.mxu1 %v1434_v15 }
  0x38   : > { %639 = vmatprep.subr.bf16.mxu0 %v1521_v1  ;;  %1394 = vmatprep.subr.bf16.mxu1 %v1521_v1 }
  0x3b   : > { %640 = vmatpush1.bf16.msra.mxu0 %v1435_v16  ;;  %1410 = vmatpush1.bf16.msra.mxu1 %v1435_v16 }
  0x3c   : > { %641 = vmatprep.subr.bf16.mxu0 %v1521_v1  ;;  %1395 = vmatprep.subr.bf16.mxu1 %v1521_v1 }
  0x3f   : > { %642 = vmatpush1.bf16.msra.mxu0 %v1436_v17  ;;  %1411 = vmatpush1.bf16.msra.mxu1 %v1436_v17 }
  0x40   : > { %643 = vmatprep.subr.bf16.mxu0 %v1521_v1  ;;  %1396 = vmatprep.subr.bf16.mxu1 %v1521_v1  ;;  %v1510_v1 = vld [vmem:[%s1579_s28 + $0xc4] ss:$8 sps:$4 sm:$0xff]  }
  0x43   : > { %644 = vmatpush1.bf16.msra.mxu0 %v1437_v18  ;;  %1412 = vmatpush1.bf16.msra.mxu1 %v1437_v18 }
  0x46   : > { %646 = vmatmul.mubr.bf16.vlgmr.msra.gmra.mrb[0].mxu0 %v1438_v19  ;;  %750 = vmatmul.mubr.bf16.vlgmr.msra.gmra.mrb[0].mxu1 %v1441_v20 }
  0x47   : > { %653 = vmatprep.mubr.bf16.mxu0 %v1444_v21  ;;  %757 = vmatprep.mubr.bf16.mxu1 %v1447_v22 }
  0x4e   : > { %654 = vmatmul.mubr.bf16.gmra.mrb[4].mxu0 %v1446_v23  ;;  %758 = vmatmul.mubr.bf16.gmra.mrb[4].mxu1 %v1449_v24 }
  0x4f   : > { %661 = vmatprep.mubr.bf16.mxu0 %v1450_v25  ;;  %765 = vmatprep.mubr.bf16.mxu1 %v1453_v26 }
  0x56   : > { %662 = vmatmul.mubr.bf16.gmra.mrb[8].mxu0 %v1452_v27  ;;  %766 = vmatmul.mubr.bf16.gmra.mrb[8].mxu1 %v1455_v28 }
  0x57   : > { %669 = vmatprep.mubr.bf16.mxu0 %v1456_v29  ;;  %773 = vmatprep.mubr.bf16.mxu1 %v1459_v30 }
  0x5e   : > { %670 = vmatmul.mubr.bf16.gmra.mrb[12].mxu0 %v1458_v31  ;;  %774 = vmatmul.mubr.bf16.gmra.mrb[12].mxu1 %v1461_v32 }
  0x5f   : > { %677 = vmatprep.mubr.bf16.mxu0 %v1462_v33  ;;  %781 = vmatprep.mubr.bf16.mxu1 %v1465_v34 }
  0x66   : > { %678 = vmatmul.mubr.bf16.gmra.mrb[16].mxu0 %v1464_v35  ;;  %782 = vmatmul.mubr.bf16.gmra.mrb[16].mxu1 %v1467_v36 }
  0x67   : > { %685 = vmatprep.mubr.bf16.mxu0 %v1468_v37  ;;  %789 = vmatprep.mubr.bf16.mxu1 %v1471_v38 }
  0x6e   : > { %686 = vmatmul.mubr.bf16.gmra.mrb[20].mxu0 %v1470_v39  ;;  %790 = vmatmul.mubr.bf16.gmra.mrb[20].mxu1 %v1473_v40 }
  0x6f   : > { %693 = vmatprep.mubr.bf16.mxu0 %v1474_v41  ;;  %797 = vmatprep.mubr.bf16.mxu1 %v1477_v42 }
  0x76   : > { %694 = vmatmul.mubr.bf16.gmra.mrb[24].mxu0 %v1476_v43  ;;  %798 = vmatmul.mubr.bf16.gmra.mrb[24].mxu1 %v1479_v44 }
  0x77   : > { %701 = vmatprep.mubr.bf16.mxu0 %v1480_v45  ;;  %805 = vmatprep.mubr.bf16.mxu1 %v1483_v46 }
  0x7e   : > { %702 = vmatmul.mubr.bf16.gmra.mrb[28].mxu0 %v1482_v47  ;;  %806 = vmatmul.mubr.bf16.gmra.mrb[28].mxu1 %v1485_v48 }
  0x7f   : > { %709 = vmatprep.mubr.bf16.mxu0 %v1486_v49  ;;  %813 = vmatprep.mubr.bf16.mxu1 %v1489_v50 }
  0x86   : > { %710 = vmatmul.mubr.bf16.gmra.mrb[32].mxu0 %v1488_v51  ;;  %814 = vmatmul.mubr.bf16.gmra.mrb[32].mxu1 %v1491_v52 }
  0x87   : > { %717 = vmatprep.mubr.bf16.mxu0 %v1492_v53  ;;  %821 = vmatprep.mubr.bf16.mxu1 %v1495_v54 }
  0x8e   : > { %718 = vmatmul.mubr.bf16.gmra.mrb[36].mxu0 %v1494_v55  ;;  %822 = vmatmul.mubr.bf16.gmra.mrb[36].mxu1 %v1497_v56 }
  0x8f   : > { %725 = vmatprep.mubr.bf16.mxu0 %v1498_v57  ;;  %829 = vmatprep.mubr.bf16.mxu1 %v1501_v58 }
  0x96   : > { %726 = vmatmul.mubr.bf16.gmra.mrb[40].mxu0 %v1500_v59  ;;  %830 = vmatmul.mubr.bf16.gmra.mrb[40].mxu1 %v1503_v60 }
  0x97   : > { %733 = vmatprep.mubr.bf16.mxu0 %v1504_v61  ;;  %837 = vmatprep.mubr.bf16.mxu1 %v1507_v62 }
  0x9e   : > { %734 = vmatmul.mubr.bf16.gmra.mrb[44].mxu0 %v1506_v63  ;;  %838 = vmatmul.mubr.bf16.gmra.mrb[44].mxu1 %v1509_v0 }
  0x9f   : > { %741 = vmatprep.mubr.bf16.mxu0 %v1510_v1 }
  0xa6   : > { %742 = vmatmul.mubr.bf16.gmra.mrb[48].mxu0 %v1512_v2 }
 0x119   : > { %v647_v4 = vpop.f32.mrb[0].mxu0  ;;  %v751_v5 = vpop.f32.mrb[0].mxu1 }
 0x11a   : > { %v648_v6 = vadd.f32 %v1691_v3, %v647_v4  ;;  %v649_v7 = vpop.f32.mrb[1].mxu0  ;;  %v752_v8 = vadd.f32 %v1691_v3, %v751_v5  ;;  %v753_v9 = vpop.f32.mrb[1].mxu1 }
 0x11b   : > { %v650_v10 = vpop.f32.mrb[2].mxu0  ;;  %v754_v11 = vpop.f32.mrb[2].mxu1 }
 0x11c   : > { %v846_v12 = vmax.f32 %v648_v6, 0.0  ;;  %v651_v13 = vadd.f32 %v1691_v3, %v650_v10  ;;  %v652_v14 = vpop.f32.mrb[3].mxu0  ;;  %v872_v15 = vmax.f32 %v752_v8, 0.0  ;;  %v755_v16 = vadd.f32 %v1691_v3, %v754_v11  ;;  %v756_v17 = vpop.f32.mrb[3].mxu1 }
 0x11e   : > { %v1331_v18 = vpack.c.bf16 %v846_v12, %v846_v12  ;;  %v847_v19 = vmax.f32 %v651_v13, 0.0  ;;  %v1357_v20 = vpack.c.bf16 %v872_v15, %v872_v15  ;;  %v873_v21 = vmax.f32 %v755_v16, 0.0 }
 0x120   : > { %1097 = vst.msk [vmem:[%s1701_s16] sm:$0xf] %vm1096_vm0, %v1331_v18  ;;  %v1332_v22 = vpack.c.bf16 %v847_v19, %v847_v19  ;;  %1123 = vst.msk [vmem:[%s1701_s16 + $0x68] sm:$0xf] %vm1096_vm0, %v1357_v20  ;;  %v1358_v23 = vpack.c.bf16 %v873_v21, %v873_v21 }
 0x121   : > { %v655_v24 = vpop.f32.mrb[4].mxu0  ;;  %v759_v25 = vpop.f32.mrb[4].mxu1 }
 0x122   : > { %1098 = vst.msk [vmem:[%s1701_s16 + $0x4] sm:$0xf] %vm1096_vm0, %v1332_v22  ;;  %1124 = vst.msk [vmem:[%s1701_s16 + $0x6c] sm:$0xf] %vm1096_vm0, %v1358_v23  ;;  %v656_v26 = vadd.f32 %v1691_v3, %v655_v24  ;;  %v657_v27 = vpop.f32.mrb[5].mxu0  ;;  %v760_v28 = vadd.f32 %v1691_v3, %v759_v25  ;;  %v761_v29 = vpop.f32.mrb[5].mxu1 }
 0x123   : > { %v658_v30 = vpop.f32.mrb[6].mxu0  ;;  %v762_v31 = vpop.f32.mrb[6].mxu1 }
 0x124   : > { %v848_v32 = vmax.f32 %v656_v26, 0.0  ;;  %v659_v33 = vadd.f32 %v1691_v3, %v658_v30  ;;  %v660_v34 = vpop.f32.mrb[7].mxu0  ;;  %v874_v35 = vmax.f32 %v760_v28, 0.0  ;;  %v763_v36 = vadd.f32 %v1691_v3, %v762_v31  ;;  %v764_v37 = vpop.f32.mrb[7].mxu1 }
 0x126   : > { %v1333_v38 = vpack.c.bf16 %v848_v32, %v848_v32  ;;  %v849_v39 = vmax.f32 %v659_v33, 0.0  ;;  %v1359_v40 = vpack.c.bf16 %v874_v35, %v874_v35  ;;  %v875_v41 = vmax.f32 %v763_v36, 0.0 }
 0x128   : > { %1099 = vst.msk [vmem:[%s1701_s16 + $0x8] sm:$0xf] %vm1096_vm0, %v1333_v38  ;;  %v1334_v42 = vpack.c.bf16 %v849_v39, %v849_v39  ;;  %1125 = vst.msk [vmem:[%s1701_s16 + $0x70] sm:$0xf] %vm1096_vm0, %v1359_v40  ;;  %v1360_v43 = vpack.c.bf16 %v875_v41, %v875_v41 }
 0x129   : > { %v663_v44 = vpop.f32.mrb[8].mxu0  ;;  %v767_v45 = vpop.f32.mrb[8].mxu1 }
 0x12a   : > { %1100 = vst.msk [vmem:[%s1701_s16 + $0xc] sm:$0xf] %vm1096_vm0, %v1334_v42  ;;  %1126 = vst.msk [vmem:[%s1701_s16 + $0x74] sm:$0xf] %vm1096_vm0, %v1360_v43  ;;  %v664_v46 = vadd.f32 %v1691_v3, %v663_v44  ;;  %v665_v47 = vpop.f32.mrb[9].mxu0  ;;  %v768_v48 = vadd.f32 %v1691_v3, %v767_v45  ;;  %v769_v49 = vpop.f32.mrb[9].mxu1 }
 0x12b   : > { %v666_v50 = vpop.f32.mrb[10].mxu0  ;;  %v770_v51 = vpop.f32.mrb[10].mxu1 }
 0x12c   : > { %v850_v52 = vmax.f32 %v664_v46, 0.0  ;;  %v667_v53 = vadd.f32 %v1691_v3, %v666_v50  ;;  %v668_v54 = vpop.f32.mrb[11].mxu0  ;;  %v876_v55 = vmax.f32 %v768_v48, 0.0  ;;  %v771_v56 = vadd.f32 %v1691_v3, %v770_v51  ;;  %v772_v57 = vpop.f32.mrb[11].mxu1 }
 0x12e   : > { %v1335_v58 = vpack.c.bf16 %v850_v52, %v850_v52  ;;  %v851_v59 = vmax.f32 %v667_v53, 0.0  ;;  %v1361_v60 = vpack.c.bf16 %v876_v55, %v876_v55  ;;  %v877_v61 = vmax.f32 %v771_v56, 0.0 }
 0x130   : > { %1101 = vst.msk [vmem:[%s1701_s16 + $0x10] sm:$0xf] %vm1096_vm0, %v1335_v58  ;;  %v1336_v62 = vpack.c.bf16 %v851_v59, %v851_v59  ;;  %1127 = vst.msk [vmem:[%s1701_s16 + $0x78] sm:$0xf] %vm1096_vm0, %v1361_v60  ;;  %v1362_v63 = vpack.c.bf16 %v877_v61, %v877_v61 }
 0x131   : > { %v671_v0 = vpop.f32.mrb[12].mxu0  ;;  %v775_v1 = vpop.f32.mrb[12].mxu1 }
 0x132   : > { %1102 = vst.msk [vmem:[%s1701_s16 + $0x14] sm:$0xf] %vm1096_vm0, %v1336_v62  ;;  %1128 = vst.msk [vmem:[%s1701_s16 + $0x7c] sm:$0xf] %vm1096_vm0, %v1362_v63  ;;  %v672_v2 = vadd.f32 %v1691_v3, %v671_v0  ;;  %v673_v4 = vpop.f32.mrb[13].mxu0  ;;  %v776_v5 = vadd.f32 %v1691_v3, %v775_v1  ;;  %v777_v6 = vpop.f32.mrb[13].mxu1 }
 0x133   : > { %v674_v7 = vpop.f32.mrb[14].mxu0  ;;  %v778_v8 = vpop.f32.mrb[14].mxu1 }
 0x134   : > { %v852_v9 = vmax.f32 %v672_v2, 0.0  ;;  %v675_v10 = vadd.f32 %v1691_v3, %v674_v7  ;;  %v676_v11 = vpop.f32.mrb[15].mxu0  ;;  %v878_v12 = vmax.f32 %v776_v5, 0.0  ;;  %v779_v13 = vadd.f32 %v1691_v3, %v778_v8  ;;  %v780_v14 = vpop.f32.mrb[15].mxu1 }
 0x136   : > { %v1337_v15 = vpack.c.bf16 %v852_v9, %v852_v9  ;;  %v853_v16 = vmax.f32 %v675_v10, 0.0  ;;  %v1363_v17 = vpack.c.bf16 %v878_v12, %v878_v12  ;;  %v879_v18 = vmax.f32 %v779_v13, 0.0 }
 0x138   : > { %1103 = vst.msk [vmem:[%s1701_s16 + $0x18] sm:$0xf] %vm1096_vm0, %v1337_v15  ;;  %v1338_v19 = vpack.c.bf16 %v853_v16, %v853_v16  ;;  %1129 = vst.msk [vmem:[%s1701_s16 + $0x80] sm:$0xf] %vm1096_vm0, %v1363_v17  ;;  %v1364_v20 = vpack.c.bf16 %v879_v18, %v879_v18 }
 0x139   : > { %v679_v21 = vpop.f32.mrb[16].mxu0  ;;  %v783_v22 = vpop.f32.mrb[16].mxu1 }
 0x13a   : > { %1104 = vst.msk [vmem:[%s1701_s16 + $0x1c] sm:$0xf] %vm1096_vm0, %v1338_v19  ;;  %1130 = vst.msk [vmem:[%s1701_s16 + $0x84] sm:$0xf] %vm1096_vm0, %v1364_v20  ;;  %v680_v23 = vadd.f32 %v1691_v3, %v679_v21  ;;  %v681_v24 = vpop.f32.mrb[17].mxu0  ;;  %v784_v25 = vadd.f32 %v1691_v3, %v783_v22  ;;  %v785_v26 = vpop.f32.mrb[17].mxu1 }
 0x13b   : > { %v682_v27 = vpop.f32.mrb[18].mxu0  ;;  %v786_v28 = vpop.f32.mrb[18].mxu1 }
 0x13c   : > { %v854_v29 = vmax.f32 %v680_v23, 0.0  ;;  %v683_v30 = vadd.f32 %v1691_v3, %v682_v27  ;;  %v684_v31 = vpop.f32.mrb[19].mxu0  ;;  %v880_v32 = vmax.f32 %v784_v25, 0.0  ;;  %v787_v33 = vadd.f32 %v1691_v3, %v786_v28  ;;  %v788_v34 = vpop.f32.mrb[19].mxu1 }
 0x13e   : > { %v1339_v35 = vpack.c.bf16 %v854_v29, %v854_v29  ;;  %v855_v36 = vmax.f32 %v683_v30, 0.0  ;;  %v1365_v37 = vpack.c.bf16 %v880_v32, %v880_v32  ;;  %v881_v38 = vmax.f32 %v787_v33, 0.0 }
 0x140   : > { %1105 = vst.msk [vmem:[%s1701_s16 + $0x20] sm:$0xf] %vm1096_vm0, %v1339_v35  ;;  %v1340_v39 = vpack.c.bf16 %v855_v36, %v855_v36  ;;  %1131 = vst.msk [vmem:[%s1701_s16 + $0x88] sm:$0xf] %vm1096_vm0, %v1365_v37  ;;  %v1366_v40 = vpack.c.bf16 %v881_v38, %v881_v38 }
 0x141   : > { %v687_v41 = vpop.f32.mrb[20].mxu0  ;;  %v791_v42 = vpop.f32.mrb[20].mxu1 }
 0x142   : > { %1106 = vst.msk [vmem:[%s1701_s16 + $0x24] sm:$0xf] %vm1096_vm0, %v1340_v39  ;;  %1132 = vst.msk [vmem:[%s1701_s16 + $0x8c] sm:$0xf] %vm1096_vm0, %v1366_v40  ;;  %v688_v43 = vadd.f32 %v1691_v3, %v687_v41  ;;  %v689_v44 = vpop.f32.mrb[21].mxu0  ;;  %v792_v45 = vadd.f32 %v1691_v3, %v791_v42  ;;  %v793_v46 = vpop.f32.mrb[21].mxu1 }
 0x143   : > { %v690_v47 = vpop.f32.mrb[22].mxu0  ;;  %v794_v48 = vpop.f32.mrb[22].mxu1 }
 0x144   : > { %v856_v49 = vmax.f32 %v688_v43, 0.0  ;;  %v691_v50 = vadd.f32 %v1691_v3, %v690_v47  ;;  %v692_v51 = vpop.f32.mrb[23].mxu0  ;;  %v882_v52 = vmax.f32 %v792_v45, 0.0  ;;  %v795_v53 = vadd.f32 %v1691_v3, %v794_v48  ;;  %v796_v54 = vpop.f32.mrb[23].mxu1 }
 0x146   : > { %v1341_v55 = vpack.c.bf16 %v856_v49, %v856_v49  ;;  %v857_v56 = vmax.f32 %v691_v50, 0.0  ;;  %v1367_v57 = vpack.c.bf16 %v882_v52, %v882_v52  ;;  %v883_v58 = vmax.f32 %v795_v53, 0.0 }
 0x148   : > { %1107 = vst.msk [vmem:[%s1701_s16 + $0x28] sm:$0xf] %vm1096_vm0, %v1341_v55  ;;  %v1342_v59 = vpack.c.bf16 %v857_v56, %v857_v56  ;;  %1133 = vst.msk [vmem:[%s1701_s16 + $0x90] sm:$0xf] %vm1096_vm0, %v1367_v57  ;;  %v1368_v60 = vpack.c.bf16 %v883_v58, %v883_v58 }
 0x149   : > { %v695_v61 = vpop.f32.mrb[24].mxu0  ;;  %v799_v62 = vpop.f32.mrb[24].mxu1 }
 0x14a   : > { %1108 = vst.msk [vmem:[%s1701_s16 + $0x2c] sm:$0xf] %vm1096_vm0, %v1342_v59  ;;  %1134 = vst.msk [vmem:[%s1701_s16 + $0x94] sm:$0xf] %vm1096_vm0, %v1368_v60  ;;  %v696_v63 = vadd.f32 %v1691_v3, %v695_v61  ;;  %v697_v0 = vpop.f32.mrb[25].mxu0  ;;  %v800_v1 = vadd.f32 %v1691_v3, %v799_v62  ;;  %v801_v2 = vpop.f32.mrb[25].mxu1 }
 0x14b   : > { %v698_v4 = vpop.f32.mrb[26].mxu0  ;;  %v802_v5 = vpop.f32.mrb[26].mxu1 }
 0x14c   : > { %v858_v6 = vmax.f32 %v696_v63, 0.0  ;;  %v699_v7 = vadd.f32 %v1691_v3, %v698_v4  ;;  %v700_v8 = vpop.f32.mrb[27].mxu0  ;;  %v884_v9 = vmax.f32 %v800_v1, 0.0  ;;  %v803_v10 = vadd.f32 %v1691_v3, %v802_v5  ;;  %v804_v11 = vpop.f32.mrb[27].mxu1 }
 0x14e   : > { %v1343_v12 = vpack.c.bf16 %v858_v6, %v858_v6  ;;  %v859_v13 = vmax.f32 %v699_v7, 0.0  ;;  %v1369_v14 = vpack.c.bf16 %v884_v9, %v884_v9  ;;  %v885_v15 = vmax.f32 %v803_v10, 0.0 }
 0x150   : > { %1109 = vst.msk [vmem:[%s1701_s16 + $0x30] sm:$0xf] %vm1096_vm0, %v1343_v12  ;;  %v1344_v16 = vpack.c.bf16 %v859_v13, %v859_v13  ;;  %1135 = vst.msk [vmem:[%s1701_s16 + $0x98] sm:$0xf] %vm1096_vm0, %v1369_v14  ;;  %v1370_v17 = vpack.c.bf16 %v885_v15, %v885_v15 }
 0x151   : > { %v703_v18 = vpop.f32.mrb[28].mxu0  ;;  %v807_v19 = vpop.f32.mrb[28].mxu1 }
 0x152   : > { %1110 = vst.msk [vmem:[%s1701_s16 + $0x34] sm:$0xf] %vm1096_vm0, %v1344_v16  ;;  %1136 = vst.msk [vmem:[%s1701_s16 + $0x9c] sm:$0xf] %vm1096_vm0, %v1370_v17  ;;  %v704_v20 = vadd.f32 %v1691_v3, %v703_v18  ;;  %v705_v21 = vpop.f32.mrb[29].mxu0  ;;  %v808_v22 = vadd.f32 %v1691_v3, %v807_v19  ;;  %v809_v23 = vpop.f32.mrb[29].mxu1 }
 0x153   : > { %v706_v24 = vpop.f32.mrb[30].mxu0  ;;  %v810_v25 = vpop.f32.mrb[30].mxu1 }
 0x154   : > { %v860_v26 = vmax.f32 %v704_v20, 0.0  ;;  %v707_v27 = vadd.f32 %v1691_v3, %v706_v24  ;;  %v708_v28 = vpop.f32.mrb[31].mxu0  ;;  %v886_v29 = vmax.f32 %v808_v22, 0.0  ;;  %v811_v30 = vadd.f32 %v1691_v3, %v810_v25  ;;  %v812_v31 = vpop.f32.mrb[31].mxu1 }
 0x156   : > { %v1345_v32 = vpack.c.bf16 %v860_v26, %v860_v26  ;;  %v861_v33 = vmax.f32 %v707_v27, 0.0  ;;  %v1371_v34 = vpack.c.bf16 %v886_v29, %v886_v29  ;;  %v887_v35 = vmax.f32 %v811_v30, 0.0 }
 0x158   : > { %1111 = vst.msk [vmem:[%s1701_s16 + $0x38] sm:$0xf] %vm1096_vm0, %v1345_v32  ;;  %v1346_v36 = vpack.c.bf16 %v861_v33, %v861_v33  ;;  %1137 = vst.msk [vmem:[%s1701_s16 + $0xa0] sm:$0xf] %vm1096_vm0, %v1371_v34  ;;  %v1372_v37 = vpack.c.bf16 %v887_v35, %v887_v35 }
 0x159   : > { %v711_v38 = vpop.f32.mrb[32].mxu0  ;;  %v815_v39 = vpop.f32.mrb[32].mxu1 }
 0x15a   : > { %1112 = vst.msk [vmem:[%s1701_s16 + $0x3c] sm:$0xf] %vm1096_vm0, %v1346_v36  ;;  %1138 = vst.msk [vmem:[%s1701_s16 + $0xa4] sm:$0xf] %vm1096_vm0, %v1372_v37  ;;  %v712_v40 = vadd.f32 %v1691_v3, %v711_v38  ;;  %v713_v41 = vpop.f32.mrb[33].mxu0  ;;  %v816_v42 = vadd.f32 %v1691_v3, %v815_v39  ;;  %v817_v43 = vpop.f32.mrb[33].mxu1 }
 0x15b   : > { %v714_v44 = vpop.f32.mrb[34].mxu0  ;;  %v818_v45 = vpop.f32.mrb[34].mxu1 }
 0x15c   : > { %v862_v46 = vmax.f32 %v712_v40, 0.0  ;;  %v715_v47 = vadd.f32 %v1691_v3, %v714_v44  ;;  %v716_v48 = vpop.f32.mrb[35].mxu0  ;;  %v888_v49 = vmax.f32 %v816_v42, 0.0  ;;  %v819_v50 = vadd.f32 %v1691_v3, %v818_v45  ;;  %v820_v51 = vpop.f32.mrb[35].mxu1 }
 0x15e   : > { %v1347_v52 = vpack.c.bf16 %v862_v46, %v862_v46  ;;  %v863_v53 = vmax.f32 %v715_v47, 0.0  ;;  %v1373_v54 = vpack.c.bf16 %v888_v49, %v888_v49  ;;  %v889_v55 = vmax.f32 %v819_v50, 0.0 }
 0x160   : > { %1113 = vst.msk [vmem:[%s1701_s16 + $0x40] sm:$0xf] %vm1096_vm0, %v1347_v52  ;;  %v1348_v56 = vpack.c.bf16 %v863_v53, %v863_v53  ;;  %1139 = vst.msk [vmem:[%s1701_s16 + $0xa8] sm:$0xf] %vm1096_vm0, %v1373_v54  ;;  %v1374_v57 = vpack.c.bf16 %v889_v55, %v889_v55 }
 0x161   : > { %v719_v58 = vpop.f32.mrb[36].mxu0  ;;  %v823_v59 = vpop.f32.mrb[36].mxu1 }
 0x162   : > { %1114 = vst.msk [vmem:[%s1701_s16 + $0x44] sm:$0xf] %vm1096_vm0, %v1348_v56  ;;  %1140 = vst.msk [vmem:[%s1701_s16 + $0xac] sm:$0xf] %vm1096_vm0, %v1374_v57  ;;  %v720_v60 = vadd.f32 %v1691_v3, %v719_v58  ;;  %v721_v61 = vpop.f32.mrb[37].mxu0  ;;  %v824_v62 = vadd.f32 %v1691_v3, %v823_v59  ;;  %v825_v63 = vpop.f32.mrb[37].mxu1 }
 0x163   : > { %v722_v0 = vpop.f32.mrb[38].mxu0  ;;  %v826_v1 = vpop.f32.mrb[38].mxu1 }
 0x164   : > { %v864_v2 = vmax.f32 %v720_v60, 0.0  ;;  %v723_v4 = vadd.f32 %v1691_v3, %v722_v0  ;;  %v724_v5 = vpop.f32.mrb[39].mxu0  ;;  %v890_v6 = vmax.f32 %v824_v62, 0.0  ;;  %v827_v7 = vadd.f32 %v1691_v3, %v826_v1  ;;  %v828_v8 = vpop.f32.mrb[39].mxu1 }
 0x166   : > { %v1349_v9 = vpack.c.bf16 %v864_v2, %v864_v2  ;;  %v865_v10 = vmax.f32 %v723_v4, 0.0  ;;  %v1375_v11 = vpack.c.bf16 %v890_v6, %v890_v6  ;;  %v891_v12 = vmax.f32 %v827_v7, 0.0 }
 0x168   : > { %1115 = vst.msk [vmem:[%s1701_s16 + $0x48] sm:$0xf] %vm1096_vm0, %v1349_v9  ;;  %v1350_v13 = vpack.c.bf16 %v865_v10, %v865_v10  ;;  %1141 = vst.msk [vmem:[%s1701_s16 + $0xb0] sm:$0xf] %vm1096_vm0, %v1375_v11  ;;  %v1376_v14 = vpack.c.bf16 %v891_v12, %v891_v12 }
 0x169   : > { %v727_v15 = vpop.f32.mrb[40].mxu0  ;;  %v831_v16 = vpop.f32.mrb[40].mxu1 }
 0x16a   : > { %1116 = vst.msk [vmem:[%s1701_s16 + $0x4c] sm:$0xf] %vm1096_vm0, %v1350_v13  ;;  %1142 = vst.msk [vmem:[%s1701_s16 + $0xb4] sm:$0xf] %vm1096_vm0, %v1376_v14  ;;  %v728_v17 = vadd.f32 %v1691_v3, %v727_v15  ;;  %v729_v18 = vpop.f32.mrb[41].mxu0  ;;  %v832_v19 = vadd.f32 %v1691_v3, %v831_v16  ;;  %v833_v20 = vpop.f32.mrb[41].mxu1 }
 0x16b   : > { %v730_v21 = vpop.f32.mrb[42].mxu0  ;;  %v834_v22 = vpop.f32.mrb[42].mxu1 }
 0x16c   : > { %v866_v23 = vmax.f32 %v728_v17, 0.0  ;;  %v731_v24 = vadd.f32 %v1691_v3, %v730_v21  ;;  %v732_v25 = vpop.f32.mrb[43].mxu0  ;;  %v892_v26 = vmax.f32 %v832_v19, 0.0  ;;  %v835_v27 = vadd.f32 %v1691_v3, %v834_v22  ;;  %v836_v28 = vpop.f32.mrb[43].mxu1 }
 0x16e   : > { %v1351_v29 = vpack.c.bf16 %v866_v23, %v866_v23  ;;  %v867_v30 = vmax.f32 %v731_v24, 0.0  ;;  %v1377_v31 = vpack.c.bf16 %v892_v26, %v892_v26  ;;  %v893_v32 = vmax.f32 %v835_v27, 0.0 }
 0x170   : > { %1117 = vst.msk [vmem:[%s1701_s16 + $0x50] sm:$0xf] %vm1096_vm0, %v1351_v29  ;;  %v1352_v33 = vpack.c.bf16 %v867_v30, %v867_v30  ;;  %1143 = vst.msk [vmem:[%s1701_s16 + $0xb8] sm:$0xf] %vm1096_vm0, %v1377_v31  ;;  %v1378_v34 = vpack.c.bf16 %v893_v32, %v893_v32 }
 0x171   : > { %v735_v35 = vpop.f32.mrb[44].mxu0  ;;  %v839_v36 = vpop.f32.mrb[44].mxu1 }
 0x172   : > { %1118 = vst.msk [vmem:[%s1701_s16 + $0x54] sm:$0xf] %vm1096_vm0, %v1352_v33  ;;  %1144 = vst.msk [vmem:[%s1701_s16 + $0xbc] sm:$0xf] %vm1096_vm0, %v1378_v34  ;;  %v736_v37 = vadd.f32 %v1691_v3, %v735_v35  ;;  %v737_v38 = vpop.f32.mrb[45].mxu0  ;;  %v840_v39 = vadd.f32 %v1691_v3, %v839_v36  ;;  %v841_v40 = vpop.f32.mrb[45].mxu1 }
 0x173   : > { %v738_v41 = vpop.f32.mrb[46].mxu0  ;;  %v842_v42 = vpop.f32.mrb[46].mxu1 }
 0x174   : > { %v868_v43 = vmax.f32 %v736_v37, 0.0  ;;  %v739_v44 = vadd.f32 %v1691_v3, %v738_v41  ;;  %v740_v45 = vpop.f32.mrb[47].mxu0  ;;  %v894_v46 = vmax.f32 %v840_v39, 0.0  ;;  %v843_v47 = vadd.f32 %v1691_v3, %v842_v42  ;;  %v844_v48 = vpop.f32.mrb[47].mxu1 }
 0x176   : > { %v1353_v49 = vpack.c.bf16 %v868_v43, %v868_v43  ;;  %v869_v50 = vmax.f32 %v739_v44, 0.0  ;;  %v1379_v51 = vpack.c.bf16 %v894_v46, %v894_v46  ;;  %v895_v52 = vmax.f32 %v843_v47, 0.0 }
 0x178   : > { %1119 = vst.msk [vmem:[%s1701_s16 + $0x58] sm:$0xf] %vm1096_vm0, %v1353_v49  ;;  %v1354_v53 = vpack.c.bf16 %v869_v50, %v869_v50  ;;  %1145 = vst.msk [vmem:[%s1701_s16 + $0xc0] sm:$0xf] %vm1096_vm0, %v1379_v51  ;;  %v1380_v54 = vpack.c.bf16 %v895_v52, %v895_v52 }
 0x179   : > { %v743_v55 = vpop.f32.mrb[48].mxu0 }
 0x17a   : > { %1120 = vst.msk [vmem:[%s1701_s16 + $0x5c] sm:$0xf] %vm1096_vm0, %v1354_v53  ;;  %1146 = vst.msk [vmem:[%s1701_s16 + $0xc4] sm:$0xf] %vm1096_vm0, %v1380_v54  ;;  %v744_v56 = vadd.f32 %v1691_v3, %v743_v55  ;;  %v745_v57 = vpop.f32.mrb[49].mxu0 }
 0x17b   : > { %v746_v58 = vpop.f32.mrb[50].mxu0 }
 0x17c   : > { %v870_v59 = vmax.f32 %v744_v56, 0.0  ;;  %v747_v60 = vadd.f32 %v1691_v3, %v746_v58  ;;  %v748_v61 = vpop.f32.mrb[51].mxu0 }
 0x17e   : > { %v1355_v62 = vpack.c.bf16 %v870_v59, %v870_v59  ;;  %v871_v63 = vmax.f32 %v747_v60, 0.0 }
 0x180   : > { %1121 = vst.msk [vmem:[%s1701_s16 + $0x60] sm:$0xf] %vm1096_vm0, %v1355_v62  ;;  %v1356_v0 = vpack.c.bf16 %v871_v63, %v871_v63 }
 0x182   : > { %1122 = vst.msk [vmem:[%s1701_s16 + $0x64] sm:$0xf] %vm1096_vm0, %v1356_v0 }
 0x183 PF: > { %s13_s12 = sadd.s32 1, %s1519_s12  }
 0x184   : > { %p10_p4 = scmp.ge.s32.totalorder %s13_s12, 4  }
 0x186   :  { %12 = sbr.rel (!%p10_p4) target bundleno = 1 (0x1), region = 62 }

// kernel: dqn_forward.5
= control target key start
LH: loop header
LB: loop body
LE: loop exit
PB: predicated region body
PF: predicated region fallthrough
CT: control target
= control target key end

     0   :  { %vm880_vm0 = vcmask 519168   ;;  %vm901_vm1 = vcmask 516096   ;;  %s1637_s1 = inlined_call_operand.vmem [shape: bf16[512,64], index: 1, kind: input, shape index: {}]   ;;  %s1638_s0 = inlined_call_operand.vmem [shape: bf16[162,512], index: 0, kind: input, shape index: {}]   ;;  %s1639_s2 = inlined_call_operand.vmem [shape: f32[1,64], index: 2, kind: input, shape index: {}]   ;;  %s1640_s3 = inlined_call_operand.vmem [shape: bf16[162,64], index: 3, kind: output, shape index: {}]  }
   0x1   :  { %v1190_v0 = vld [vmem:[%s1637_s1 + $0x40] sm:$0xff]   ;;  %v1194_v4 = vld [vmem:[%s1637_s1 + $0x48] sm:$0xff]   ;;  %v1198_v8 = vld [vmem:[%s1637_s1 + $0x50] sm:$0xff]  }
   0x2   :  { %v1191_v1 = vld [vmem:[%s1637_s1 + $0xc0] sm:$0xff]   ;;  %1026 = vmatprep.subr.bf16.mxu0 %v1190_v0  ;;  %v1195_v5 = vld [vmem:[%s1637_s1 + $0xc8] sm:$0xff]   ;;  %v1199_v9 = vld [vmem:[%s1637_s1 + $0xd0] sm:$0xff]  }
   0x3   :  { %v1192_v2 = vld [vmem:[%s1637_s1] sm:$0xff]   ;;  %1108 = vmatprep.subr.bf16.mxu1 %v1191_v1  ;;  %v1196_v6 = vld [vmem:[%s1637_s1 + $0x8] sm:$0xff]   ;;  %v1200_v10 = vld [vmem:[%s1637_s1 + $0x10] sm:$0xff]  }
   0x4   :  { %v1193_v3 = vld [vmem:[%s1637_s1 + $0x80] sm:$0xff]   ;;  %1027 = vmatpush3.bf16.msra.mxu0 %v1192_v2  ;;  %v1197_v7 = vld [vmem:[%s1637_s1 + $0x88] sm:$0xff]   ;;  %v1201_v11 = vld [vmem:[%s1637_s1 + $0x90] sm:$0xff]  }
   0x5   :  { %1109 = vmatpush3.bf16.msra.mxu1 %v1193_v3  ;;  %1028 = vmatprep.subr.bf16.mxu0 %v1194_v4  ;;  %v1202_v12 = vld [vmem:[%s1637_s1 + $0x58] sm:$0xff]   ;;  %v1206_v16 = vld [vmem:[%s1637_s1 + $0x60] sm:$0xff]   ;;  %v1210_v20 = vld [vmem:[%s1637_s1 + $0x68] sm:$0xff]  }
   0x6   :  { %1110 = vmatprep.subr.bf16.mxu1 %v1195_v5  ;;  %v1203_v13 = vld [vmem:[%s1637_s1 + $0xd8] sm:$0xff]   ;;  %v1207_v17 = vld [vmem:[%s1637_s1 + $0xe0] sm:$0xff]   ;;  %v1211_v21 = vld [vmem:[%s1637_s1 + $0xe8] sm:$0xff]  }
   0x7   :  { %v1204_v14 = vld [vmem:[%s1637_s1 + $0x18] sm:$0xff]   ;;  %v1208_v18 = vld [vmem:[%s1637_s1 + $0x20] sm:$0xff]   ;;  %v1212_v22 = vld [vmem:[%s1637_s1 + $0x28] sm:$0xff]  }
   0x8   :  { %1029 = vmatpush3.bf16.msra.mxu0 %v1196_v6  ;;  %v1205_v15 = vld [vmem:[%s1637_s1 + $0x98] sm:$0xff]   ;;  %v1209_v19 = vld [vmem:[%s1637_s1 + $0xa0] sm:$0xff]   ;;  %v1213_v23 = vld [vmem:[%s1637_s1 + $0xa8] sm:$0xff]  }
   0x9   :  { %1111 = vmatpush3.bf16.msra.mxu1 %v1197_v7  ;;  %1030 = vmatprep.subr.bf16.mxu0 %v1198_v8  ;;  %v1214_v24 = vld [vmem:[%s1637_s1 + $0x70] sm:$0xff]   ;;  %v1218_v28 = vld [vmem:[%s1637_s1 + $0x78] sm:$0xff]   ;;  %v55_v6 = vld [vmem:[%s1638_s0 + $0x140] sm:$0x11] }
   0xa   :  { %1112 = vmatprep.subr.bf16.mxu1 %v1199_v9  ;;  %v1215_v25 = vld [vmem:[%s1637_s1 + $0xf0] sm:$0xff]   ;;  %v1219_v29 = vld [vmem:[%s1637_s1 + $0xf8] sm:$0xff]   ;;  %v56_v7 = vld [vmem:[%s1638_s0 + $0x148] sm:$0x11] }
   0xb   :  { %v1216_v26 = vld [vmem:[%s1637_s1 + $0x30] sm:$0xff]   ;;  %v1220_v30 = vld [vmem:[%s1637_s1 + $0x38] sm:$0xff]  }
   0xc   :  { %1031 = vmatpush3.bf16.msra.mxu0 %v1200_v10  ;;  %v1217_v27 = vld [vmem:[%s1637_s1 + $0xb0] sm:$0xff]   ;;  %v1221_v31 = vld [vmem:[%s1637_s1 + $0xb8] sm:$0xff]   ;;  %v949_v10 = vcombine.high %v55_v6, %v55_v6 }
   0xd   :  { %1113 = vmatpush3.bf16.msra.mxu1 %v1201_v11  ;;  %1032 = vmatprep.subr.bf16.mxu0 %v1202_v12  ;;  %v1222_v32 = vld [vmem:[%s1638_s0] ss:$16 sps:$4 sm:$0xff]   ;;  %v1224_v33 = vld [vmem:[%s1638_s0 + $0x4] ss:$16 sps:$4 sm:$0xff]   ;;  %v1225_v34 = vld [vmem:[%s1638_s0 + $0x8] ss:$16 sps:$4 sm:$0xff]   ;;  %v951_v11 = vcombine.high %v56_v7, %v56_v7  ;;  %v948_v12 = vcombine.low %v55_v6, %v55_v6 }
   0xe   :  { %1114 = vmatprep.subr.bf16.mxu1 %v1203_v13  ;;  %v1227_v35 = vld [vmem:[%s1638_s0 + $0xc] ss:$16 sps:$4 sm:$0xff]   ;;  %566 = vmatprep.mubr.bf16.mxu0 %v1224_v33  ;;  %v1228_v36 = vld [vmem:[%s1638_s0 + $0x24] ss:$16 sps:$4 sm:$0xff]   ;;  %v1232_v38 = vld [vmem:[%s1638_s0 + $0x20] ss:$16 sps:$4 sm:$0xff]   ;;  %v950_v13 = vcombine.low %v56_v7, %v56_v7 }
   0xf   :  { %686 = vmatprep.mubr.bf16.mxu1 %v1227_v35  ;;  %v1230_v37 = vld [vmem:[%s1638_s0 + $0x2c] ss:$16 sps:$4 sm:$0xff]   ;;  %v1233_v39 = vld [vmem:[%s1638_s0 + $0x28] ss:$16 sps:$4 sm:$0xff]   ;;  %v1234_v40 = vld [vmem:[%s1638_s0 + $0x44] ss:$16 sps:$4 sm:$0xff]  }
  0x10   :  { %1033 = vmatpush3.bf16.msra.mxu0 %v1204_v14  ;;  %v1236_v41 = vld [vmem:[%s1638_s0 + $0x4c] ss:$16 sps:$4 sm:$0xff]   ;;  %v1238_v42 = vld [vmem:[%s1638_s0 + $0x40] ss:$16 sps:$4 sm:$0xff]   ;;  %v1239_v43 = vld [vmem:[%s1638_s0 + $0x48] ss:$16 sps:$4 sm:$0xff]  }
  0x11   :  { %1115 = vmatpush3.bf16.msra.mxu1 %v1205_v15  ;;  %1034 = vmatprep.subr.bf16.mxu0 %v1206_v16  ;;  %v1240_v44 = vld [vmem:[%s1638_s0 + $0x64] ss:$16 sps:$4 sm:$0xff]   ;;  %v1242_v45 = vld [vmem:[%s1638_s0 + $0x6c] ss:$16 sps:$4 sm:$0xff]   ;;  %v1244_v46 = vld [vmem:[%s1638_s0 + $0x60] ss:$16 sps:$4 sm:$0xff]  }
  0x12   :  { %1116 = vmatprep.subr.bf16.mxu1 %v1207_v17  ;;  %v1245_v47 = vld [vmem:[%s1638_s0 + $0x68] ss:$16 sps:$4 sm:$0xff]   ;;  %v1246_v48 = vld [vmem:[%s1638_s0 + $0x84] ss:$16 sps:$4 sm:$0xff]   ;;  %v1248_v49 = vld [vmem:[%s1638_s0 + $0x8c] ss:$16 sps:$4 sm:$0xff]  }
  0x13   :  { %v1250_v50 = vld [vmem:[%s1638_s0 + $0x80] ss:$16 sps:$4 sm:$0xff]   ;;  %v1251_v51 = vld [vmem:[%s1638_s0 + $0x88] ss:$16 sps:$4 sm:$0xff]   ;;  %v1252_v52 = vld [vmem:[%s1638_s0 + $0xa4] ss:$16 sps:$4 sm:$0xff]  }
  0x14   :  { %1035 = vmatpush3.bf16.msra.mxu0 %v1208_v18  ;;  %v1254_v53 = vld [vmem:[%s1638_s0 + $0xac] ss:$16 sps:$4 sm:$0xff]   ;;  %v1256_v54 = vld [vmem:[%s1638_s0 + $0xa0] ss:$16 sps:$4 sm:$0xff]   ;;  %v1257_v55 = vld [vmem:[%s1638_s0 + $0xa8] ss:$16 sps:$4 sm:$0xff]  }
  0x15   :  { %1117 = vmatpush3.bf16.msra.mxu1 %v1209_v19  ;;  %1036 = vmatprep.subr.bf16.mxu0 %v1210_v20  ;;  %v1258_v56 = vld [vmem:[%s1638_s0 + $0xc4] ss:$16 sps:$4 sm:$0xff]   ;;  %v1260_v57 = vld [vmem:[%s1638_s0 + $0xcc] ss:$16 sps:$4 sm:$0xff]   ;;  %v1262_v58 = vld [vmem:[%s1638_s0 + $0xc0] ss:$16 sps:$4 sm:$0xff]  }
  0x16   :  { %1118 = vmatprep.subr.bf16.mxu1 %v1211_v21  ;;  %v1263_v59 = vld [vmem:[%s1638_s0 + $0xc8] ss:$16 sps:$4 sm:$0xff]   ;;  %v1264_v60 = vld [vmem:[%s1638_s0 + $0xe4] ss:$16 sps:$4 sm:$0xff]   ;;  %v1266_v61 = vld [vmem:[%s1638_s0 + $0xec] ss:$16 sps:$4 sm:$0xff]  }
  0x17   :  { %v1268_v62 = vld [vmem:[%s1638_s0 + $0xe0] ss:$16 sps:$4 sm:$0xff]   ;;  %v1269_v63 = vld [vmem:[%s1638_s0 + $0xe8] ss:$16 sps:$4 sm:$0xff]   ;;  %v1270_v0 = vld [vmem:[%s1638_s0 + $0x104] ss:$16 sps:$4 sm:$0xff]  }
  0x18   :  { %1037 = vmatpush3.bf16.msra.mxu0 %v1212_v22  ;;  %v1272_v1 = vld [vmem:[%s1638_s0 + $0x10c] ss:$16 sps:$4 sm:$0xff]   ;;  %v1274_v2 = vld [vmem:[%s1638_s0 + $0x100] ss:$16 sps:$4 sm:$0xff]   ;;  %v1275_v3 = vld [vmem:[%s1638_s0 + $0x108] ss:$16 sps:$4 sm:$0xff]  }
  0x19   :  { %1119 = vmatpush3.bf16.msra.mxu1 %v1213_v23  ;;  %1038 = vmatprep.subr.bf16.mxu0 %v1214_v24  ;;  %v1276_v4 = vld [vmem:[%s1638_s0 + $0x124] ss:$16 sps:$4 sm:$0xff]   ;;  %v1278_v5 = vld [vmem:[%s1638_s0 + $0x12c] ss:$16 sps:$4 sm:$0xff]   ;;  %v1280_v8 = vld [vmem:[%s1638_s0 + $0x120] ss:$16 sps:$4 sm:$0xff]  }
  0x1a   :  { %1120 = vmatprep.subr.bf16.mxu1 %v1215_v25  ;;  %v1281_v9 = vld [vmem:[%s1638_s0 + $0x128] ss:$16 sps:$4 sm:$0xff]   ;;  %v1531_v16 = vld [vmem:[%s1639_s2] ss:$0 sm:$0xff] }
  0x1c   :  { %1039 = vmatpush3.bf16.msra.mxu0 %v1216_v26 }
  0x1d   :  { %1121 = vmatpush3.bf16.msra.mxu1 %v1217_v27  ;;  %1040 = vmatprep.subr.bf16.mxu0 %v1218_v28 }
  0x1e   :  { %1122 = vmatprep.subr.bf16.mxu1 %v1219_v29 }
  0x20   :  { %1041 = vmatpush3.bf16.msra.mxu0 %v1220_v30 }
  0x21   :  { %1123 = vmatpush3.bf16.msra.mxu1 %v1221_v31 }
  0x23   :  { %567 = vmatmul.mubr.bf16.vlgmr.msra.gmra.mrb[0].mxu0 %v1222_v32 }
  0x24   :  { %687 = vmatmul.mubr.bf16.vlgmr.msra.gmra.mrb[0].mxu1 %v1225_v34  ;;  %574 = vmatprep.mubr.bf16.mxu0 %v1228_v36 }
  0x25   :  { %694 = vmatprep.mubr.bf16.mxu1 %v1230_v37 }
  0x2b   :  { %575 = vmatmul.mubr.bf16.gmra.mrb[4].mxu0 %v1232_v38 }
  0x2c   :  { %695 = vmatmul.mubr.bf16.gmra.mrb[4].mxu1 %v1233_v39  ;;  %582 = vmatprep.mubr.bf16.mxu0 %v1234_v40 }
  0x2d   :  { %702 = vmatprep.mubr.bf16.mxu1 %v1236_v41 }
  0x33   :  { %583 = vmatmul.mubr.bf16.gmra.mrb[8].mxu0 %v1238_v42 }
  0x34   :  { %703 = vmatmul.mubr.bf16.gmra.mrb[8].mxu1 %v1239_v43  ;;  %590 = vmatprep.mubr.bf16.mxu0 %v1240_v44 }
  0x35   :  { %710 = vmatprep.mubr.bf16.mxu1 %v1242_v45 }
  0x3b   :  { %591 = vmatmul.mubr.bf16.gmra.mrb[12].mxu0 %v1244_v46 }
  0x3c   :  { %711 = vmatmul.mubr.bf16.gmra.mrb[12].mxu1 %v1245_v47  ;;  %598 = vmatprep.mubr.bf16.mxu0 %v1246_v48 }
  0x3d   :  { %718 = vmatprep.mubr.bf16.mxu1 %v1248_v49 }
  0x43   :  { %599 = vmatmul.mubr.bf16.gmra.mrb[16].mxu0 %v1250_v50 }
  0x44   :  { %719 = vmatmul.mubr.bf16.gmra.mrb[16].mxu1 %v1251_v51  ;;  %606 = vmatprep.mubr.bf16.mxu0 %v1252_v52 }
  0x45   :  { %726 = vmatprep.mubr.bf16.mxu1 %v1254_v53 }
  0x4b   :  { %607 = vmatmul.mubr.bf16.gmra.mrb[20].mxu0 %v1256_v54 }
  0x4c   :  { %727 = vmatmul.mubr.bf16.gmra.mrb[20].mxu1 %v1257_v55  ;;  %614 = vmatprep.mubr.bf16.mxu0 %v1258_v56 }
  0x4d   :  { %734 = vmatprep.mubr.bf16.mxu1 %v1260_v57 }
  0x53   :  { %615 = vmatmul.mubr.bf16.gmra.mrb[24].mxu0 %v1262_v58 }
  0x54   :  { %735 = vmatmul.mubr.bf16.gmra.mrb[24].mxu1 %v1263_v59  ;;  %622 = vmatprep.mubr.bf16.mxu0 %v1264_v60 }
  0x55   :  { %742 = vmatprep.mubr.bf16.mxu1 %v1266_v61 }
  0x5b   :  { %623 = vmatmul.mubr.bf16.gmra.mrb[28].mxu0 %v1268_v62 }
  0x5c   :  { %743 = vmatmul.mubr.bf16.gmra.mrb[28].mxu1 %v1269_v63  ;;  %630 = vmatprep.mubr.bf16.mxu0 %v1270_v0 }
  0x5d   :  { %750 = vmatprep.mubr.bf16.mxu1 %v1272_v1 }
  0x63   :  { %631 = vmatmul.mubr.bf16.gmra.mrb[32].mxu0 %v1274_v2 }
  0x64   :  { %751 = vmatmul.mubr.bf16.gmra.mrb[32].mxu1 %v1275_v3  ;;  %638 = vmatprep.mubr.bf16.mxu0 %v1276_v4 }
  0x65   :  { %758 = vmatprep.mubr.bf16.mxu1 %v1278_v5 }
  0x6b   :  { %639 = vmatmul.mubr.bf16.gmra.mrb[36].mxu0 %v1280_v8 }
  0x6c   :  { %759 = vmatmul.mubr.bf16.gmra.mrb[36].mxu1 %v1281_v9  ;;  %646 = vmatprep.mubr.bf16.mxu0 %v949_v10 }
  0x6d   :  { %766 = vmatprep.mubr.bf16.mxu1 %v951_v11 }
  0x73   :  { %647 = vmatmul.mubr.bf16.gmra.mrb[40].mxu0 %v948_v12 }
  0x74   :  { %767 = vmatmul.mubr.bf16.gmra.mrb[40].mxu1 %v950_v13 }
  0xf6   :  { %v1042_v14 = vpop.f32.mrb[0].mxu0 }
  0xf7   :  { %v1124_v15 = vpop.f32.mrb[0].mxu1  ;;  %v1043_v17 = vpop.f32.mrb[1].mxu0 }
  0xf8   :  { %v1044_v18 = vadd.f32 %v1043_v17, %v1042_v14  ;;  %v1125_v19 = vpop.f32.mrb[1].mxu1  ;;  %v1045_v20 = vpop.f32.mrb[2].mxu0 }
  0xf9   :  { %v1126_v21 = vadd.f32 %v1125_v19, %v1124_v15  ;;  %v1127_v22 = vpop.f32.mrb[2].mxu1  ;;  %v1046_v23 = vpop.f32.mrb[3].mxu0 }
  0xfa   :  { %v569_v24 = vadd.f32 %v1044_v18, %v1531_v16  ;;  %v1047_v25 = vadd.f32 %v1046_v23, %v1045_v20  ;;  %v1128_v26 = vpop.f32.mrb[3].mxu1 }
  0xfb   :  { %v1129_v27 = vadd.f32 %v1128_v26, %v1127_v22 }
  0xfc   :  { %v689_v28 = vadd.f32 %v1126_v21, %v569_v24  ;;  %v572_v29 = vadd.f32 %v1047_v25, %v1531_v16 }
  0xfe   :  { %v774_v30 = vmax.f32 %v689_v28, 0.0  ;;  %v692_v31 = vadd.f32 %v1129_v27, %v572_v29  ;;  %v1048_v32 = vpop.f32.mrb[4].mxu0 }
  0xff   :  { %v1130_v33 = vpop.f32.mrb[4].mxu1  ;;  %v1049_v34 = vpop.f32.mrb[5].mxu0 }
 0x100   :  { %v1005_v35 = vpack.c.bf16 %v774_v30, %v774_v30  ;;  %v775_v36 = vmax.f32 %v692_v31, 0.0  ;;  %v1050_v37 = vadd.f32 %v1049_v34, %v1048_v32  ;;  %v1131_v38 = vpop.f32.mrb[5].mxu1  ;;  %v1051_v39 = vpop.f32.mrb[6].mxu0 }
 0x101   :  { %v1132_v40 = vadd.f32 %v1131_v38, %v1130_v33  ;;  %v1133_v41 = vpop.f32.mrb[6].mxu1  ;;  %v1052_v42 = vpop.f32.mrb[7].mxu0 }
 0x102   :  { %881 = vst.msk [vmem:[%s1640_s3] sm:$0xf] %vm880_vm0, %v1005_v35  ;;  %v1006_v43 = vpack.c.bf16 %v775_v36, %v775_v36  ;;  %v577_v44 = vadd.f32 %v1050_v37, %v1531_v16  ;;  %v1053_v45 = vadd.f32 %v1052_v42, %v1051_v39  ;;  %v1134_v46 = vpop.f32.mrb[7].mxu1 }
 0x103   :  { %v1135_v47 = vadd.f32 %v1134_v46, %v1133_v41 }
 0x104   :  { %882 = vst.msk [vmem:[%s1640_s3 + $0x4] sm:$0xf] %vm880_vm0, %v1006_v43  ;;  %v697_v48 = vadd.f32 %v1132_v40, %v577_v44  ;;  %v580_v49 = vadd.f32 %v1053_v45, %v1531_v16 }
 0x106   :  { %v776_v50 = vmax.f32 %v697_v48, 0.0  ;;  %v700_v51 = vadd.f32 %v1135_v47, %v580_v49  ;;  %v1054_v52 = vpop.f32.mrb[8].mxu0 }
 0x107   :  { %v1136_v53 = vpop.f32.mrb[8].mxu1  ;;  %v1055_v54 = vpop.f32.mrb[9].mxu0 }
 0x108   :  { %v1007_v55 = vpack.c.bf16 %v776_v50, %v776_v50  ;;  %v777_v56 = vmax.f32 %v700_v51, 0.0  ;;  %v1056_v57 = vadd.f32 %v1055_v54, %v1054_v52  ;;  %v1137_v58 = vpop.f32.mrb[9].mxu1  ;;  %v1057_v59 = vpop.f32.mrb[10].mxu0 }
 0x109   :  { %v1138_v60 = vadd.f32 %v1137_v58, %v1136_v53  ;;  %v1139_v61 = vpop.f32.mrb[10].mxu1  ;;  %v1058_v62 = vpop.f32.mrb[11].mxu0 }
 0x10a   :  { %883 = vst.msk [vmem:[%s1640_s3 + $0x8] sm:$0xf] %vm880_vm0, %v1007_v55  ;;  %v1008_v63 = vpack.c.bf16 %v777_v56, %v777_v56  ;;  %v585_v0 = vadd.f32 %v1056_v57, %v1531_v16  ;;  %v1059_v1 = vadd.f32 %v1058_v62, %v1057_v59  ;;  %v1140_v2 = vpop.f32.mrb[11].mxu1 }
 0x10b   :  { %v1141_v3 = vadd.f32 %v1140_v2, %v1139_v61 }
 0x10c   :  { %884 = vst.msk [vmem:[%s1640_s3 + $0xc] sm:$0xf] %vm880_vm0, %v1008_v63  ;;  %v705_v4 = vadd.f32 %v1138_v60, %v585_v0  ;;  %v588_v5 = vadd.f32 %v1059_v1, %v1531_v16 }
 0x10e   :  { %v778_v6 = vmax.f32 %v705_v4, 0.0  ;;  %v708_v7 = vadd.f32 %v1141_v3, %v588_v5  ;;  %v1060_v8 = vpop.f32.mrb[12].mxu0 }
 0x10f   :  { %v1142_v9 = vpop.f32.mrb[12].mxu1  ;;  %v1061_v10 = vpop.f32.mrb[13].mxu0 }
 0x110   :  { %v1009_v11 = vpack.c.bf16 %v778_v6, %v778_v6  ;;  %v779_v12 = vmax.f32 %v708_v7, 0.0  ;;  %v1062_v13 = vadd.f32 %v1061_v10, %v1060_v8  ;;  %v1143_v14 = vpop.f32.mrb[13].mxu1  ;;  %v1063_v15 = vpop.f32.mrb[14].mxu0 }
 0x111   :  { %v1144_v17 = vadd.f32 %v1143_v14, %v1142_v9  ;;  %v1145_v18 = vpop.f32.mrb[14].mxu1  ;;  %v1064_v19 = vpop.f32.mrb[15].mxu0 }
 0x112   :  { %885 = vst.msk [vmem:[%s1640_s3 + $0x10] sm:$0xf] %vm880_vm0, %v1009_v11  ;;  %v1010_v20 = vpack.c.bf16 %v779_v12, %v779_v12  ;;  %v593_v21 = vadd.f32 %v1062_v13, %v1531_v16  ;;  %v1065_v22 = vadd.f32 %v1064_v19, %v1063_v15  ;;  %v1146_v23 = vpop.f32.mrb[15].mxu1 }
 0x113   :  { %v1147_v24 = vadd.f32 %v1146_v23, %v1145_v18 }
 0x114   :  { %886 = vst.msk [vmem:[%s1640_s3 + $0x14] sm:$0xf] %vm880_vm0, %v1010_v20  ;;  %v713_v25 = vadd.f32 %v1144_v17, %v593_v21  ;;  %v596_v26 = vadd.f32 %v1065_v22, %v1531_v16 }
 0x116   :  { %v780_v27 = vmax.f32 %v713_v25, 0.0  ;;  %v716_v28 = vadd.f32 %v1147_v24, %v596_v26  ;;  %v1066_v29 = vpop.f32.mrb[16].mxu0 }
 0x117   :  { %v1148_v30 = vpop.f32.mrb[16].mxu1  ;;  %v1067_v31 = vpop.f32.mrb[17].mxu0 }
 0x118   :  { %v1011_v32 = vpack.c.bf16 %v780_v27, %v780_v27  ;;  %v781_v33 = vmax.f32 %v716_v28, 0.0  ;;  %v1068_v34 = vadd.f32 %v1067_v31, %v1066_v29  ;;  %v1149_v35 = vpop.f32.mrb[17].mxu1  ;;  %v1069_v36 = vpop.f32.mrb[18].mxu0 }
 0x119   :  { %v1150_v37 = vadd.f32 %v1149_v35, %v1148_v30  ;;  %v1151_v38 = vpop.f32.mrb[18].mxu1  ;;  %v1070_v39 = vpop.f32.mrb[19].mxu0 }
 0x11a   :  { %887 = vst.msk [vmem:[%s1640_s3 + $0x18] sm:$0xf] %vm880_vm0, %v1011_v32  ;;  %v1012_v40 = vpack.c.bf16 %v781_v33, %v781_v33  ;;  %v601_v41 = vadd.f32 %v1068_v34, %v1531_v16  ;;  %v1071_v42 = vadd.f32 %v1070_v39, %v1069_v36  ;;  %v1152_v43 = vpop.f32.mrb[19].mxu1 }
 0x11b   :  { %v1153_v44 = vadd.f32 %v1152_v43, %v1151_v38 }
 0x11c   :  { %888 = vst.msk [vmem:[%s1640_s3 + $0x1c] sm:$0xf] %vm880_vm0, %v1012_v40  ;;  %v721_v45 = vadd.f32 %v1150_v37, %v601_v41  ;;  %v604_v46 = vadd.f32 %v1071_v42, %v1531_v16 }
 0x11e   :  { %v782_v47 = vmax.f32 %v721_v45, 0.0  ;;  %v724_v48 = vadd.f32 %v1153_v44, %v604_v46  ;;  %v1072_v49 = vpop.f32.mrb[20].mxu0 }
 0x11f   :  { %v1154_v50 = vpop.f32.mrb[20].mxu1  ;;  %v1073_v51 = vpop.f32.mrb[21].mxu0 }
 0x120   :  { %v1013_v52 = vpack.c.bf16 %v782_v47, %v782_v47  ;;  %v783_v53 = vmax.f32 %v724_v48, 0.0  ;;  %v1074_v54 = vadd.f32 %v1073_v51, %v1072_v49  ;;  %v1155_v55 = vpop.f32.mrb[21].mxu1  ;;  %v1075_v56 = vpop.f32.mrb[22].mxu0 }
 0x121   :  { %v1156_v57 = vadd.f32 %v1155_v55, %v1154_v50  ;;  %v1157_v58 = vpop.f32.mrb[22].mxu1  ;;  %v1076_v59 = vpop.f32.mrb[23].mxu0 }
 0x122   :  { %889 = vst.msk [vmem:[%s1640_s3 + $0x20] sm:$0xf] %vm880_vm0, %v1013_v52  ;;  %v1014_v60 = vpack.c.bf16 %v783_v53, %v783_v53  ;;  %v609_v61 = vadd.f32 %v1074_v54, %v1531_v16  ;;  %v1077_v62 = vadd.f32 %v1076_v59, %v1075_v56  ;;  %v1158_v63 = vpop.f32.mrb[23].mxu1 }
 0x123   :  { %v1159_v0 = vadd.f32 %v1158_v63, %v1157_v58 }
 0x124   :  { %890 = vst.msk [vmem:[%s1640_s3 + $0x24] sm:$0xf] %vm880_vm0, %v1014_v60  ;;  %v729_v1 = vadd.f32 %v1156_v57, %v609_v61  ;;  %v612_v2 = vadd.f32 %v1077_v62, %v1531_v16 }
 0x126   :  { %v784_v3 = vmax.f32 %v729_v1, 0.0  ;;  %v732_v4 = vadd.f32 %v1159_v0, %v612_v2  ;;  %v1078_v5 = vpop.f32.mrb[24].mxu0 }
 0x127   :  { %v1160_v6 = vpop.f32.mrb[24].mxu1  ;;  %v1079_v7 = vpop.f32.mrb[25].mxu0 }
 0x128   :  { %v1015_v8 = vpack.c.bf16 %v784_v3, %v784_v3  ;;  %v785_v9 = vmax.f32 %v732_v4, 0.0  ;;  %v1080_v10 = vadd.f32 %v1079_v7, %v1078_v5  ;;  %v1161_v11 = vpop.f32.mrb[25].mxu1  ;;  %v1081_v12 = vpop.f32.mrb[26].mxu0 }
 0x129   :  { %v1162_v13 = vadd.f32 %v1161_v11, %v1160_v6  ;;  %v1163_v14 = vpop.f32.mrb[26].mxu1  ;;  %v1082_v15 = vpop.f32.mrb[27].mxu0 }
 0x12a   :  { %891 = vst.msk [vmem:[%s1640_s3 + $0x28] sm:$0xf] %vm880_vm0, %v1015_v8  ;;  %v1016_v17 = vpack.c.bf16 %v785_v9, %v785_v9  ;;  %v617_v18 = vadd.f32 %v1080_v10, %v1531_v16  ;;  %v1083_v19 = vadd.f32 %v1082_v15, %v1081_v12  ;;  %v1164_v20 = vpop.f32.mrb[27].mxu1 }
 0x12b   :  { %v1165_v21 = vadd.f32 %v1164_v20, %v1163_v14 }
 0x12c   :  { %892 = vst.msk [vmem:[%s1640_s3 + $0x2c] sm:$0xf] %vm880_vm0, %v1016_v17  ;;  %v737_v22 = vadd.f32 %v1162_v13, %v617_v18  ;;  %v620_v23 = vadd.f32 %v1083_v19, %v1531_v16 }
 0x12e   :  { %v786_v24 = vmax.f32 %v737_v22, 0.0  ;;  %v740_v25 = vadd.f32 %v1165_v21, %v620_v23  ;;  %v1084_v26 = vpop.f32.mrb[28].mxu0 }
 0x12f   :  { %v1166_v27 = vpop.f32.mrb[28].mxu1  ;;  %v1085_v28 = vpop.f32.mrb[29].mxu0 }
 0x130   :  { %v1017_v29 = vpack.c.bf16 %v786_v24, %v786_v24  ;;  %v787_v30 = vmax.f32 %v740_v25, 0.0  ;;  %v1086_v31 = vadd.f32 %v1085_v28, %v1084_v26  ;;  %v1167_v32 = vpop.f32.mrb[29].mxu1  ;;  %v1087_v33 = vpop.f32.mrb[30].mxu0 }
 0x131   :  { %v1168_v34 = vadd.f32 %v1167_v32, %v1166_v27  ;;  %v1169_v35 = vpop.f32.mrb[30].mxu1  ;;  %v1088_v36 = vpop.f32.mrb[31].mxu0 }
 0x132   :  { %893 = vst.msk [vmem:[%s1640_s3 + $0x30] sm:$0xf] %vm880_vm0, %v1017_v29  ;;  %v1018_v37 = vpack.c.bf16 %v787_v30, %v787_v30  ;;  %v625_v38 = vadd.f32 %v1086_v31, %v1531_v16  ;;  %v1089_v39 = vadd.f32 %v1088_v36, %v1087_v33  ;;  %v1170_v40 = vpop.f32.mrb[31].mxu1 }
 0x133   :  { %v1171_v41 = vadd.f32 %v1170_v40, %v1169_v35 }
 0x134   :  { %894 = vst.msk [vmem:[%s1640_s3 + $0x34] sm:$0xf] %vm880_vm0, %v1018_v37  ;;  %v745_v42 = vadd.f32 %v1168_v34, %v625_v38  ;;  %v628_v43 = vadd.f32 %v1089_v39, %v1531_v16 }
 0x136   :  { %v788_v44 = vmax.f32 %v745_v42, 0.0  ;;  %v748_v45 = vadd.f32 %v1171_v41, %v628_v43  ;;  %v1090_v46 = vpop.f32.mrb[32].mxu0 }
 0x137   :  { %v1172_v47 = vpop.f32.mrb[32].mxu1  ;;  %v1091_v48 = vpop.f32.mrb[33].mxu0 }
 0x138   :  { %v1019_v49 = vpack.c.bf16 %v788_v44, %v788_v44  ;;  %v789_v50 = vmax.f32 %v748_v45, 0.0  ;;  %v1092_v51 = vadd.f32 %v1091_v48, %v1090_v46  ;;  %v1173_v52 = vpop.f32.mrb[33].mxu1  ;;  %v1093_v53 = vpop.f32.mrb[34].mxu0 }
 0x139   :  { %v1174_v54 = vadd.f32 %v1173_v52, %v1172_v47  ;;  %v1175_v55 = vpop.f32.mrb[34].mxu1  ;;  %v1094_v56 = vpop.f32.mrb[35].mxu0 }
 0x13a   :  { %895 = vst.msk [vmem:[%s1640_s3 + $0x38] sm:$0xf] %vm880_vm0, %v1019_v49  ;;  %v1020_v57 = vpack.c.bf16 %v789_v50, %v789_v50  ;;  %v633_v58 = vadd.f32 %v1092_v51, %v1531_v16  ;;  %v1095_v59 = vadd.f32 %v1094_v56, %v1093_v53  ;;  %v1176_v60 = vpop.f32.mrb[35].mxu1 }
 0x13b   :  { %v1177_v61 = vadd.f32 %v1176_v60, %v1175_v55 }
 0x13c   :  { %896 = vst.msk [vmem:[%s1640_s3 + $0x3c] sm:$0xf] %vm880_vm0, %v1020_v57  ;;  %v753_v62 = vadd.f32 %v1174_v54, %v633_v58  ;;  %v636_v63 = vadd.f32 %v1095_v59, %v1531_v16 }
 0x13e   :  { %v790_v0 = vmax.f32 %v753_v62, 0.0  ;;  %v756_v1 = vadd.f32 %v1177_v61, %v636_v63  ;;  %v1096_v2 = vpop.f32.mrb[36].mxu0 }
 0x13f   :  { %v1178_v3 = vpop.f32.mrb[36].mxu1  ;;  %v1097_v4 = vpop.f32.mrb[37].mxu0 }
 0x140   :  { %v1021_v5 = vpack.c.bf16 %v790_v0, %v790_v0  ;;  %v791_v6 = vmax.f32 %v756_v1, 0.0  ;;  %v1098_v7 = vadd.f32 %v1097_v4, %v1096_v2  ;;  %v1179_v8 = vpop.f32.mrb[37].mxu1  ;;  %v1099_v9 = vpop.f32.mrb[38].mxu0 }
 0x141   :  { %v1180_v10 = vadd.f32 %v1179_v8, %v1178_v3  ;;  %v1181_v11 = vpop.f32.mrb[38].mxu1  ;;  %v1100_v12 = vpop.f32.mrb[39].mxu0 }
 0x142   :  { %897 = vst.msk [vmem:[%s1640_s3 + $0x40] sm:$0xf] %vm880_vm0, %v1021_v5  ;;  %v1022_v13 = vpack.c.bf16 %v791_v6, %v791_v6  ;;  %v641_v14 = vadd.f32 %v1098_v7, %v1531_v16  ;;  %v1101_v15 = vadd.f32 %v1100_v12, %v1099_v9  ;;  %v1182_v17 = vpop.f32.mrb[39].mxu1 }
 0x143   :  { %v1183_v18 = vadd.f32 %v1182_v17, %v1181_v11 }
 0x144   :  { %898 = vst.msk [vmem:[%s1640_s3 + $0x44] sm:$0xf] %vm880_vm0, %v1022_v13  ;;  %v761_v19 = vadd.f32 %v1180_v10, %v641_v14  ;;  %v644_v20 = vadd.f32 %v1101_v15, %v1531_v16 }
 0x146   :  { %v792_v21 = vmax.f32 %v761_v19, 0.0  ;;  %v764_v22 = vadd.f32 %v1183_v18, %v644_v20  ;;  %v1102_v23 = vpop.f32.mrb[40].mxu0 }
 0x147   :  { %v1184_v24 = vpop.f32.mrb[40].mxu1  ;;  %v1103_v25 = vpop.f32.mrb[41].mxu0 }
 0x148   :  { %v1023_v26 = vpack.c.bf16 %v792_v21, %v792_v21  ;;  %v793_v27 = vmax.f32 %v764_v22, 0.0  ;;  %v1104_v28 = vadd.f32 %v1103_v25, %v1102_v23  ;;  %v1185_v29 = vpop.f32.mrb[41].mxu1  ;;  %v1105_v30 = vpop.f32.mrb[42].mxu0 }
 0x149   :  { %v1186_v31 = vadd.f32 %v1185_v29, %v1184_v24  ;;  %v1187_v32 = vpop.f32.mrb[42].mxu1  ;;  %v1106_v33 = vpop.f32.mrb[43].mxu0 }
 0x14a   :  { %899 = vst.msk [vmem:[%s1640_s3 + $0x48] sm:$0xf] %vm880_vm0, %v1023_v26  ;;  %v1024_v34 = vpack.c.bf16 %v793_v27, %v793_v27  ;;  %v649_v35 = vadd.f32 %v1104_v28, %v1531_v16  ;;  %v1188_v36 = vpop.f32.mrb[43].mxu1 }
 0x14c   :  { %900 = vst.msk [vmem:[%s1640_s3 + $0x4c] sm:$0xf] %vm880_vm0, %v1024_v34  ;;  %v769_v37 = vadd.f32 %v1186_v31, %v649_v35 }
 0x14e   :  { %v794_v38 = vmax.f32 %v769_v37, 0.0 }
 0x150   :  { %v1025_v39 = vpack.c.bf16 %v794_v38, %v794_v38 }
 0x152   :  { %902 = vst.msk [vmem:[%s1640_s3 + $0x50] sm:$0x1] %vm901_vm1, %v1025_v39 }

// kernel: dqn_forward.6
= control target key start
LH: loop header
LB: loop body
LE: loop exit
PB: predicated region body
PF: predicated region fallthrough
CT: control target
= control target key end

     0   :  { %v1248_v34 = vmov 0.0   ;;  %vm1249_vm0 = vmmov 0   ;;  %vm516_vm1 = vcmask 523264   ;;  %vm868_vm2 = vcmask 519168   ;;  %s1599_s1 = inlined_call_operand.vmem [shape: bf16[576,64], index: 1, kind: input, shape index: {}]   ;;  %s1600_s0 = inlined_call_operand.vmem [shape: bf16[98,576], index: 0, kind: input, shape index: {}]   ;;  %s1601_s2 = inlined_call_operand.vmem [shape: f32[1,64], index: 2, kind: input, shape index: {}]   ;;  %s1602_s3 = inlined_call_operand.vmem [shape: bf16[98,64], index: 3, kind: output, shape index: {}]  }
   0x1   :  { %v1165_v0 = vld [vmem:[%s1599_s1 + $0x40] sm:$0xff]   ;;  %v1169_v4 = vld [vmem:[%s1599_s1 + $0x48] sm:$0xff]   ;;  %v1173_v8 = vld [vmem:[%s1599_s1 + $0x50] sm:$0xff]   ;;  %vm881_vm3 = vcmask 516096  }
   0x2   :  { %v1166_v1 = vld [vmem:[%s1599_s1 + $0xc0] sm:$0xff]   ;;  %992 = vmatprep.subr.bf16.mxu0 %v1165_v0  ;;  %v1170_v5 = vld [vmem:[%s1599_s1 + $0xc8] sm:$0xff]   ;;  %v1174_v9 = vld [vmem:[%s1599_s1 + $0xd0] sm:$0xff]  }
   0x3   :  { %v1167_v2 = vld [vmem:[%s1599_s1] sm:$0xff]   ;;  %1050 = vmatprep.subr.bf16.mxu1 %v1166_v1  ;;  %v1171_v6 = vld [vmem:[%s1599_s1 + $0x8] sm:$0xff]   ;;  %v1175_v10 = vld [vmem:[%s1599_s1 + $0x10] sm:$0xff]  }
   0x4   :  { %v1168_v3 = vld [vmem:[%s1599_s1 + $0x80] sm:$0xff]   ;;  %993 = vmatpush3.bf16.msra.mxu0 %v1167_v2  ;;  %v1172_v7 = vld [vmem:[%s1599_s1 + $0x88] sm:$0xff]   ;;  %v1176_v11 = vld [vmem:[%s1599_s1 + $0x90] sm:$0xff]  }
   0x5   :  { %1051 = vmatpush3.bf16.msra.mxu1 %v1168_v3  ;;  %994 = vmatprep.subr.bf16.mxu0 %v1169_v4  ;;  %v1177_v12 = vld [vmem:[%s1599_s1 + $0x58] sm:$0xff]   ;;  %v1181_v16 = vld [vmem:[%s1599_s1 + $0x60] sm:$0xff]   ;;  %v1185_v20 = vld [vmem:[%s1599_s1 + $0x68] sm:$0xff]  }
   0x6   :  { %1052 = vmatprep.subr.bf16.mxu1 %v1170_v5  ;;  %v1178_v13 = vld [vmem:[%s1599_s1 + $0xd8] sm:$0xff]   ;;  %v1182_v17 = vld [vmem:[%s1599_s1 + $0xe0] sm:$0xff]   ;;  %v1186_v21 = vld [vmem:[%s1599_s1 + $0xe8] sm:$0xff]  }
   0x7   :  { %v1179_v14 = vld [vmem:[%s1599_s1 + $0x18] sm:$0xff]   ;;  %v1183_v18 = vld [vmem:[%s1599_s1 + $0x20] sm:$0xff]   ;;  %v1187_v22 = vld [vmem:[%s1599_s1 + $0x28] sm:$0xff]  }
   0x8   :  { %995 = vmatpush3.bf16.msra.mxu0 %v1171_v6  ;;  %v1180_v15 = vld [vmem:[%s1599_s1 + $0x98] sm:$0xff]   ;;  %v1184_v19 = vld [vmem:[%s1599_s1 + $0xa0] sm:$0xff]   ;;  %v1188_v23 = vld [vmem:[%s1599_s1 + $0xa8] sm:$0xff]  }
   0x9   :  { %1053 = vmatpush3.bf16.msra.mxu1 %v1172_v7  ;;  %996 = vmatprep.subr.bf16.mxu0 %v1173_v8  ;;  %v1189_v24 = vld [vmem:[%s1599_s1 + $0x70] sm:$0xff]   ;;  %v1193_v28 = vld [vmem:[%s1599_s1 + $0x78] sm:$0xff]   ;;  %v1202_v36 = vld [vmem:[%s1600_s0 + $0xc] ss:$20 sps:$4 sm:$0xff]  }
   0xa   :  { %1054 = vmatprep.subr.bf16.mxu1 %v1174_v9  ;;  %v1190_v25 = vld [vmem:[%s1599_s1 + $0xf0] sm:$0xff]   ;;  %v1194_v29 = vld [vmem:[%s1599_s1 + $0xf8] sm:$0xff]   ;;  %v1203_v37 = vld [vmem:[%s1599_s1 + $0x100] sm:$0xff]   ;;  %658 = vmatprep.mubr.bf16.mxu1 %v1202_v36 }
   0xb   :  { %v1191_v26 = vld [vmem:[%s1599_s1 + $0x30] sm:$0xff]   ;;  %v1195_v30 = vld [vmem:[%s1599_s1 + $0x38] sm:$0xff]   ;;  %v1204_v38 = vld [vmem:[%s1600_s0 + $0x2c] ss:$20 sps:$4 sm:$0xff]  }
   0xc   :  { %997 = vmatpush3.bf16.msra.mxu0 %v1175_v10  ;;  %v1192_v27 = vld [vmem:[%s1599_s1 + $0xb0] sm:$0xff]   ;;  %v1196_v31 = vld [vmem:[%s1599_s1 + $0xb8] sm:$0xff]   ;;  %v1214_v43 = vld [vmem:[%s1599_s1 + $0x108] sm:$0xff]  }
   0xd   :  { %1055 = vmatpush3.bf16.msra.mxu1 %v1176_v11  ;;  %998 = vmatprep.subr.bf16.mxu0 %v1177_v12  ;;  %v1197_v32 = vld [vmem:[%s1600_s0] ss:$20 sps:$4 sm:$0xff]   ;;  %v1199_v33 = vld [vmem:[%s1600_s0 + $0x4] ss:$20 sps:$4 sm:$0xff]   ;;  %v1200_v35 = vld [vmem:[%s1600_s0 + $0x8] ss:$20 sps:$4 sm:$0xff]  }
   0xe   :  { %1056 = vmatprep.subr.bf16.mxu1 %v1178_v13  ;;  %570 = vmatprep.mubr.bf16.mxu0 %v1199_v33  ;;  %v1206_v39 = vld [vmem:[%s1600_s0 + $0x34] ss:$20 sps:$4 sm:$0xff]   ;;  %v1209_v41 = vld [vmem:[%s1600_s0 + $0x30] ss:$20 sps:$4 sm:$0xff]   ;;  %v1216_v47 = vld [vmem:[%s1600_s0 + $0x58] ss:$20 sps:$4 sm:$0xff]  }
   0xf   :  { %v1208_v40 = vld [vmem:[%s1600_s0 + $0x28] ss:$20 sps:$4 sm:$0xff]   ;;  %v1223_v45 = vld [vmem:[%s1599_s1 + $0x110] sm:$0xff]   ;;  %v1219_v49 = vld [vmem:[%s1600_s0 + $0x84] ss:$20 sps:$4 sm:$0xff]  }
  0x10   :  { %999 = vmatpush3.bf16.msra.mxu0 %v1179_v14  ;;  %v1210_v42 = vld [vmem:[%s1600_s0 + $0x54] ss:$20 sps:$4 sm:$0xff]   ;;  %v1212_v44 = vld [vmem:[%s1600_s0 + $0x5c] ss:$20 sps:$4 sm:$0xff]   ;;  %v1221_v51 = vld [vmem:[%s1600_s0 + $0x78] ss:$20 sps:$4 sm:$0xff]  }
  0x11   :  { %1057 = vmatpush3.bf16.msra.mxu1 %v1180_v15  ;;  %1000 = vmatprep.subr.bf16.mxu0 %v1181_v16  ;;  %v1215_v46 = vld [vmem:[%s1600_s0 + $0x50] ss:$20 sps:$4 sm:$0xff]   ;;  %v1236_v50 = vld [vmem:[%s1599_s1 + $0x118] sm:$0xff]   ;;  %v1222_v52 = vld [vmem:[%s1600_s0 + $0x80] ss:$20 sps:$4 sm:$0xff]  }
  0x12   :  { %1058 = vmatprep.subr.bf16.mxu1 %v1182_v17  ;;  %v1217_v48 = vld [vmem:[%s1600_s0 + $0x7c] ss:$20 sps:$4 sm:$0xff]   ;;  %v1224_v53 = vld [vmem:[%s1600_s0 + $0xa4] ss:$20 sps:$4 sm:$0xff]   ;;  %v1226_v54 = vld [vmem:[%s1600_s0 + $0xac] ss:$20 sps:$4 sm:$0xff]  }
  0x13   :  { %v1228_v55 = vld [vmem:[%s1600_s0 + $0xa0] ss:$20 sps:$4 sm:$0xff]   ;;  %v1229_v56 = vld [vmem:[%s1600_s0 + $0xa8] ss:$20 sps:$4 sm:$0xff]   ;;  %v1235_v62 = vld [vmem:[%s1600_s0 + $0xd0] ss:$20 sps:$4 sm:$0xff]  }
  0x14   :  { %1001 = vmatpush3.bf16.msra.mxu0 %v1183_v18  ;;  %v1230_v57 = vld [vmem:[%s1600_s0 + $0xcc] ss:$20 sps:$4 sm:$0xff]   ;;  %v1232_v58 = vld [vmem:[%s1600_s0 + $0xd4] ss:$20 sps:$4 sm:$0xff]   ;;  %v52_v60 = vld [vmem:[%s1600_s0 + $0xf8] sm:$0x11] }
  0x15   :  { %1059 = vmatpush3.bf16.msra.mxu1 %v1184_v19  ;;  %1002 = vmatprep.subr.bf16.mxu0 %v1185_v20  ;;  %v51_v59 = vld [vmem:[%s1600_s0 + $0xf0] sm:$0x11]  ;;  %v1234_v61 = vld [vmem:[%s1600_s0 + $0xc8] ss:$20 sps:$4 sm:$0xff]   ;;  %v921_v0 = vcombine.high %v52_v60, %v52_v60  ;;  %v920_v2 = vcombine.low %v52_v60, %v52_v60  ;;  %v1243_v5 = vld [vmem:[%s1600_s0 + $0x38] ss:$20 sps:$4 sm:$0xff]  }
  0x16   :  { %1060 = vmatprep.subr.bf16.mxu1 %v1186_v21  ;;  %v919_v63 = vcombine.high %v51_v59, %v51_v59  ;;  %v918_v1 = vcombine.low %v51_v59, %v51_v59  ;;  %v1241_v3 = vld [vmem:[%s1600_s0 + $0x10] ss:$20 sps:$4 sm:$0xff]   ;;  %v1244_v6 = vld [vmem:[%s1600_s0 + $0xd8] ss:$20 sps:$4 sm:$0xff]   ;;  %v1245_v7 = vld [vmem:[%s1600_s0 + $0x60] ss:$20 sps:$4 sm:$0xff]  }
  0x17   :  { %v1242_v4 = vld [vmem:[%s1600_s0 + $0xb0] ss:$20 sps:$4 sm:$0xff]   ;;  %v1246_v8 = vld [vmem:[%s1600_s0 + $0x100] ss:$0 sps:$4 sm:$0x11]  }
  0x18   :  { %1003 = vmatpush3.bf16.msra.mxu0 %v1187_v22  ;;  %v1247_v9 = vld [vmem:[%s1600_s0 + $0x88] ss:$20 sps:$4 sm:$0xff]   ;;  %v1509_v11 = vld [vmem:[%s1601_s2] ss:$0 sm:$0xff] }
  0x19   :  { %1061 = vmatpush3.bf16.msra.mxu1 %v1188_v23  ;;  %1004 = vmatprep.subr.bf16.mxu0 %v1189_v24 }
  0x1a   :  { %1062 = vmatprep.subr.bf16.mxu1 %v1190_v25 }
  0x1c   :  { %1005 = vmatpush3.bf16.msra.mxu0 %v1191_v26 }
  0x1d   :  { %1063 = vmatpush3.bf16.msra.mxu1 %v1192_v27  ;;  %1006 = vmatprep.subr.bf16.mxu0 %v1193_v28 }
  0x1e   :  { %1064 = vmatprep.subr.bf16.mxu1 %v1194_v29 }
  0x20   :  { %1007 = vmatpush3.bf16.msra.mxu0 %v1195_v30 }
  0x21   :  { %1065 = vmatpush3.bf16.msra.mxu1 %v1196_v31  ;;  %1119 = vmatprep.subr.bf16.mxu0 %v1248_v34 }
  0x22   :  { %1155 = vmatprep.subr.bf16.mxu1 %v1248_v34 }
  0x23   :  { %571 = vmatmul.mubr.bf16.vlgmr.msra.gmra.mrb[0].mxu0 %v1197_v32 }
  0x24   :  { %659 = vmatmul.mubr.bf16.vlgmr.msra.gmra.mrb[0].mxu1 %v1200_v35  ;;  %1120 = vmatpush3.bf16.msra.mxu0 %v1203_v37 }
  0x25   :  { %578 = vmatprep.mubr.bf16.mxu0 %v1204_v38  ;;  %1159 = vmatpush3.bf16.msra.mxu1 %v1203_v37 }
  0x26   :  { %666 = vmatprep.mubr.bf16.mxu1 %v1206_v39  ;;  %1121 = vmatprep.subr.bf16.mxu0 %v1248_v34 }
  0x27   :  { %1156 = vmatprep.subr.bf16.mxu1 %v1248_v34 }
  0x28   :  { %1122 = vmatpush3.bf16.msra.mxu0 %v1214_v43 }
  0x29   :  { %1160 = vmatpush3.bf16.msra.mxu1 %v1214_v43  ;;  %1123 = vmatprep.subr.bf16.mxu0 %v1248_v34 }
  0x2a   :  { %1157 = vmatprep.subr.bf16.mxu1 %v1248_v34 }
  0x2b   :  { %579 = vmatmul.mubr.bf16.gmra.mrb[4].mxu0 %v1208_v40 }
  0x2c   :  { %667 = vmatmul.mubr.bf16.gmra.mrb[4].mxu1 %v1209_v41  ;;  %586 = vmatprep.mubr.bf16.mxu0 %v1210_v42 }
  0x2d   :  { %674 = vmatprep.mubr.bf16.mxu1 %v1212_v44  ;;  %1124 = vmatpush3.bf16.msra.mxu0 %v1223_v45 }
  0x2e   :  { %1161 = vmatpush3.bf16.msra.mxu1 %v1223_v45  ;;  %1125 = vmatprep.subr.bf16.mxu0 %v1248_v34 }
  0x2f   :  { %1158 = vmatprep.subr.bf16.mxu1 %v1248_v34 }
  0x31   :  { %1126 = vmatpush3.bf16.msra.mxu0 %v1236_v50 }
  0x32   :  { %1162 = vmatpush3.bf16.msra.mxu1 %v1236_v50 }
  0x33   :  { %587 = vmatmul.mubr.bf16.gmra.mrb[8].mxu0 %v1215_v46 }
  0x34   :  { %675 = vmatmul.mubr.bf16.gmra.mrb[8].mxu1 %v1216_v47  ;;  %594 = vmatprep.mubr.bf16.mxu0 %v1217_v48 }
  0x35   :  { %682 = vmatprep.mubr.bf16.mxu1 %v1219_v49 }
  0x3b   :  { %595 = vmatmul.mubr.bf16.gmra.mrb[12].mxu0 %v1221_v51 }
  0x3c   :  { %683 = vmatmul.mubr.bf16.gmra.mrb[12].mxu1 %v1222_v52  ;;  %602 = vmatprep.mubr.bf16.mxu0 %v1224_v53 }
  0x3d   :  { %690 = vmatprep.mubr.bf16.mxu1 %v1226_v54 }
  0x43   :  { %603 = vmatmul.mubr.bf16.gmra.mrb[16].mxu0 %v1228_v55 }
  0x44   :  { %691 = vmatmul.mubr.bf16.gmra.mrb[16].mxu1 %v1229_v56  ;;  %610 = vmatprep.mubr.bf16.mxu0 %v1230_v57 }
  0x45   :  { %698 = vmatprep.mubr.bf16.mxu1 %v1232_v58 }
  0x4b   :  { %611 = vmatmul.mubr.bf16.gmra.mrb[20].mxu0 %v1234_v61 }
  0x4c   :  { %699 = vmatmul.mubr.bf16.gmra.mrb[20].mxu1 %v1235_v62  ;;  %618 = vmatprep.mubr.bf16.mxu0 %v919_v63 }
  0x4d   :  { %706 = vmatprep.mubr.bf16.mxu1 %v921_v0 }
  0x53   :  { %619 = vmatmul.mubr.bf16.gmra.mrb[24].mxu0 %v918_v1 }
  0x54   :  { %707 = vmatmul.mubr.bf16.gmra.mrb[24].mxu1 %v920_v2  ;;  %1127 = vmatprep.mubr.msk.bf16.mxu0 %vm1249_vm0, %v1248_v34 }
  0x55   :  { %1143 = vmatprep.mubr.msk.bf16.mxu1 %vm1249_vm0, %v1248_v34 }
  0x5b   :  { %1128 = vmatmul.mubr.msk.bf16.vlgmr.msra.gmra.mrb[28].mxu0 %vm516_vm1, %v1241_v3 }
  0x5c   :  { %1144 = vmatmul.mubr.msk.bf16.vlgmr.msra.gmra.mrb[28].mxu1 %vm516_vm1, %v1242_v4  ;;  %1131 = vmatprep.mubr.msk.bf16.mxu0 %vm1249_vm0, %v1248_v34 }
  0x5d   :  { %1147 = vmatprep.mubr.msk.bf16.mxu1 %vm1249_vm0, %v1248_v34 }
  0x63   :  { %1132 = vmatmul.mubr.msk.bf16.gmra.mrb[32].mxu0 %vm516_vm1, %v1243_v5 }
  0x64   :  { %1148 = vmatmul.mubr.msk.bf16.gmra.mrb[32].mxu1 %vm516_vm1, %v1244_v6  ;;  %1135 = vmatprep.mubr.msk.bf16.mxu0 %vm1249_vm0, %v1248_v34 }
  0x65   :  { %1151 = vmatprep.mubr.msk.bf16.mxu1 %vm1249_vm0, %v1248_v34 }
  0x6b   :  { %1136 = vmatmul.mubr.msk.bf16.gmra.mrb[36].mxu0 %vm516_vm1, %v1245_v7 }
  0x6c   :  { %1152 = vmatmul.mubr.msk.bf16.gmra.mrb[36].mxu1 %vm516_vm1, %v1246_v8  ;;  %1139 = vmatprep.mubr.msk.bf16.mxu0 %vm1249_vm0, %v1248_v34 }
  0x73   :  { %1140 = vmatmul.mubr.msk.bf16.gmra.mrb[40].mxu0 %vm516_vm1, %v1247_v9 }
  0xf6   :  { %v1008_v10 = vpop.f32.mrb[0].mxu0 }
  0xf7   :  { %v1009_v12 = vpop.f32.mrb[1].mxu0  ;;  %v1066_v13 = vpop.f32.mrb[0].mxu1 }
  0xf8   :  { %v1010_v14 = vadd.f32 %v1009_v12, %v1008_v10  ;;  %v1011_v15 = vpop.f32.mrb[2].mxu0  ;;  %v1067_v16 = vpop.f32.mrb[1].mxu1 }
  0xf9   :  { %v1012_v17 = vpop.f32.mrb[3].mxu0  ;;  %v1068_v18 = vadd.f32 %v1067_v16, %v1066_v13  ;;  %v1069_v19 = vpop.f32.mrb[2].mxu1 }
  0xfa   :  { %v573_v20 = vadd.f32 %v1010_v14, %v1509_v11  ;;  %v1013_v21 = vadd.f32 %v1012_v17, %v1011_v15  ;;  %v1070_v22 = vpop.f32.mrb[3].mxu1 }
  0xfb   :  { %v1071_v23 = vadd.f32 %v1070_v22, %v1069_v19 }
  0xfc   :  { %v576_v24 = vadd.f32 %v1013_v21, %v1509_v11  ;;  %v1513_v25 = vadd.f32 %v1068_v18, %v573_v20 }
  0xfe   :  { %v1014_v26 = vpop.f32.mrb[4].mxu0  ;;  %v1515_v27 = vadd.f32 %v1071_v23, %v576_v24 }
  0xff   :  { %v1015_v28 = vpop.f32.mrb[5].mxu0  ;;  %v1072_v29 = vpop.f32.mrb[4].mxu1 }
 0x100   :  { %v1016_v30 = vadd.f32 %v1015_v28, %v1014_v26  ;;  %v1017_v31 = vpop.f32.mrb[6].mxu0  ;;  %v1073_v32 = vpop.f32.mrb[5].mxu1 }
 0x101   :  { %v1018_v33 = vpop.f32.mrb[7].mxu0  ;;  %v1074_v34 = vadd.f32 %v1073_v32, %v1072_v29  ;;  %v1075_v35 = vpop.f32.mrb[6].mxu1 }
 0x102   :  { %v581_v36 = vadd.f32 %v1016_v30, %v1509_v11  ;;  %v1019_v37 = vadd.f32 %v1018_v33, %v1017_v31  ;;  %v1076_v38 = vpop.f32.mrb[7].mxu1 }
 0x103   :  { %v1077_v39 = vadd.f32 %v1076_v38, %v1075_v35 }
 0x104   :  { %v584_v40 = vadd.f32 %v1019_v37, %v1509_v11  ;;  %v1519_v41 = vadd.f32 %v1074_v34, %v581_v36 }
 0x106   :  { %v1020_v42 = vpop.f32.mrb[8].mxu0  ;;  %v1521_v43 = vadd.f32 %v1077_v39, %v584_v40 }
 0x107   :  { %v1021_v44 = vpop.f32.mrb[9].mxu0  ;;  %v1078_v45 = vpop.f32.mrb[8].mxu1 }
 0x108   :  { %v1022_v46 = vadd.f32 %v1021_v44, %v1020_v42  ;;  %v1023_v47 = vpop.f32.mrb[10].mxu0  ;;  %v1079_v48 = vpop.f32.mrb[9].mxu1 }
 0x109   :  { %v1024_v49 = vpop.f32.mrb[11].mxu0  ;;  %v1080_v50 = vadd.f32 %v1079_v48, %v1078_v45  ;;  %v1081_v51 = vpop.f32.mrb[10].mxu1 }
 0x10a   :  { %v589_v52 = vadd.f32 %v1022_v46, %v1509_v11  ;;  %v1025_v53 = vadd.f32 %v1024_v49, %v1023_v47  ;;  %v1082_v54 = vpop.f32.mrb[11].mxu1 }
 0x10b   :  { %v1083_v55 = vadd.f32 %v1082_v54, %v1081_v51 }
 0x10c   :  { %v592_v56 = vadd.f32 %v1025_v53, %v1509_v11  ;;  %v1525_v57 = vadd.f32 %v1080_v50, %v589_v52 }
 0x10e   :  { %v1026_v58 = vpop.f32.mrb[12].mxu0  ;;  %v1527_v59 = vadd.f32 %v1083_v55, %v592_v56 }
 0x10f   :  { %v1027_v60 = vpop.f32.mrb[13].mxu0  ;;  %v1084_v61 = vpop.f32.mrb[12].mxu1 }
 0x110   :  { %v1028_v62 = vadd.f32 %v1027_v60, %v1026_v58  ;;  %v1029_v63 = vpop.f32.mrb[14].mxu0  ;;  %v1085_v0 = vpop.f32.mrb[13].mxu1 }
 0x111   :  { %v1030_v1 = vpop.f32.mrb[15].mxu0  ;;  %v1086_v2 = vadd.f32 %v1085_v0, %v1084_v61  ;;  %v1087_v3 = vpop.f32.mrb[14].mxu1 }
 0x112   :  { %v597_v4 = vadd.f32 %v1028_v62, %v1509_v11  ;;  %v1031_v5 = vadd.f32 %v1030_v1, %v1029_v63  ;;  %v1088_v6 = vpop.f32.mrb[15].mxu1 }
 0x113   :  { %v1089_v7 = vadd.f32 %v1088_v6, %v1087_v3 }
 0x114   :  { %v600_v8 = vadd.f32 %v1031_v5, %v1509_v11  ;;  %v1531_v9 = vadd.f32 %v1086_v2, %v597_v4 }
 0x116   :  { %v1032_v10 = vpop.f32.mrb[16].mxu0  ;;  %v1533_v12 = vadd.f32 %v1089_v7, %v600_v8 }
 0x117   :  { %v1033_v13 = vpop.f32.mrb[17].mxu0  ;;  %v1090_v14 = vpop.f32.mrb[16].mxu1 }
 0x118   :  { %v1034_v15 = vadd.f32 %v1033_v13, %v1032_v10  ;;  %v1035_v16 = vpop.f32.mrb[18].mxu0  ;;  %v1091_v17 = vpop.f32.mrb[17].mxu1 }
 0x119   :  { %v1036_v18 = vpop.f32.mrb[19].mxu0  ;;  %v1092_v19 = vadd.f32 %v1091_v17, %v1090_v14  ;;  %v1093_v20 = vpop.f32.mrb[18].mxu1 }
 0x11a   :  { %v605_v21 = vadd.f32 %v1034_v15, %v1509_v11  ;;  %v1037_v22 = vadd.f32 %v1036_v18, %v1035_v16  ;;  %v1094_v23 = vpop.f32.mrb[19].mxu1 }
 0x11b   :  { %v1095_v24 = vadd.f32 %v1094_v23, %v1093_v20 }
 0x11c   :  { %v608_v26 = vadd.f32 %v1037_v22, %v1509_v11  ;;  %v693_v28 = vadd.f32 %v1092_v19, %v605_v21 }
 0x11e   :  { %v1038_v29 = vpop.f32.mrb[20].mxu0  ;;  %v696_v30 = vadd.f32 %v1095_v24, %v608_v26 }
 0x11f   :  { %v1039_v31 = vpop.f32.mrb[21].mxu0  ;;  %v1096_v32 = vpop.f32.mrb[20].mxu1 }
 0x120   :  { %v1040_v33 = vadd.f32 %v1039_v31, %v1038_v29  ;;  %v1041_v34 = vpop.f32.mrb[22].mxu0  ;;  %v1097_v35 = vpop.f32.mrb[21].mxu1 }
 0x121   :  { %v1042_v36 = vpop.f32.mrb[23].mxu0  ;;  %v1098_v37 = vadd.f32 %v1097_v35, %v1096_v32  ;;  %v1099_v38 = vpop.f32.mrb[22].mxu1 }
 0x122   :  { %v613_v39 = vadd.f32 %v1040_v33, %v1509_v11  ;;  %v1043_v40 = vadd.f32 %v1042_v36, %v1041_v34  ;;  %v1100_v42 = vpop.f32.mrb[23].mxu1 }
 0x123   :  { %v1101_v44 = vadd.f32 %v1100_v42, %v1099_v38 }
 0x124   :  { %v616_v45 = vadd.f32 %v1043_v40, %v1509_v11  ;;  %v701_v46 = vadd.f32 %v1098_v37, %v613_v39 }
 0x126   :  { %v1044_v47 = vpop.f32.mrb[24].mxu0  ;;  %v704_v48 = vadd.f32 %v1101_v44, %v616_v45 }
 0x127   :  { %v1045_v49 = vpop.f32.mrb[25].mxu0  ;;  %v1102_v50 = vpop.f32.mrb[24].mxu1 }
 0x128   :  { %v1046_v51 = vadd.f32 %v1045_v49, %v1044_v47  ;;  %v1047_v52 = vpop.f32.mrb[26].mxu0  ;;  %v1103_v53 = vpop.f32.mrb[25].mxu1 }
 0x129   :  { %v1048_v54 = vpop.f32.mrb[27].mxu0  ;;  %v1104_v55 = vadd.f32 %v1103_v53, %v1102_v50  ;;  %v1105_v56 = vpop.f32.mrb[26].mxu1 }
 0x12a   :  { %v621_v58 = vadd.f32 %v1046_v51, %v1509_v11  ;;  %v1106_v60 = vpop.f32.mrb[27].mxu1 }
 0x12c   :  { %v709_v61 = vadd.f32 %v1104_v55, %v621_v58 }
 0x12e   :  { %v748_v62 = vpop.f32.mrb[28].mxu0 }
 0x12f   :  { %v749_v63 = vadd.f32 %v748_v62, %v1513_v25  ;;  %v780_v0 = vpop.f32.mrb[28].mxu1  ;;  %v1129_v1 = vpop.f32.mrb[29].mxu0 }
 0x130   :  { %v781_v2 = vadd.f32 %v780_v0, %v693_v28  ;;  %v1145_v3 = vpop.f32.mrb[29].mxu1  ;;  %v751_v4 = vpop.f32.mrb[30].mxu0 }
 0x131   :  { %v802_v5 = vmax.f32 %v749_v63, 0.0  ;;  %v752_v6 = vadd.f32 %v751_v4, %v1515_v27  ;;  %v783_v7 = vpop.f32.mrb[30].mxu1  ;;  %v1130_v8 = vpop.f32.mrb[31].mxu0 }
 0x132   :  { %v810_v10 = vmax.f32 %v781_v2, 0.0  ;;  %v784_v13 = vadd.f32 %v783_v7, %v696_v30  ;;  %v1146_v14 = vpop.f32.mrb[31].mxu1 }
 0x133   :  { %v979_v11 = vpack.c.bf16 %v802_v5, %v802_v5  ;;  %v803_v15 = vmax.f32 %v752_v6, 0.0 }
 0x134   :  { %v987_v16 = vpack.c.bf16 %v810_v10, %v810_v10  ;;  %v811_v17 = vmax.f32 %v784_v13, 0.0 }
 0x135   :  { %869 = vst.msk [vmem:[%s1602_s3] sm:$0xf] %vm868_vm2, %v979_v11  ;;  %v980_v25 = vpack.c.bf16 %v803_v15, %v803_v15 }
 0x136   :  { %877 = vst.msk [vmem:[%s1602_s3 + $0x20] sm:$0xf] %vm868_vm2, %v987_v16  ;;  %v988_v27 = vpack.c.bf16 %v811_v17, %v811_v17  ;;  %v756_v18 = vpop.f32.mrb[32].mxu0 }
 0x137   :  { %870 = vst.msk [vmem:[%s1602_s3 + $0x4] sm:$0xf] %vm868_vm2, %v980_v25  ;;  %v757_v19 = vadd.f32 %v756_v18, %v1519_v41  ;;  %v788_v20 = vpop.f32.mrb[32].mxu1  ;;  %v1133_v21 = vpop.f32.mrb[33].mxu0 }
 0x138   :  { %878 = vst.msk [vmem:[%s1602_s3 + $0x24] sm:$0xf] %vm868_vm2, %v988_v27  ;;  %v789_v22 = vadd.f32 %v788_v20, %v701_v46  ;;  %v1149_v23 = vpop.f32.mrb[33].mxu1  ;;  %v759_v24 = vpop.f32.mrb[34].mxu0 }
 0x139   :  { %v804_v26 = vmax.f32 %v757_v19, 0.0  ;;  %v760_v28 = vadd.f32 %v759_v24, %v1521_v43  ;;  %v791_v29 = vpop.f32.mrb[34].mxu1  ;;  %v1134_v30 = vpop.f32.mrb[35].mxu0 }
 0x13a   :  { %v812_v31 = vmax.f32 %v789_v22, 0.0  ;;  %v792_v32 = vadd.f32 %v791_v29, %v704_v48  ;;  %v1150_v33 = vpop.f32.mrb[35].mxu1 }
 0x13b   :  { %v981_v34 = vpack.c.bf16 %v804_v26, %v804_v26  ;;  %v805_v41 = vmax.f32 %v760_v28, 0.0 }
 0x13c   :  { %v989_v35 = vpack.c.bf16 %v812_v31, %v812_v31  ;;  %v813_v36 = vmax.f32 %v792_v32, 0.0 }
 0x13d   :  { %871 = vst.msk [vmem:[%s1602_s3 + $0x8] sm:$0xf] %vm868_vm2, %v981_v34  ;;  %v982_v37 = vpack.c.bf16 %v805_v41, %v805_v41 }
 0x13e   :  { %879 = vst.msk [vmem:[%s1602_s3 + $0x28] sm:$0xf] %vm868_vm2, %v989_v35  ;;  %v990_v43 = vpack.c.bf16 %v813_v36, %v813_v36  ;;  %v764_v38 = vpop.f32.mrb[36].mxu0 }
 0x13f   :  { %872 = vst.msk [vmem:[%s1602_s3 + $0xc] sm:$0xf] %vm868_vm2, %v982_v37  ;;  %v765_v39 = vadd.f32 %v764_v38, %v1525_v57  ;;  %v796_v40 = vpop.f32.mrb[36].mxu1  ;;  %v1137_v42 = vpop.f32.mrb[37].mxu0 }
 0x140   :  { %880 = vst.msk [vmem:[%s1602_s3 + $0x2c] sm:$0xf] %vm868_vm2, %v990_v43  ;;  %v797_v44 = vadd.f32 %v796_v40, %v709_v61  ;;  %v767_v45 = vpop.f32.mrb[38].mxu0  ;;  %v1153_v46 = vpop.f32.mrb[37].mxu1 }
 0x141   :  { %v806_v47 = vmax.f32 %v765_v39, 0.0  ;;  %v768_v48 = vadd.f32 %v767_v45, %v1527_v59  ;;  %v1138_v49 = vpop.f32.mrb[39].mxu0  ;;  %v799_v50 = vpop.f32.mrb[38].mxu1 }
 0x142   :  { %v814_v51 = vmax.f32 %v797_v44, 0.0  ;;  %v1154_v52 = vpop.f32.mrb[39].mxu1 }
 0x143   :  { %v983_v53 = vpack.c.bf16 %v806_v47, %v806_v47  ;;  %v807_v57 = vmax.f32 %v768_v48, 0.0 }
 0x144   :  { %v991_v54 = vpack.c.bf16 %v814_v51, %v814_v51 }
 0x145   :  { %873 = vst.msk [vmem:[%s1602_s3 + $0x10] sm:$0xf] %vm868_vm2, %v983_v53  ;;  %v984_v55 = vpack.c.bf16 %v807_v57, %v807_v57 }
 0x146   :  { %882 = vst.msk [vmem:[%s1602_s3 + $0x30] sm:$0x1] %vm881_vm3, %v991_v54  ;;  %v772_v56 = vpop.f32.mrb[40].mxu0 }
 0x147   :  { %874 = vst.msk [vmem:[%s1602_s3 + $0x14] sm:$0xf] %vm868_vm2, %v984_v55  ;;  %v773_v59 = vadd.f32 %v772_v56, %v1531_v9  ;;  %v1141_v58 = vpop.f32.mrb[41].mxu0 }
 0x148   :  { %v775_v60 = vpop.f32.mrb[42].mxu0 }
 0x149   :  { %v808_v61 = vmax.f32 %v773_v59, 0.0  ;;  %v776_v62 = vadd.f32 %v775_v60, %v1533_v12  ;;  %v1142_v63 = vpop.f32.mrb[43].mxu0 }
 0x14b   :  { %v985_v0 = vpack.c.bf16 %v808_v61, %v808_v61  ;;  %v809_v1 = vmax.f32 %v776_v62, 0.0 }
 0x14d   :  { %875 = vst.msk [vmem:[%s1602_s3 + $0x18] sm:$0xf] %vm868_vm2, %v985_v0  ;;  %v986_v2 = vpack.c.bf16 %v809_v1, %v809_v1 }
 0x14f   :  { %876 = vst.msk [vmem:[%s1602_s3 + $0x1c] sm:$0xf] %vm868_vm2, %v986_v2 }

// kernel: dqn_forward.7
= control target key start
LH: loop header
LB: loop body
LE: loop exit
PB: predicated region body
PF: predicated region fallthrough
CT: control target
= control target key end

     0   :  { %v818_v36 = vlaneseq  ;;  %v9008_v37 = vmov 1966171168   ;;  %s11881_s0 = inlined_call_operand.vmem [shape: bf16[2,3136], index: 0, kind: input, shape index: {}]   ;;  %s11882_s1 = inlined_call_operand.vmem [shape: bf16[3136,512], index: 1, kind: input, shape index: {}]   ;;  %s11883_s2 = inlined_call_operand.vmem [shape: f32[1,512], index: 2, kind: input, shape index: {}]   ;;  %s11884_s3 = inlined_call_operand.vmem [shape: bf16[512,256], index: 3, kind: input, shape index: {}]   ;;  %s11885_s4 = inlined_call_operand.vmem [shape: f32[1,256], index: 4, kind: input, shape index: {}]   ;;  %s11886_s5 = inlined_call_operand.vmem [shape: bf16[256,6], index: 5, kind: input, shape index: {}]   ;;  %s11887_s6 = inlined_call_operand.vmem [shape: f32[1,6], index: 6, kind: input, shape index: {}]   ;;  %s11888_s7 = inlined_call_operand.hbm [shape: f32[2,6], index: 7, kind: output, shape index: {}]  }
   0x1   :  { %v7693_v0 = vld [vmem:[%s11882_s1 + $0x4] ss:$16 sps:$4 sm:$0xff]   ;;  %v7697_v2 = vld [vmem:[%s11882_s1] ss:$16 sps:$4 sm:$0xff]   ;;  %v844_v38 = vunpack.c.l.s4 %v9008_v37 }
   0x2   :  { %v7695_v1 = vld [vmem:[%s11882_s1 + $0x204] ss:$16 sps:$4 sm:$0xff]   ;;  %4951 = vmatprep.subr.bf16.mxu1 %v7693_v0  ;;  %v7698_v3 = vld [vmem:[%s11882_s1 + $0x200] ss:$16 sps:$4 sm:$0xff]   ;;  %v9168_v42 = vshrl.u32 %v818_v36, 7 }
   0x3   :  { %4992 = vmatprep.subr.bf16.mxu0 %v7695_v1  ;;  %v7699_v4 = vld [vmem:[%s11882_s1 + $0x24] ss:$16 sps:$4 sm:$0xff]   ;;  %4952 = vmatpush1.bf16.msra.mxu1 %v7697_v2  ;;  %v7703_v6 = vld [vmem:[%s11882_s1 + $0x20] ss:$16 sps:$4 sm:$0xff]   ;;  %v845_v43 = vunpack.c.0.s8 %v844_v38  ;;  %v7816_v36 = vld [vmem:[%s11882_s1 + $0x88] ss:$16 sps:$4 sm:$0xff]  }
   0x4   :  { %4993 = vmatpush1.bf16.msra.mxu0 %v7698_v3  ;;  %v7701_v5 = vld [vmem:[%s11882_s1 + $0x224] ss:$16 sps:$4 sm:$0xff]   ;;  %4953 = vmatprep.subr.bf16.mxu1 %v7699_v4  ;;  %v7704_v7 = vld [vmem:[%s11882_s1 + $0x220] ss:$16 sps:$4 sm:$0xff]   ;;  %v7824_v38 = vld [vmem:[%s11882_s1 + $0xac] ss:$16 sps:$4 sm:$0xff]  }
   0x5   :  { %4994 = vmatprep.subr.bf16.mxu0 %v7701_v5  ;;  %v7705_v8 = vld [vmem:[%s11882_s1 + $0x44] ss:$16 sps:$4 sm:$0xff]   ;;  %v7709_v10 = vld [vmem:[%s11882_s1 + $0x40] ss:$16 sps:$4 sm:$0xff]   ;;  %v9186_v49 = vsub.s32 %v845_v43, %v9168_v42  ;;  %v7830_v43 = vld [vmem:[%s11882_s1 + $0xcc] ss:$16 sps:$4 sm:$0xff]  }
   0x6   :  { %v7707_v9 = vld [vmem:[%s11882_s1 + $0x244] ss:$16 sps:$4 sm:$0xff]   ;;  %v7710_v11 = vld [vmem:[%s11882_s1 + $0x240] ss:$16 sps:$4 sm:$0xff]  }
   0x7   :  { %4954 = vmatpush1.bf16.msra.mxu1 %v7703_v6  ;;  %v7711_v12 = vld [vmem:[%s11882_s1 + $0x64] ss:$16 sps:$4 sm:$0xff]   ;;  %v7715_v14 = vld [vmem:[%s11882_s1 + $0x60] ss:$16 sps:$4 sm:$0xff]  }
   0x8   :  { %4995 = vmatpush1.bf16.msra.mxu0 %v7704_v7  ;;  %4955 = vmatprep.subr.bf16.mxu1 %v7705_v8  ;;  %v7713_v13 = vld [vmem:[%s11882_s1 + $0x264] ss:$16 sps:$4 sm:$0xff]   ;;  %v7716_v15 = vld [vmem:[%s11882_s1 + $0x260] ss:$16 sps:$4 sm:$0xff]  }
   0x9   :  { %4996 = vmatprep.subr.bf16.mxu0 %v7707_v9  ;;  %v7717_v16 = vld [vmem:[%s11882_s1 + $0x84] ss:$16 sps:$4 sm:$0xff]   ;;  %v7721_v18 = vld [vmem:[%s11882_s1 + $0x80] ss:$16 sps:$4 sm:$0xff]  }
   0xa   :  { %v7719_v17 = vld [vmem:[%s11882_s1 + $0x284] ss:$16 sps:$4 sm:$0xff]   ;;  %v7722_v19 = vld [vmem:[%s11882_s1 + $0x280] ss:$16 sps:$4 sm:$0xff]  }
   0xb   :  { %4956 = vmatpush1.bf16.msra.mxu1 %v7709_v10  ;;  %v7723_v20 = vld [vmem:[%s11882_s1 + $0xa4] ss:$16 sps:$4 sm:$0xff]   ;;  %v7727_v22 = vld [vmem:[%s11882_s1 + $0xa0] ss:$16 sps:$4 sm:$0xff]  }
   0xc   :  { %4997 = vmatpush1.bf16.msra.mxu0 %v7710_v11  ;;  %4957 = vmatprep.subr.bf16.mxu1 %v7711_v12  ;;  %v7725_v21 = vld [vmem:[%s11882_s1 + $0x2a4] ss:$16 sps:$4 sm:$0xff]   ;;  %v7728_v23 = vld [vmem:[%s11882_s1 + $0x2a0] ss:$16 sps:$4 sm:$0xff]  }
   0xd   :  { %4998 = vmatprep.subr.bf16.mxu0 %v7713_v13  ;;  %v7729_v24 = vld [vmem:[%s11882_s1 + $0xc4] ss:$16 sps:$4 sm:$0xff]   ;;  %v7733_v26 = vld [vmem:[%s11882_s1 + $0xc0] ss:$16 sps:$4 sm:$0xff]  }
   0xe   :  { %v7731_v25 = vld [vmem:[%s11882_s1 + $0x2c4] ss:$16 sps:$4 sm:$0xff]   ;;  %v7734_v27 = vld [vmem:[%s11882_s1 + $0x2c0] ss:$16 sps:$4 sm:$0xff]  }
   0xf   :  { %4958 = vmatpush1.bf16.msra.mxu1 %v7715_v14  ;;  %v7735_v28 = vld [vmem:[%s11882_s1 + $0xe4] ss:$16 sps:$4 sm:$0xff]   ;;  %v7739_v30 = vld [vmem:[%s11882_s1 + $0xe0] ss:$16 sps:$4 sm:$0xff]  }
  0x10   :  { %4999 = vmatpush1.bf16.msra.mxu0 %v7716_v15  ;;  %4959 = vmatprep.subr.bf16.mxu1 %v7717_v16  ;;  %v7737_v29 = vld [vmem:[%s11882_s1 + $0x2e4] ss:$16 sps:$4 sm:$0xff]   ;;  %v7740_v31 = vld [vmem:[%s11882_s1 + $0x2e0] ss:$16 sps:$4 sm:$0xff]   ;;  %v7794_v15 = vld [vmem:[%s11882_s1 + $0xc] ss:$16 sps:$4 sm:$0xff]  }
  0x11   :  { %5000 = vmatprep.subr.bf16.mxu0 %v7719_v17  ;;  %v7741_v32 = vld [vmem:[%s11882_s1 + $0x104] ss:$16 sps:$4 sm:$0xff]   ;;  %v7745_v34 = vld [vmem:[%s11882_s1 + $0x100] ss:$16 sps:$4 sm:$0xff]  }
  0x12   :  { %v7743_v33 = vld [vmem:[%s11882_s1 + $0x304] ss:$16 sps:$4 sm:$0xff]   ;;  %v7746_v35 = vld [vmem:[%s11882_s1 + $0x300] ss:$16 sps:$4 sm:$0xff]  }
  0x13   :  { %4960 = vmatpush1.bf16.msra.mxu1 %v7721_v18  ;;  %v7747_v39 = vld [vmem:[%s11882_s1 + $0x124] ss:$16 sps:$4 sm:$0xff]   ;;  %v7751_v41 = vld [vmem:[%s11882_s1 + $0x120] ss:$16 sps:$4 sm:$0xff]  }
  0x14   :  { %5001 = vmatpush1.bf16.msra.mxu0 %v7722_v19  ;;  %4961 = vmatprep.subr.bf16.mxu1 %v7723_v20  ;;  %v7749_v40 = vld [vmem:[%s11882_s1 + $0x324] ss:$16 sps:$4 sm:$0xff]   ;;  %v7752_v44 = vld [vmem:[%s11882_s1 + $0x320] ss:$16 sps:$4 sm:$0xff]   ;;  %v7792_v19 = vld [vmem:[%s11882_s1 + $0x8] ss:$16 sps:$4 sm:$0xff]  }
  0x15   :  { %5002 = vmatprep.subr.bf16.mxu0 %v7725_v21  ;;  %v7753_v45 = vld [vmem:[%s11882_s1 + $0x144] ss:$16 sps:$4 sm:$0xff]   ;;  %v7757_v47 = vld [vmem:[%s11882_s1 + $0x140] ss:$16 sps:$4 sm:$0xff]   ;;  %v7800_v21 = vld [vmem:[%s11882_s1 + $0x2c] ss:$16 sps:$4 sm:$0xff]  }
  0x16   :  { %v7755_v46 = vld [vmem:[%s11882_s1 + $0x344] ss:$16 sps:$4 sm:$0xff]   ;;  %v7758_v48 = vld [vmem:[%s11882_s1 + $0x340] ss:$16 sps:$4 sm:$0xff]  }
  0x17   :  { %4962 = vmatpush1.bf16.msra.mxu1 %v7727_v22  ;;  %v7759_v50 = vld [vmem:[%s11882_s1 + $0x164] ss:$16 sps:$4 sm:$0xff]   ;;  %v7763_v53 = vld [vmem:[%s11882_s1 + $0x160] ss:$16 sps:$4 sm:$0xff]  }
  0x18   :  { %5003 = vmatpush1.bf16.msra.mxu0 %v7728_v23  ;;  %4963 = vmatprep.subr.bf16.mxu1 %v7729_v24  ;;  %v7761_v51 = vld [vmem:[%s11882_s1 + $0x364] ss:$16 sps:$4 sm:$0xff]   ;;  %v7764_v55 = vld [vmem:[%s11882_s1 + $0x360] ss:$16 sps:$4 sm:$0xff]   ;;  %v7798_v24 = vld [vmem:[%s11882_s1 + $0x28] ss:$16 sps:$4 sm:$0xff]  }
  0x19   :  { %5004 = vmatprep.subr.bf16.mxu0 %v7731_v25  ;;  %v28_v52 = vld [vmem:[%s11881_s0] sm:$0xff] }
  0x1a   :  { %v849_v54 = vrot.slane %v28_v52, %v9186_v49  ;;  %v7765_v56 = vld [vmem:[%s11882_s1 + $0x184] ss:$16 sps:$4 sm:$0xff]   ;;  %v7769_v59 = vld [vmem:[%s11882_s1 + $0x180] ss:$16 sps:$4 sm:$0xff]   ;;  %v842_v5 = vcombine.high %v28_v52, %v28_v52  ;;  %v7842_v52 = vld [vmem:[%s11882_s1 + $0x10c] ss:$16 sps:$4 sm:$0xff]  }
  0x1b   :  { %4964 = vmatpush1.bf16.msra.mxu1 %v7733_v26  ;;  %v7767_v57 = vld [vmem:[%s11882_s1 + $0x384] ss:$16 sps:$4 sm:$0xff]   ;;  %v7770_v61 = vld [vmem:[%s11882_s1 + $0x380] ss:$16 sps:$4 sm:$0xff]   ;;  %v7806_v26 = vld [vmem:[%s11882_s1 + $0x4c] ss:$16 sps:$4 sm:$0xff]  }
  0x1c   :  { %5005 = vmatpush1.bf16.msra.mxu0 %v7734_v27  ;;  %4965 = vmatprep.subr.bf16.mxu1 %v7735_v28  ;;  %v857_v58 = vcombine.high %v849_v54, %v849_v54  ;;  %v7771_v62 = vld [vmem:[%s11882_s1 + $0x1a4] ss:$16 sps:$4 sm:$0xff]   ;;  %v7775_v1 = vld [vmem:[%s11882_s1 + $0x1a0] ss:$16 sps:$4 sm:$0xff]   ;;  %v9251_v10 = vrot.slane %v842_v5, %v9186_v49  ;;  %v9257_v12 = vrot.slane %v849_v54, %v9186_v49  ;;  %v7804_v28 = vld [vmem:[%s11882_s1 + $0x48] ss:$16 sps:$4 sm:$0xff]  }
  0x1d   :  { %5006 = vmatprep.subr.bf16.mxu0 %v7737_v29  ;;  %v7773_v63 = vld [vmem:[%s11882_s1 + $0x3a4] ss:$16 sps:$4 sm:$0xff]   ;;  %v7776_v2 = vld [vmem:[%s11882_s1 + $0x3a0] ss:$16 sps:$4 sm:$0xff]   ;;  %v7840_v54 = vld [vmem:[%s11882_s1 + $0x108] ss:$16 sps:$4 sm:$0xff]  }
  0x1e   :  { %v879_v60 = vrot.slane %v857_v58, %v9186_v49  ;;  %v7777_v3 = vld [vmem:[%s11882_s1 + $0x1c4] ss:$16 sps:$4 sm:$0xff]   ;;  %v7781_v6 = vld [vmem:[%s11882_s1 + $0x1c0] ss:$16 sps:$4 sm:$0xff]   ;;  %v858_v16 = vcombine.high %v9251_v10, %v9251_v10  ;;  %v9275_v18 = vcombine.high %v9257_v12, %v9257_v12  ;;  %v7846_v58 = vld [vmem:[%s11882_s1 + $0x128] ss:$16 sps:$4 sm:$0xff]  }
  0x1f   :  { %4966 = vmatpush1.bf16.msra.mxu1 %v7739_v30  ;;  %v7779_v4 = vld [vmem:[%s11882_s1 + $0x3c4] ss:$16 sps:$4 sm:$0xff]   ;;  %v7782_v7 = vld [vmem:[%s11882_s1 + $0x3c0] ss:$16 sps:$4 sm:$0xff]   ;;  %v7812_v30 = vld [vmem:[%s11882_s1 + $0x6c] ss:$16 sps:$4 sm:$0xff]  }
  0x20   :  { %5007 = vmatpush1.bf16.msra.mxu0 %v7740_v31  ;;  %4967 = vmatprep.subr.bf16.mxu1 %v7741_v32  ;;  %v9223_v0 = vcombine.high %v879_v60, %v879_v60  ;;  %v7783_v8 = vld [vmem:[%s11882_s1 + $0x1e4] ss:$16 sps:$4 sm:$0xff]   ;;  %v7787_v11 = vld [vmem:[%s11882_s1 + $0x1e0] ss:$16 sps:$4 sm:$0xff]   ;;  %v9287_v22 = vrot.slane %v858_v16, %v9186_v49  ;;  %v7810_v32 = vld [vmem:[%s11882_s1 + $0x68] ss:$16 sps:$4 sm:$0xff]  }
  0x21   :  { %5008 = vmatprep.subr.bf16.mxu0 %v7743_v33  ;;  %4983 = vmatprep.mubr.bf16.mxu1 %v879_v60  ;;  %v7785_v9 = vld [vmem:[%s11882_s1 + $0x3e4] ss:$16 sps:$4 sm:$0xff]   ;;  %v7788_v13 = vld [vmem:[%s11882_s1 + $0x3e0] ss:$16 sps:$4 sm:$0xff]   ;;  %v7866_v5 = vld [vmem:[%s11882_s1 + $0x18c] ss:$16 sps:$4 sm:$0xff]  }
  0x22   :  { %5024 = vmatprep.mubr.bf16.mxu0 %v9223_v0  ;;  %v7791_v14 = vld [vmem:[%s11882_s1 + $0x404] ss:$16 sps:$4 sm:$0xff]   ;;  %v7789_v17 = vld [vmem:[%s11882_s1 + $0x400] ss:$16 sps:$4 sm:$0xff]  }
  0x23   :  { %4968 = vmatpush1.bf16.msra.mxu1 %v7745_v34  ;;  %v7797_v20 = vld [vmem:[%s11882_s1 + $0x424] ss:$16 sps:$4 sm:$0xff]   ;;  %v7795_v23 = vld [vmem:[%s11882_s1 + $0x420] ss:$16 sps:$4 sm:$0xff]   ;;  %v7818_v34 = vld [vmem:[%s11882_s1 + $0x8c] ss:$16 sps:$4 sm:$0xff]  }
  0x24   :  { %5009 = vmatpush1.bf16.msra.mxu0 %v7746_v35  ;;  %4969 = vmatprep.subr.bf16.mxu1 %v7747_v39  ;;  %v7803_v25 = vld [vmem:[%s11882_s1 + $0x444] ss:$16 sps:$4 sm:$0xff]   ;;  %v7801_v27 = vld [vmem:[%s11882_s1 + $0x440] ss:$16 sps:$4 sm:$0xff]  }
  0x25   :  { %5010 = vmatprep.subr.bf16.mxu0 %v7749_v40  ;;  %v7809_v29 = vld [vmem:[%s11882_s1 + $0x464] ss:$16 sps:$4 sm:$0xff]   ;;  %v7807_v31 = vld [vmem:[%s11882_s1 + $0x460] ss:$16 sps:$4 sm:$0xff]   ;;  %v7822_v40 = vld [vmem:[%s11882_s1 + $0xa8] ss:$16 sps:$4 sm:$0xff]  }
  0x26   :  { %v7815_v33 = vld [vmem:[%s11882_s1 + $0x484] ss:$16 sps:$4 sm:$0xff]   ;;  %v7813_v35 = vld [vmem:[%s11882_s1 + $0x480] ss:$16 sps:$4 sm:$0xff]  }
  0x27   :  { %4970 = vmatpush1.bf16.msra.mxu1 %v7751_v41  ;;  %v7821_v37 = vld [vmem:[%s11882_s1 + $0x4a4] ss:$16 sps:$4 sm:$0xff]   ;;  %v7819_v39 = vld [vmem:[%s11882_s1 + $0x4a0] ss:$16 sps:$4 sm:$0xff]  }
  0x28   :  { %5011 = vmatpush1.bf16.msra.mxu0 %v7752_v44  ;;  %4971 = vmatprep.subr.bf16.mxu1 %v7753_v45  ;;  %v7827_v41 = vld [vmem:[%s11882_s1 + $0x4c4] ss:$16 sps:$4 sm:$0xff]   ;;  %v7825_v44 = vld [vmem:[%s11882_s1 + $0x4c0] ss:$16 sps:$4 sm:$0xff]   ;;  %v7828_v45 = vld [vmem:[%s11882_s1 + $0xc8] ss:$16 sps:$4 sm:$0xff]  }
  0x29   :  { %5012 = vmatprep.subr.bf16.mxu0 %v7755_v46  ;;  %v7833_v46 = vld [vmem:[%s11882_s1 + $0x4e4] ss:$16 sps:$4 sm:$0xff]   ;;  %v7873_v16 = vld [vmem:[%s11882_s1 + $0x5c0] ss:$16 sps:$4 sm:$0xff]  }
  0x2b   :  { %4972 = vmatpush1.bf16.msra.mxu1 %v7757_v47  ;;  %v7836_v47 = vld [vmem:[%s11882_s1 + $0xec] ss:$16 sps:$4 sm:$0xff]  }
  0x2c   :  { %5013 = vmatpush1.bf16.msra.mxu0 %v7758_v48  ;;  %4973 = vmatprep.subr.bf16.mxu1 %v7759_v50  ;;  %v7831_v48 = vld [vmem:[%s11882_s1 + $0x4e0] ss:$16 sps:$4 sm:$0xff]   ;;  %v7834_v50 = vld [vmem:[%s11882_s1 + $0xe8] ss:$16 sps:$4 sm:$0xff]  }
  0x2d   :  { %5014 = vmatprep.subr.bf16.mxu0 %v7761_v51  ;;  %v7839_v51 = vld [vmem:[%s11882_s1 + $0x504] ss:$16 sps:$4 sm:$0xff]  }
  0x2f   :  { %4974 = vmatpush1.bf16.msra.mxu1 %v7763_v53  ;;  %v7837_v53 = vld [vmem:[%s11882_s1 + $0x500] ss:$16 sps:$4 sm:$0xff]  }
  0x30   :  { %5015 = vmatpush1.bf16.msra.mxu0 %v7764_v55  ;;  %4975 = vmatprep.subr.bf16.mxu1 %v7765_v56  ;;  %v7845_v55 = vld [vmem:[%s11882_s1 + $0x524] ss:$16 sps:$4 sm:$0xff]   ;;  %v7848_v56 = vld [vmem:[%s11882_s1 + $0x12c] ss:$16 sps:$4 sm:$0xff]  }
  0x31   :  { %5016 = vmatprep.subr.bf16.mxu0 %v7767_v57  ;;  %v7843_v57 = vld [vmem:[%s11882_s1 + $0x520] ss:$16 sps:$4 sm:$0xff]  }
  0x33   :  { %4976 = vmatpush1.bf16.msra.mxu1 %v7769_v59  ;;  %v7851_v59 = vld [vmem:[%s11882_s1 + $0x544] ss:$16 sps:$4 sm:$0xff]  }
  0x34   :  { %5017 = vmatpush1.bf16.msra.mxu0 %v7770_v61  ;;  %4977 = vmatprep.subr.bf16.mxu1 %v7771_v62  ;;  %v7849_v61 = vld [vmem:[%s11882_s1 + $0x540] ss:$16 sps:$4 sm:$0xff]   ;;  %v7852_v62 = vld [vmem:[%s11882_s1 + $0x148] ss:$16 sps:$4 sm:$0xff]  }
  0x35   :  { %5018 = vmatprep.subr.bf16.mxu0 %v7773_v63  ;;  %v7857_v63 = vld [vmem:[%s11882_s1 + $0x564] ss:$16 sps:$4 sm:$0xff]  }
  0x37   :  { %4978 = vmatpush1.bf16.msra.mxu1 %v7775_v1  ;;  %v7860_v1 = vld [vmem:[%s11882_s1 + $0x16c] ss:$16 sps:$4 sm:$0xff]  }
  0x38   :  { %5019 = vmatpush1.bf16.msra.mxu0 %v7776_v2  ;;  %4979 = vmatprep.subr.bf16.mxu1 %v7777_v3  ;;  %v7855_v2 = vld [vmem:[%s11882_s1 + $0x560] ss:$16 sps:$4 sm:$0xff]   ;;  %v7858_v3 = vld [vmem:[%s11882_s1 + $0x168] ss:$16 sps:$4 sm:$0xff]  }
  0x39   :  { %5020 = vmatprep.subr.bf16.mxu0 %v7779_v4  ;;  %v7863_v4 = vld [vmem:[%s11882_s1 + $0x584] ss:$16 sps:$4 sm:$0xff]  }
  0x3b   :  { %4980 = vmatpush1.bf16.msra.mxu1 %v7781_v6  ;;  %v7861_v6 = vld [vmem:[%s11882_s1 + $0x580] ss:$16 sps:$4 sm:$0xff]  }
  0x3c   :  { %5021 = vmatpush1.bf16.msra.mxu0 %v7782_v7  ;;  %4981 = vmatprep.subr.bf16.mxu1 %v7783_v8  ;;  %v7864_v7 = vld [vmem:[%s11882_s1 + $0x188] ss:$16 sps:$4 sm:$0xff]   ;;  %v7869_v8 = vld [vmem:[%s11882_s1 + $0x5a4] ss:$16 sps:$4 sm:$0xff]  }
  0x3d   :  { %5022 = vmatprep.subr.bf16.mxu0 %v7785_v9  ;;  %v7872_v9 = vld [vmem:[%s11882_s1 + $0x1ac] ss:$16 sps:$4 sm:$0xff]  }
  0x3f   :  { %4982 = vmatpush1.bf16.msra.mxu1 %v7787_v11  ;;  %v7867_v11 = vld [vmem:[%s11882_s1 + $0x5a0] ss:$16 sps:$4 sm:$0xff]  }
  0x40   :  { %5023 = vmatpush1.bf16.msra.mxu0 %v7788_v13  ;;  %5484 = vmatprep.subr.bf16.mxu1 %v7794_v15  ;;  %v7870_v13 = vld [vmem:[%s11882_s1 + $0x1a8] ss:$16 sps:$4 sm:$0xff]   ;;  %v7878_v15 = vld [vmem:[%s11882_s1 + $0x1cc] ss:$16 sps:$4 sm:$0xff]  }
  0x41   :  { %5033 = vmatprep.subr.bf16.mxu0 %v7791_v14  ;;  %v7875_v14 = vld [vmem:[%s11882_s1 + $0x5c4] ss:$16 sps:$4 sm:$0xff]  }
  0x42   :  { %4984 = vmatmul.mubr.bf16.vlgmr.msra.gmra.mrb[0].mxu1 %v9257_v12 }
  0x43   :  { %5025 = vmatmul.mubr.bf16.vlgmr.msra.gmra.mrb[0].mxu0 %v9275_v18  ;;  %5485 = vmatpush1.bf16.msra.mxu1 %v7792_v19  ;;  %v7881_v19 = vld [vmem:[%s11882_s1 + $0x5e4] ss:$16 sps:$4 sm:$0xff]  }
  0x44   :  { %5034 = vmatpush1.bf16.msra.mxu0 %v7789_v17  ;;  %5486 = vmatprep.subr.bf16.mxu1 %v7800_v21  ;;  %v7876_v17 = vld [vmem:[%s11882_s1 + $0x1c8] ss:$16 sps:$4 sm:$0xff]   ;;  %v7879_v21 = vld [vmem:[%s11882_s1 + $0x5e0] ss:$16 sps:$4 sm:$0xff]  }
  0x45   :  { %5035 = vmatprep.subr.bf16.mxu0 %v7797_v20  ;;  %5065 = vmatprep.mubr.bf16.mxu0 %v9287_v22  ;;  %v7884_v20 = vld [vmem:[%s11882_s1 + $0x1ec] ss:$16 sps:$4 sm:$0xff]  }
  0x46   :  { %5516 = vmatprep.mubr.bf16.mxu1 %v879_v60  ;;  %v7854_v60 = vld [vmem:[%s11882_s1 + $0x14c] ss:$16 sps:$4 sm:$0xff]  }
  0x47   :  { %5487 = vmatpush1.bf16.msra.mxu1 %v7798_v24  ;;  %v7888_v24 = vld [vmem:[%s11882_s1 + $0x604] ss:$16 sps:$4 sm:$0xff]  }
  0x48   :  { %5036 = vmatpush1.bf16.msra.mxu0 %v7795_v23  ;;  %5488 = vmatprep.subr.bf16.mxu1 %v7806_v26  ;;  %v7882_v23 = vld [vmem:[%s11882_s1 + $0x1e8] ss:$16 sps:$4 sm:$0xff]   ;;  %v7886_v26 = vld [vmem:[%s11882_s1 + $0x600] ss:$16 sps:$4 sm:$0xff]  }
  0x49   :  { %5037 = vmatprep.subr.bf16.mxu0 %v7803_v25  ;;  %v7891_v25 = vld [vmem:[%s11882_s1 + $0x20c] ss:$16 sps:$4 sm:$0xff]  }
  0x4b   :  { %5489 = vmatpush1.bf16.msra.mxu1 %v7804_v28  ;;  %v7889_v28 = vld [vmem:[%s11882_s1 + $0x208] ss:$16 sps:$4 sm:$0xff]  }
  0x4c   :  { %5038 = vmatpush1.bf16.msra.mxu0 %v7801_v27  ;;  %5490 = vmatprep.subr.bf16.mxu1 %v7812_v30  ;;  %v9477_v27 = vrot.slane %v9251_v10, %v9186_v49  ;;  %v7897_v30 = vld [vmem:[%s11882_s1 + $0x22c] ss:$16 sps:$4 sm:$0xff]   ;;  %v9490_v10 = vcombine.high %v9287_v22, %v9287_v22 }
  0x4d   :  { %5039 = vmatprep.subr.bf16.mxu0 %v7809_v29  ;;  %v7894_v29 = vld [vmem:[%s11882_s1 + $0x624] ss:$16 sps:$4 sm:$0xff]  }
  0x4f   :  { %5491 = vmatpush1.bf16.msra.mxu1 %v7810_v32  ;;  %v7895_v32 = vld [vmem:[%s11882_s1 + $0x228] ss:$16 sps:$4 sm:$0xff]  }
  0x50   :  { %5040 = vmatpush1.bf16.msra.mxu0 %v7807_v31  ;;  %5492 = vmatprep.subr.bf16.mxu1 %v7818_v34  ;;  %v7892_v31 = vld [vmem:[%s11882_s1 + $0x620] ss:$16 sps:$4 sm:$0xff]  }
  0x51   :  { %5041 = vmatprep.subr.bf16.mxu0 %v7815_v33  ;;  %v7900_v33 = vld [vmem:[%s11882_s1 + $0x644] ss:$16 sps:$4 sm:$0xff]   ;;  %v7898_v34 = vld [vmem:[%s11882_s1 + $0x640] ss:$16 sps:$4 sm:$0xff]  }
  0x53   :  { %5493 = vmatpush1.bf16.msra.mxu1 %v7816_v36  ;;  %v7906_v36 = vld [vmem:[%s11882_s1 + $0x664] ss:$16 sps:$4 sm:$0xff]  }
  0x54   :  { %5042 = vmatpush1.bf16.msra.mxu0 %v7813_v35  ;;  %5494 = vmatprep.subr.bf16.mxu1 %v7824_v38  ;;  %v7901_v35 = vld [vmem:[%s11882_s1 + $0x248] ss:$16 sps:$4 sm:$0xff]  }
  0x55   :  { %5043 = vmatprep.subr.bf16.mxu0 %v7821_v37  ;;  %v7904_v37 = vld [vmem:[%s11882_s1 + $0x660] ss:$16 sps:$4 sm:$0xff]   ;;  %v7907_v38 = vld [vmem:[%s11882_s1 + $0x268] ss:$16 sps:$4 sm:$0xff]  }
  0x57   :  { %5495 = vmatpush1.bf16.msra.mxu1 %v7822_v40  ;;  %v7915_v40 = vld [vmem:[%s11882_s1 + $0x28c] ss:$16 sps:$4 sm:$0xff]  }
  0x58   :  { %5044 = vmatpush1.bf16.msra.mxu0 %v7819_v39  ;;  %5496 = vmatprep.subr.bf16.mxu1 %v7830_v43  ;;  %v7912_v39 = vld [vmem:[%s11882_s1 + $0x684] ss:$16 sps:$4 sm:$0xff]   ;;  %v7913_v43 = vld [vmem:[%s11882_s1 + $0x288] ss:$16 sps:$4 sm:$0xff]  }
  0x59   :  { %5045 = vmatprep.subr.bf16.mxu0 %v7827_v41  ;;  %v7910_v41 = vld [vmem:[%s11882_s1 + $0x680] ss:$16 sps:$4 sm:$0xff]  }
  0x5b   :  { %5497 = vmatpush1.bf16.msra.mxu1 %v7828_v45  ;;  %v7921_v45 = vld [vmem:[%s11882_s1 + $0x2ac] ss:$16 sps:$4 sm:$0xff]  }
  0x5c   :  { %5046 = vmatpush1.bf16.msra.mxu0 %v7825_v44  ;;  %5498 = vmatprep.subr.bf16.mxu1 %v7836_v47  ;;  %v7918_v44 = vld [vmem:[%s11882_s1 + $0x6a4] ss:$16 sps:$4 sm:$0xff]   ;;  %v7919_v47 = vld [vmem:[%s11882_s1 + $0x2a8] ss:$16 sps:$4 sm:$0xff]  }
  0x5d   :  { %5047 = vmatprep.subr.bf16.mxu0 %v7833_v46  ;;  %v7916_v46 = vld [vmem:[%s11882_s1 + $0x6a0] ss:$16 sps:$4 sm:$0xff]  }
  0x5f   :  { %5499 = vmatpush1.bf16.msra.mxu1 %v7834_v50  ;;  %v7927_v50 = vld [vmem:[%s11882_s1 + $0x2cc] ss:$16 sps:$4 sm:$0xff]  }
  0x60   :  { %5048 = vmatpush1.bf16.msra.mxu0 %v7831_v48  ;;  %5500 = vmatprep.subr.bf16.mxu1 %v7842_v52  ;;  %v7924_v48 = vld [vmem:[%s11882_s1 + $0x6c4] ss:$16 sps:$4 sm:$0xff]   ;;  %v7925_v52 = vld [vmem:[%s11882_s1 + $0x2c8] ss:$16 sps:$4 sm:$0xff]  }
  0x61   :  { %5049 = vmatprep.subr.bf16.mxu0 %v7839_v51  ;;  %v7922_v51 = vld [vmem:[%s11882_s1 + $0x6c0] ss:$16 sps:$4 sm:$0xff]  }
  0x63   :  { %5501 = vmatpush1.bf16.msra.mxu1 %v7840_v54  ;;  %v7933_v54 = vld [vmem:[%s11882_s1 + $0x2ec] ss:$16 sps:$4 sm:$0xff]  }
  0x64   :  { %5050 = vmatpush1.bf16.msra.mxu0 %v7837_v53  ;;  %5502 = vmatprep.subr.bf16.mxu1 %v7848_v56  ;;  %v7930_v53 = vld [vmem:[%s11882_s1 + $0x6e4] ss:$16 sps:$4 sm:$0xff]   ;;  %v7931_v56 = vld [vmem:[%s11882_s1 + $0x2e8] ss:$16 sps:$4 sm:$0xff]  }
  0x65   :  { %5051 = vmatprep.subr.bf16.mxu0 %v7845_v55  ;;  %v7928_v55 = vld [vmem:[%s11882_s1 + $0x6e0] ss:$16 sps:$4 sm:$0xff]  }
  0x67   :  { %5503 = vmatpush1.bf16.msra.mxu1 %v7846_v58  ;;  %v7939_v58 = vld [vmem:[%s11882_s1 + $0x30c] ss:$16 sps:$4 sm:$0xff]  }
  0x68   :  { %5052 = vmatpush1.bf16.msra.mxu0 %v7843_v57  ;;  %5504 = vmatprep.subr.bf16.mxu1 %v7854_v60  ;;  %v7936_v57 = vld [vmem:[%s11882_s1 + $0x704] ss:$16 sps:$4 sm:$0xff]   ;;  %v7937_v60 = vld [vmem:[%s11882_s1 + $0x308] ss:$16 sps:$4 sm:$0xff]  }
  0x69   :  { %5053 = vmatprep.subr.bf16.mxu0 %v7851_v59  ;;  %v7934_v59 = vld [vmem:[%s11882_s1 + $0x700] ss:$16 sps:$4 sm:$0xff]  }
  0x6b   :  { %5505 = vmatpush1.bf16.msra.mxu1 %v7852_v62  ;;  %v7945_v62 = vld [vmem:[%s11882_s1 + $0x32c] ss:$16 sps:$4 sm:$0xff]  }
  0x6c   :  { %5054 = vmatpush1.bf16.msra.mxu0 %v7849_v61  ;;  %5506 = vmatprep.subr.bf16.mxu1 %v7860_v1  ;;  %v7942_v61 = vld [vmem:[%s11882_s1 + $0x724] ss:$16 sps:$4 sm:$0xff]   ;;  %v7943_v1 = vld [vmem:[%s11882_s1 + $0x328] ss:$16 sps:$4 sm:$0xff]  }
  0x6d   :  { %5055 = vmatprep.subr.bf16.mxu0 %v7857_v63  ;;  %v7940_v63 = vld [vmem:[%s11882_s1 + $0x720] ss:$16 sps:$4 sm:$0xff]  }
  0x6f   :  { %5507 = vmatpush1.bf16.msra.mxu1 %v7858_v3  ;;  %v7951_v3 = vld [vmem:[%s11882_s1 + $0x34c] ss:$16 sps:$4 sm:$0xff]  }
  0x70   :  { %5056 = vmatpush1.bf16.msra.mxu0 %v7855_v2  ;;  %5508 = vmatprep.subr.bf16.mxu1 %v7866_v5  ;;  %v7948_v2 = vld [vmem:[%s11882_s1 + $0x744] ss:$16 sps:$4 sm:$0xff]   ;;  %v7949_v5 = vld [vmem:[%s11882_s1 + $0x348] ss:$16 sps:$4 sm:$0xff]  }
  0x71   :  { %5057 = vmatprep.subr.bf16.mxu0 %v7863_v4  ;;  %v7946_v4 = vld [vmem:[%s11882_s1 + $0x740] ss:$16 sps:$4 sm:$0xff]  }
  0x73   :  { %5509 = vmatpush1.bf16.msra.mxu1 %v7864_v7  ;;  %v7957_v7 = vld [vmem:[%s11882_s1 + $0x36c] ss:$16 sps:$4 sm:$0xff]  }
  0x74   :  { %5058 = vmatpush1.bf16.msra.mxu0 %v7861_v6  ;;  %5510 = vmatprep.subr.bf16.mxu1 %v7872_v9  ;;  %v7954_v6 = vld [vmem:[%s11882_s1 + $0x764] ss:$16 sps:$4 sm:$0xff]   ;;  %v7955_v9 = vld [vmem:[%s11882_s1 + $0x368] ss:$16 sps:$4 sm:$0xff]  }
  0x75   :  { %5059 = vmatprep.subr.bf16.mxu0 %v7869_v8  ;;  %v7952_v8 = vld [vmem:[%s11882_s1 + $0x760] ss:$16 sps:$4 sm:$0xff]  }
  0x77   :  { %5511 = vmatpush1.bf16.msra.mxu1 %v7870_v13  ;;  %v7963_v13 = vld [vmem:[%s11882_s1 + $0x38c] ss:$16 sps:$4 sm:$0xff]  }
  0x78   :  { %5060 = vmatpush1.bf16.msra.mxu0 %v7867_v11  ;;  %5512 = vmatprep.subr.bf16.mxu1 %v7878_v15  ;;  %v7960_v11 = vld [vmem:[%s11882_s1 + $0x784] ss:$16 sps:$4 sm:$0xff]   ;;  %v7961_v15 = vld [vmem:[%s11882_s1 + $0x388] ss:$16 sps:$4 sm:$0xff]  }
  0x79   :  { %5061 = vmatprep.subr.bf16.mxu0 %v7875_v14  ;;  %v7958_v14 = vld [vmem:[%s11882_s1 + $0x780] ss:$16 sps:$4 sm:$0xff]  }
  0x7b   :  { %5513 = vmatpush1.bf16.msra.mxu1 %v7876_v17  ;;  %v7969_v17 = vld [vmem:[%s11882_s1 + $0x3ac] ss:$16 sps:$4 sm:$0xff]  }
  0x7c   :  { %5062 = vmatpush1.bf16.msra.mxu0 %v7873_v16  ;;  %5514 = vmatprep.subr.bf16.mxu1 %v7884_v20  ;;  %v7966_v16 = vld [vmem:[%s11882_s1 + $0x7a4] ss:$16 sps:$4 sm:$0xff]   ;;  %v7967_v20 = vld [vmem:[%s11882_s1 + $0x3a8] ss:$16 sps:$4 sm:$0xff]  }
  0x7d   :  { %5063 = vmatprep.subr.bf16.mxu0 %v7881_v19  ;;  %v7964_v19 = vld [vmem:[%s11882_s1 + $0x7a0] ss:$16 sps:$4 sm:$0xff]  }
  0x7f   :  { %5515 = vmatpush1.bf16.msra.mxu1 %v7882_v23  ;;  %v7975_v23 = vld [vmem:[%s11882_s1 + $0x3cc] ss:$16 sps:$4 sm:$0xff]  }
  0x80   :  { %5064 = vmatpush1.bf16.msra.mxu0 %v7879_v21  ;;  %5525 = vmatprep.subr.bf16.mxu1 %v7891_v25  ;;  %v7972_v21 = vld [vmem:[%s11882_s1 + $0x7c4] ss:$16 sps:$4 sm:$0xff]   ;;  %v7970_v25 = vld [vmem:[%s11882_s1 + $0x7c0] ss:$16 sps:$4 sm:$0xff]  }
  0x81   :  { %5074 = vmatprep.subr.bf16.mxu0 %v7888_v24  ;;  %v9655_v24 = vld [vmem:[%s11881_s0 + $0x8] sm:$0xff] }
  0x82   :  { %5517 = vmatmul.mubr.bf16.vlgmr.msra.gmra.mrb[4].mxu1 %v9257_v12  ;;  %v7903_v12 = vld [vmem:[%s11882_s1 + $0x24c] ss:$16 sps:$4 sm:$0xff]  }
  0x83   :  { %5066 = vmatmul.mubr.bf16.vlgmr.msra.gmra.mrb[0].mxu0 %v9477_v27  ;;  %5526 = vmatpush1.bf16.msra.mxu1 %v7889_v28  ;;  %v7978_v28 = vld [vmem:[%s11882_s1 + $0x7e4] ss:$16 sps:$4 sm:$0xff]  }
  0x84   :  { %5075 = vmatpush1.bf16.msra.mxu0 %v7886_v26  ;;  %5527 = vmatprep.subr.bf16.mxu1 %v7897_v30  ;;  %v7973_v26 = vld [vmem:[%s11882_s1 + $0x3c8] ss:$16 sps:$4 sm:$0xff]   ;;  %v9671_v30 = vrot.slane %v9655_v24, %v9186_v49 }
  0x85   :  { %5076 = vmatprep.subr.bf16.mxu0 %v7894_v29  ;;  %5106 = vmatprep.mubr.bf16.mxu0 %v9490_v10  ;;  %v7981_v29 = vld [vmem:[%s11882_s1 + $0x3ec] ss:$16 sps:$4 sm:$0xff]  }
  0x86   :  { %5557 = vmatprep.mubr.bf16.mxu1 %v9223_v0  ;;  %v7909_v0 = vld [vmem:[%s11882_s1 + $0x26c] ss:$16 sps:$4 sm:$0xff]  }
  0x87   :  { %5528 = vmatpush1.bf16.msra.mxu1 %v7895_v32  ;;  %v7979_v32 = vld [vmem:[%s11882_s1 + $0x3e8] ss:$16 sps:$4 sm:$0xff]  }
  0x88   :  { %5077 = vmatpush1.bf16.msra.mxu0 %v7892_v31  ;;  %5529 = vmatprep.subr.bf16.mxu1 %v7903_v12  ;;  %v7976_v31 = vld [vmem:[%s11882_s1 + $0x7e0] ss:$16 sps:$4 sm:$0xff]   ;;  %v7987_v12 = vld [vmem:[%s11882_s1 + $0x40c] ss:$16 sps:$4 sm:$0xff]  }
  0x89   :  { %5078 = vmatprep.subr.bf16.mxu0 %v7900_v33  ;;  %v7984_v33 = vld [vmem:[%s11882_s1 + $0x804] ss:$16 sps:$4 sm:$0xff]  }
  0x8b   :  { %5530 = vmatpush1.bf16.msra.mxu1 %v7901_v35  ;;  %v7982_v35 = vld [vmem:[%s11882_s1 + $0x800] ss:$16 sps:$4 sm:$0xff]  }
  0x8c   :  { %5079 = vmatpush1.bf16.msra.mxu0 %v7898_v34  ;;  %5531 = vmatprep.subr.bf16.mxu1 %v7909_v0  ;;  %v906_v34 = vcombine.high %v9671_v30, %v9671_v30  ;;  %v7985_v0 = vld [vmem:[%s11882_s1 + $0x408] ss:$16 sps:$4 sm:$0xff]  }
  0x8d   :  { %5080 = vmatprep.subr.bf16.mxu0 %v7906_v36  ;;  %v9692_v36 = vcombine.high %v9477_v27, %v9477_v27 }
  0x8f   :  { %5532 = vmatpush1.bf16.msra.mxu1 %v7907_v38  ;;  %v7993_v38 = vld [vmem:[%s11882_s1 + $0x42c] ss:$16 sps:$4 sm:$0xff]  }
  0x90   :  { %5081 = vmatpush1.bf16.msra.mxu0 %v7904_v37  ;;  %5533 = vmatprep.subr.bf16.mxu1 %v7915_v40  ;;  %v7990_v37 = vld [vmem:[%s11882_s1 + $0x824] ss:$16 sps:$4 sm:$0xff]   ;;  %v7988_v40 = vld [vmem:[%s11882_s1 + $0x820] ss:$16 sps:$4 sm:$0xff]  }
  0x91   :  { %5082 = vmatprep.subr.bf16.mxu0 %v7912_v39  ;;  %v9704_v39 = vrot.slane %v906_v34, %v9186_v49  ;;  %v8071_v34 = vld [vmem:[%s11882_s1 + $0x5cc] ss:$16 sps:$4 sm:$0xff]  }
  0x93   :  { %5534 = vmatpush1.bf16.msra.mxu1 %v7913_v43  ;;  %v7996_v43 = vld [vmem:[%s11882_s1 + $0x844] ss:$16 sps:$4 sm:$0xff]  }
  0x94   :  { %5083 = vmatpush1.bf16.msra.mxu0 %v7910_v41  ;;  %5535 = vmatprep.subr.bf16.mxu1 %v7921_v45  ;;  %v7991_v41 = vld [vmem:[%s11882_s1 + $0x428] ss:$16 sps:$4 sm:$0xff]  }
  0x95   :  { %5084 = vmatprep.subr.bf16.mxu0 %v7918_v44  ;;  %v7994_v44 = vld [vmem:[%s11882_s1 + $0x840] ss:$16 sps:$4 sm:$0xff]   ;;  %v7997_v45 = vld [vmem:[%s11882_s1 + $0x448] ss:$16 sps:$4 sm:$0xff]  }
  0x97   :  { %5536 = vmatpush1.bf16.msra.mxu1 %v7919_v47  ;;  %v8000_v47 = vld [vmem:[%s11882_s1 + $0x860] ss:$16 sps:$4 sm:$0xff]  }
  0x98   :  { %5085 = vmatpush1.bf16.msra.mxu0 %v7916_v46  ;;  %5537 = vmatprep.subr.bf16.mxu1 %v7927_v50  ;;  %v8002_v46 = vld [vmem:[%s11882_s1 + $0x864] ss:$16 sps:$4 sm:$0xff]  }
  0x99   :  { %5086 = vmatprep.subr.bf16.mxu0 %v7924_v48  ;;  %v8003_v48 = vld [vmem:[%s11882_s1 + $0x468] ss:$16 sps:$4 sm:$0xff]   ;;  %v8008_v50 = vld [vmem:[%s11882_s1 + $0x884] ss:$16 sps:$4 sm:$0xff]  }
  0x9b   :  { %5538 = vmatpush1.bf16.msra.mxu1 %v7925_v52  ;;  %v8006_v52 = vld [vmem:[%s11882_s1 + $0x880] ss:$16 sps:$4 sm:$0xff]  }
  0x9c   :  { %5087 = vmatpush1.bf16.msra.mxu0 %v7922_v51  ;;  %5539 = vmatprep.subr.bf16.mxu1 %v7933_v54  ;;  %v8011_v51 = vld [vmem:[%s11882_s1 + $0x48c] ss:$16 sps:$4 sm:$0xff]   ;;  %v8014_v54 = vld [vmem:[%s11882_s1 + $0x8a4] ss:$16 sps:$4 sm:$0xff]  }
  0x9d   :  { %5088 = vmatprep.subr.bf16.mxu0 %v7930_v53  ;;  %v8009_v53 = vld [vmem:[%s11882_s1 + $0x488] ss:$16 sps:$4 sm:$0xff]  }
  0x9f   :  { %5540 = vmatpush1.bf16.msra.mxu1 %v7931_v56  ;;  %v8012_v56 = vld [vmem:[%s11882_s1 + $0x8a0] ss:$16 sps:$4 sm:$0xff]  }
  0xa0   :  { %5089 = vmatpush1.bf16.msra.mxu0 %v7928_v55  ;;  %5541 = vmatprep.subr.bf16.mxu1 %v7939_v58  ;;  %v8017_v55 = vld [vmem:[%s11882_s1 + $0x4ac] ss:$16 sps:$4 sm:$0xff]   ;;  %v8020_v58 = vld [vmem:[%s11882_s1 + $0x8c4] ss:$16 sps:$4 sm:$0xff]  }
  0xa1   :  { %5090 = vmatprep.subr.bf16.mxu0 %v7936_v57  ;;  %v8015_v57 = vld [vmem:[%s11882_s1 + $0x4a8] ss:$16 sps:$4 sm:$0xff]  }
  0xa3   :  { %5542 = vmatpush1.bf16.msra.mxu1 %v7937_v60  ;;  %v8018_v60 = vld [vmem:[%s11882_s1 + $0x8c0] ss:$16 sps:$4 sm:$0xff]  }
  0xa4   :  { %5091 = vmatpush1.bf16.msra.mxu0 %v7934_v59  ;;  %5543 = vmatprep.subr.bf16.mxu1 %v7945_v62  ;;  %v8023_v59 = vld [vmem:[%s11882_s1 + $0x4cc] ss:$16 sps:$4 sm:$0xff]   ;;  %v8026_v62 = vld [vmem:[%s11882_s1 + $0x8e4] ss:$16 sps:$4 sm:$0xff]  }
  0xa5   :  { %5092 = vmatprep.subr.bf16.mxu0 %v7942_v61  ;;  %v8021_v61 = vld [vmem:[%s11882_s1 + $0x4c8] ss:$16 sps:$4 sm:$0xff]  }
  0xa7   :  { %5544 = vmatpush1.bf16.msra.mxu1 %v7943_v1  ;;  %v8024_v1 = vld [vmem:[%s11882_s1 + $0x8e0] ss:$16 sps:$4 sm:$0xff]  }
  0xa8   :  { %5093 = vmatpush1.bf16.msra.mxu0 %v7940_v63  ;;  %5545 = vmatprep.subr.bf16.mxu1 %v7951_v3  ;;  %v8029_v63 = vld [vmem:[%s11882_s1 + $0x4ec] ss:$16 sps:$4 sm:$0xff]   ;;  %v8032_v3 = vld [vmem:[%s11882_s1 + $0x904] ss:$16 sps:$4 sm:$0xff]  }
  0xa9   :  { %5094 = vmatprep.subr.bf16.mxu0 %v7948_v2  ;;  %v8027_v2 = vld [vmem:[%s11882_s1 + $0x4e8] ss:$16 sps:$4 sm:$0xff]  }
  0xab   :  { %5546 = vmatpush1.bf16.msra.mxu1 %v7949_v5  ;;  %v8030_v5 = vld [vmem:[%s11882_s1 + $0x900] ss:$16 sps:$4 sm:$0xff]  }
  0xac   :  { %5095 = vmatpush1.bf16.msra.mxu0 %v7946_v4  ;;  %5547 = vmatprep.subr.bf16.mxu1 %v7957_v7  ;;  %v8035_v4 = vld [vmem:[%s11882_s1 + $0x50c] ss:$16 sps:$4 sm:$0xff]   ;;  %v8038_v7 = vld [vmem:[%s11882_s1 + $0x924] ss:$16 sps:$4 sm:$0xff]  }
  0xad   :  { %5096 = vmatprep.subr.bf16.mxu0 %v7954_v6  ;;  %v8033_v6 = vld [vmem:[%s11882_s1 + $0x508] ss:$16 sps:$4 sm:$0xff]  }
  0xaf   :  { %5548 = vmatpush1.bf16.msra.mxu1 %v7955_v9  ;;  %v8036_v9 = vld [vmem:[%s11882_s1 + $0x920] ss:$16 sps:$4 sm:$0xff]  }
  0xb0   :  { %5097 = vmatpush1.bf16.msra.mxu0 %v7952_v8  ;;  %5549 = vmatprep.subr.bf16.mxu1 %v7963_v13  ;;  %v8041_v8 = vld [vmem:[%s11882_s1 + $0x52c] ss:$16 sps:$4 sm:$0xff]   ;;  %v8044_v13 = vld [vmem:[%s11882_s1 + $0x944] ss:$16 sps:$4 sm:$0xff]  }
  0xb1   :  { %5098 = vmatprep.subr.bf16.mxu0 %v7960_v11  ;;  %v8039_v11 = vld [vmem:[%s11882_s1 + $0x528] ss:$16 sps:$4 sm:$0xff]  }
  0xb3   :  { %5550 = vmatpush1.bf16.msra.mxu1 %v7961_v15  ;;  %v8042_v15 = vld [vmem:[%s11882_s1 + $0x940] ss:$16 sps:$4 sm:$0xff]  }
  0xb4   :  { %5099 = vmatpush1.bf16.msra.mxu0 %v7958_v14  ;;  %5551 = vmatprep.subr.bf16.mxu1 %v7969_v17  ;;  %v8047_v14 = vld [vmem:[%s11882_s1 + $0x54c] ss:$16 sps:$4 sm:$0xff]   ;;  %v8050_v17 = vld [vmem:[%s11882_s1 + $0x964] ss:$16 sps:$4 sm:$0xff]  }
  0xb5   :  { %5100 = vmatprep.subr.bf16.mxu0 %v7966_v16  ;;  %v8045_v16 = vld [vmem:[%s11882_s1 + $0x548] ss:$16 sps:$4 sm:$0xff]  }
  0xb7   :  { %5552 = vmatpush1.bf16.msra.mxu1 %v7967_v20  ;;  %v8048_v20 = vld [vmem:[%s11882_s1 + $0x960] ss:$16 sps:$4 sm:$0xff]  }
  0xb8   :  { %5101 = vmatpush1.bf16.msra.mxu0 %v7964_v19  ;;  %5553 = vmatprep.subr.bf16.mxu1 %v7975_v23  ;;  %v8053_v19 = vld [vmem:[%s11882_s1 + $0x56c] ss:$16 sps:$4 sm:$0xff]   ;;  %v8056_v23 = vld [vmem:[%s11882_s1 + $0x984] ss:$16 sps:$4 sm:$0xff]  }
  0xb9   :  { %5102 = vmatprep.subr.bf16.mxu0 %v7972_v21  ;;  %v8051_v21 = vld [vmem:[%s11882_s1 + $0x568] ss:$16 sps:$4 sm:$0xff]  }
  0xbb   :  { %5554 = vmatpush1.bf16.msra.mxu1 %v7973_v26  ;;  %v8054_v26 = vld [vmem:[%s11882_s1 + $0x980] ss:$16 sps:$4 sm:$0xff]  }
  0xbc   :  { %5103 = vmatpush1.bf16.msra.mxu0 %v7970_v25  ;;  %5555 = vmatprep.subr.bf16.mxu1 %v7981_v29  ;;  %v8059_v25 = vld [vmem:[%s11882_s1 + $0x58c] ss:$16 sps:$4 sm:$0xff]   ;;  %v8062_v29 = vld [vmem:[%s11882_s1 + $0x9a4] ss:$16 sps:$4 sm:$0xff]  }
  0xbd   :  { %5104 = vmatprep.subr.bf16.mxu0 %v7978_v28  ;;  %v8057_v28 = vld [vmem:[%s11882_s1 + $0x588] ss:$16 sps:$4 sm:$0xff]  }
  0xbf   :  { %5556 = vmatpush1.bf16.msra.mxu1 %v7979_v32  ;;  %v8060_v32 = vld [vmem:[%s11882_s1 + $0x9a0] ss:$16 sps:$4 sm:$0xff]  }
  0xc0   :  { %5105 = vmatpush1.bf16.msra.mxu0 %v7976_v31  ;;  %5566 = vmatprep.subr.bf16.mxu1 %v7987_v12  ;;  %v8065_v31 = vld [vmem:[%s11882_s1 + $0x5ac] ss:$16 sps:$4 sm:$0xff]   ;;  %v8068_v12 = vld [vmem:[%s11882_s1 + $0x9c4] ss:$16 sps:$4 sm:$0xff]  }
  0xc1   :  { %5115 = vmatprep.subr.bf16.mxu0 %v7984_v33  ;;  %v8063_v33 = vld [vmem:[%s11882_s1 + $0x5a8] ss:$16 sps:$4 sm:$0xff]  }
  0xc2   :  { %5558 = vmatmul.mubr.bf16.vlgmr.msra.gmra.mrb[4].mxu1 %v9275_v18  ;;  %v7999_v18 = vld [vmem:[%s11882_s1 + $0x44c] ss:$16 sps:$4 sm:$0xff]  }
  0xc3   :  { %5107 = vmatmul.mubr.bf16.vlgmr.msra.gmra.mrb[0].mxu0 %v9692_v36  ;;  %5567 = vmatpush1.bf16.msra.mxu1 %v7985_v0  ;;  %v8069_v0 = vld [vmem:[%s11882_s1 + $0x5c8] ss:$16 sps:$4 sm:$0xff]  }
  0xc4   :  { %5116 = vmatpush1.bf16.msra.mxu0 %v7982_v35  ;;  %5568 = vmatprep.subr.bf16.mxu1 %v7993_v38  ;;  %v8066_v35 = vld [vmem:[%s11882_s1 + $0x9c0] ss:$16 sps:$4 sm:$0xff]   ;;  %v8077_v38 = vld [vmem:[%s11882_s1 + $0x5ec] ss:$16 sps:$4 sm:$0xff]  }
  0xc5   :  { %5117 = vmatprep.subr.bf16.mxu0 %v7990_v37  ;;  %5147 = vmatprep.mubr.bf16.mxu0 %v9704_v39  ;;  %v8074_v37 = vld [vmem:[%s11882_s1 + $0x9e4] ss:$16 sps:$4 sm:$0xff]  }
  0xc6   :  { %5598 = vmatprep.mubr.bf16.mxu1 %v9287_v22  ;;  %v8005_v22 = vld [vmem:[%s11882_s1 + $0x46c] ss:$16 sps:$4 sm:$0xff]  }
  0xc7   :  { %5569 = vmatpush1.bf16.msra.mxu1 %v7991_v41  ;;  %v8075_v41 = vld [vmem:[%s11882_s1 + $0x5e8] ss:$16 sps:$4 sm:$0xff]  }
  0xc8   :  { %5118 = vmatpush1.bf16.msra.mxu0 %v7988_v40  ;;  %5570 = vmatprep.subr.bf16.mxu1 %v7999_v18  ;;  %v8072_v40 = vld [vmem:[%s11882_s1 + $0x9e0] ss:$16 sps:$4 sm:$0xff]   ;;  %v8083_v18 = vld [vmem:[%s11882_s1 + $0x60c] ss:$16 sps:$4 sm:$0xff]  }
  0xc9   :  { %5119 = vmatprep.subr.bf16.mxu0 %v7996_v43  ;;  %v8080_v43 = vld [vmem:[%s11882_s1 + $0xa04] ss:$16 sps:$4 sm:$0xff]  }
  0xcb   :  { %5571 = vmatpush1.bf16.msra.mxu1 %v7997_v45  ;;  %v9895_v45 = vrot.slane %v9671_v30, %v9186_v49  ;;  %v9908_v30 = vcombine.high %v9704_v39, %v9704_v39 }
  0xcc   :  { %5120 = vmatpush1.bf16.msra.mxu0 %v7994_v44  ;;  %5572 = vmatprep.subr.bf16.mxu1 %v8005_v22  ;;  %v8078_v44 = vld [vmem:[%s11882_s1 + $0xa00] ss:$16 sps:$4 sm:$0xff]   ;;  %v8086_v22 = vld [vmem:[%s11882_s1 + $0xa24] ss:$16 sps:$4 sm:$0xff]  }
  0xcd   :  { %5121 = vmatprep.subr.bf16.mxu0 %v8002_v46  ;;  %v8081_v46 = vld [vmem:[%s11882_s1 + $0x608] ss:$16 sps:$4 sm:$0xff]  }
  0xcf   :  { %5573 = vmatpush1.bf16.msra.mxu1 %v8003_v48  ;;  %v8084_v48 = vld [vmem:[%s11882_s1 + $0xa20] ss:$16 sps:$4 sm:$0xff]  }
  0xd0   :  { %5122 = vmatpush1.bf16.msra.mxu0 %v8000_v47  ;;  %5574 = vmatprep.subr.bf16.mxu1 %v8011_v51  ;;  %v8089_v47 = vld [vmem:[%s11882_s1 + $0x62c] ss:$16 sps:$4 sm:$0xff]   ;;  %v8092_v51 = vld [vmem:[%s11882_s1 + $0xa44] ss:$16 sps:$4 sm:$0xff]  }
  0xd1   :  { %5123 = vmatprep.subr.bf16.mxu0 %v8008_v50  ;;  %v8087_v50 = vld [vmem:[%s11882_s1 + $0x628] ss:$16 sps:$4 sm:$0xff]  }
  0xd3   :  { %5575 = vmatpush1.bf16.msra.mxu1 %v8009_v53  ;;  %v8093_v53 = vld [vmem:[%s11882_s1 + $0x648] ss:$16 sps:$4 sm:$0xff]  }
  0xd4   :  { %5124 = vmatpush1.bf16.msra.mxu0 %v8006_v52  ;;  %5576 = vmatprep.subr.bf16.mxu1 %v8017_v55  ;;  %v8090_v52 = vld [vmem:[%s11882_s1 + $0xa40] ss:$16 sps:$4 sm:$0xff]  }
  0xd5   :  { %5125 = vmatprep.subr.bf16.mxu0 %v8014_v54  ;;  %v8098_v54 = vld [vmem:[%s11882_s1 + $0xa64] ss:$16 sps:$4 sm:$0xff]   ;;  %v8096_v55 = vld [vmem:[%s11882_s1 + $0xa60] ss:$16 sps:$4 sm:$0xff]  }
  0xd7   :  { %5577 = vmatpush1.bf16.msra.mxu1 %v8015_v57  ;;  %v8104_v57 = vld [vmem:[%s11882_s1 + $0xa84] ss:$16 sps:$4 sm:$0xff]  }
  0xd8   :  { %5126 = vmatpush1.bf16.msra.mxu0 %v8012_v56  ;;  %5578 = vmatprep.subr.bf16.mxu1 %v8023_v59  ;;  %v8099_v56 = vld [vmem:[%s11882_s1 + $0x668] ss:$16 sps:$4 sm:$0xff]   ;;  %v8102_v59 = vld [vmem:[%s11882_s1 + $0xa80] ss:$16 sps:$4 sm:$0xff]  }
  0xd9   :  { %5127 = vmatprep.subr.bf16.mxu0 %v8020_v58  ;;  %v8107_v58 = vld [vmem:[%s11882_s1 + $0x68c] ss:$16 sps:$4 sm:$0xff]  }
  0xdb   :  { %5579 = vmatpush1.bf16.msra.mxu1 %v8021_v61  ;;  %v8110_v61 = vld [vmem:[%s11882_s1 + $0xaa4] ss:$16 sps:$4 sm:$0xff]  }
  0xdc   :  { %5128 = vmatpush1.bf16.msra.mxu0 %v8018_v60  ;;  %5580 = vmatprep.subr.bf16.mxu1 %v8029_v63  ;;  %v8105_v60 = vld [vmem:[%s11882_s1 + $0x688] ss:$16 sps:$4 sm:$0xff]   ;;  %v8108_v63 = vld [vmem:[%s11882_s1 + $0xaa0] ss:$16 sps:$4 sm:$0xff]  }
  0xdd   :  { %5129 = vmatprep.subr.bf16.mxu0 %v8026_v62  ;;  %v8113_v62 = vld [vmem:[%s11882_s1 + $0x6ac] ss:$16 sps:$4 sm:$0xff]  }
  0xdf   :  { %5581 = vmatpush1.bf16.msra.mxu1 %v8027_v2  ;;  %v8116_v2 = vld [vmem:[%s11882_s1 + $0xac4] ss:$16 sps:$4 sm:$0xff]  }
  0xe0   :  { %5130 = vmatpush1.bf16.msra.mxu0 %v8024_v1  ;;  %5582 = vmatprep.subr.bf16.mxu1 %v8035_v4  ;;  %v8111_v1 = vld [vmem:[%s11882_s1 + $0x6a8] ss:$16 sps:$4 sm:$0xff]  }
  0xe1   :  { %5131 = vmatprep.subr.bf16.mxu0 %v8032_v3  ;;  %v8119_v3 = vld [vmem:[%s11882_s1 + $0x6cc] ss:$16 sps:$4 sm:$0xff]  }
  0xe3   :  { %5583 = vmatpush1.bf16.msra.mxu1 %v8033_v6 }
  0xe4   :  { %5132 = vmatpush1.bf16.msra.mxu0 %v8030_v5  ;;  %5584 = vmatprep.subr.bf16.mxu1 %v8041_v8  ;;  %v8117_v8 = vld [vmem:[%s11882_s1 + $0x6c8] ss:$16 sps:$4 sm:$0xff]  }
  0xe5   :  { %5133 = vmatprep.subr.bf16.mxu0 %v8038_v7  ;;  %v8114_v7 = vld [vmem:[%s11882_s1 + $0xac0] ss:$16 sps:$4 sm:$0xff]  }
  0xe7   :  { %5585 = vmatpush1.bf16.msra.mxu1 %v8039_v11  ;;  %v8122_v11 = vld [vmem:[%s11882_s1 + $0xae4] ss:$16 sps:$4 sm:$0xff]  }
  0xe8   :  { %5134 = vmatpush1.bf16.msra.mxu0 %v8036_v9  ;;  %5586 = vmatprep.subr.bf16.mxu1 %v8047_v14  ;;  %v8120_v14 = vld [vmem:[%s11882_s1 + $0xae0] ss:$16 sps:$4 sm:$0xff]  }
  0xe9   :  { %5135 = vmatprep.subr.bf16.mxu0 %v8044_v13  ;;  %v8125_v13 = vld [vmem:[%s11882_s1 + $0x6ec] ss:$16 sps:$4 sm:$0xff]  }
  0xeb   :  { %5587 = vmatpush1.bf16.msra.mxu1 %v8045_v16  ;;  %v8128_v16 = vld [vmem:[%s11882_s1 + $0xb04] ss:$16 sps:$4 sm:$0xff]  }
  0xec   :  { %5136 = vmatpush1.bf16.msra.mxu0 %v8042_v15  ;;  %5588 = vmatprep.subr.bf16.mxu1 %v8053_v19  ;;  %v8123_v15 = vld [vmem:[%s11882_s1 + $0x6e8] ss:$16 sps:$4 sm:$0xff]   ;;  %v8126_v19 = vld [vmem:[%s11882_s1 + $0xb00] ss:$16 sps:$4 sm:$0xff]  }
  0xed   :  { %5137 = vmatprep.subr.bf16.mxu0 %v8050_v17  ;;  %v8131_v17 = vld [vmem:[%s11882_s1 + $0x70c] ss:$16 sps:$4 sm:$0xff]  }
  0xef   :  { %5589 = vmatpush1.bf16.msra.mxu1 %v8051_v21  ;;  %v8134_v21 = vld [vmem:[%s11882_s1 + $0xb24] ss:$16 sps:$4 sm:$0xff]  }
  0xf0   :  { %5138 = vmatpush1.bf16.msra.mxu0 %v8048_v20  ;;  %5590 = vmatprep.subr.bf16.mxu1 %v8059_v25  ;;  %v8129_v20 = vld [vmem:[%s11882_s1 + $0x708] ss:$16 sps:$4 sm:$0xff]   ;;  %v8132_v25 = vld [vmem:[%s11882_s1 + $0xb20] ss:$16 sps:$4 sm:$0xff]  }
  0xf1   :  { %5139 = vmatprep.subr.bf16.mxu0 %v8056_v23  ;;  %v8137_v23 = vld [vmem:[%s11882_s1 + $0x72c] ss:$16 sps:$4 sm:$0xff]  }
  0xf3   :  { %5591 = vmatpush1.bf16.msra.mxu1 %v8057_v28  ;;  %v8140_v28 = vld [vmem:[%s11882_s1 + $0xb44] ss:$16 sps:$4 sm:$0xff]  }
  0xf4   :  { %5140 = vmatpush1.bf16.msra.mxu0 %v8054_v26  ;;  %5592 = vmatprep.subr.bf16.mxu1 %v8065_v31  ;;  %v8135_v26 = vld [vmem:[%s11882_s1 + $0x728] ss:$16 sps:$4 sm:$0xff]   ;;  %v8138_v31 = vld [vmem:[%s11882_s1 + $0xb40] ss:$16 sps:$4 sm:$0xff]  }
  0xf5   :  { %5141 = vmatprep.subr.bf16.mxu0 %v8062_v29  ;;  %v8143_v29 = vld [vmem:[%s11882_s1 + $0x74c] ss:$16 sps:$4 sm:$0xff]  }
  0xf7   :  { %5593 = vmatpush1.bf16.msra.mxu1 %v8063_v33  ;;  %v8146_v33 = vld [vmem:[%s11882_s1 + $0xb64] ss:$16 sps:$4 sm:$0xff]  }
  0xf8   :  { %5142 = vmatpush1.bf16.msra.mxu0 %v8060_v32  ;;  %5594 = vmatprep.subr.bf16.mxu1 %v8071_v34  ;;  %v8141_v32 = vld [vmem:[%s11882_s1 + $0x748] ss:$16 sps:$4 sm:$0xff]   ;;  %v8144_v34 = vld [vmem:[%s11882_s1 + $0xb60] ss:$16 sps:$4 sm:$0xff]  }
  0xf9   :  { %5143 = vmatprep.subr.bf16.mxu0 %v8068_v12  ;;  %v8149_v12 = vld [vmem:[%s11882_s1 + $0x76c] ss:$16 sps:$4 sm:$0xff]  }
  0xfb   :  { %5595 = vmatpush1.bf16.msra.mxu1 %v8069_v0  ;;  %v8152_v0 = vld [vmem:[%s11882_s1 + $0xb84] ss:$16 sps:$4 sm:$0xff]  }
  0xfc   :  { %5144 = vmatpush1.bf16.msra.mxu0 %v8066_v35  ;;  %5596 = vmatprep.subr.bf16.mxu1 %v8077_v38  ;;  %v8147_v35 = vld [vmem:[%s11882_s1 + $0x768] ss:$16 sps:$4 sm:$0xff]   ;;  %v8150_v38 = vld [vmem:[%s11882_s1 + $0xb80] ss:$16 sps:$4 sm:$0xff]  }
  0xfd   :  { %5145 = vmatprep.subr.bf16.mxu0 %v8074_v37  ;;  %v8155_v37 = vld [vmem:[%s11882_s1 + $0x78c] ss:$16 sps:$4 sm:$0xff]  }
  0xff   :  { %5597 = vmatpush1.bf16.msra.mxu1 %v8075_v41  ;;  %v8158_v41 = vld [vmem:[%s11882_s1 + $0xba4] ss:$16 sps:$4 sm:$0xff]  }
 0x100   :  { %5146 = vmatpush1.bf16.msra.mxu0 %v8072_v40  ;;  %5607 = vmatprep.subr.bf16.mxu1 %v8083_v18  ;;  %v8153_v40 = vld [vmem:[%s11882_s1 + $0x788] ss:$16 sps:$4 sm:$0xff]   ;;  %v8156_v18 = vld [vmem:[%s11882_s1 + $0xba0] ss:$16 sps:$4 sm:$0xff]  }
 0x101   :  { %5156 = vmatprep.subr.bf16.mxu0 %v8080_v43  ;;  %v8161_v43 = vld [vmem:[%s11882_s1 + $0x7ac] ss:$16 sps:$4 sm:$0xff]  }
 0x102   :  { %5599 = vmatmul.mubr.bf16.vlgmr.msra.gmra.mrb[4].mxu1 %v9477_v27  ;;  %v8095_v27 = vld [vmem:[%s11882_s1 + $0x64c] ss:$16 sps:$4 sm:$0xff]  }
 0x103   :  { %5148 = vmatmul.mubr.bf16.vlgmr.msra.gmra.mrb[0].mxu0 %v9895_v45  ;;  %5608 = vmatpush1.bf16.msra.mxu1 %v8081_v46  ;;  %v8164_v46 = vld [vmem:[%s11882_s1 + $0xbc4] ss:$16 sps:$4 sm:$0xff]  }
 0x104   :  { %5157 = vmatpush1.bf16.msra.mxu0 %v8078_v44  ;;  %5609 = vmatprep.subr.bf16.mxu1 %v8089_v47  ;;  %v8159_v44 = vld [vmem:[%s11882_s1 + $0x7a8] ss:$16 sps:$4 sm:$0xff]   ;;  %v891_v47 = vcombine.high %v9655_v24, %v9655_v24  ;;  %v8173_v24 = vld [vmem:[%s11882_s1 + $0x7ec] ss:$16 sps:$4 sm:$0xff]  }
 0x105   :  { %5158 = vmatprep.subr.bf16.mxu0 %v8086_v22  ;;  %5188 = vmatprep.mubr.bf16.mxu0 %v9908_v30  ;;  %v8167_v22 = vld [vmem:[%s11882_s1 + $0x7cc] ss:$16 sps:$4 sm:$0xff]  }
 0x106   :  { %5639 = vmatprep.mubr.bf16.mxu1 %v9490_v10  ;;  %v8101_v10 = vld [vmem:[%s11882_s1 + $0x66c] ss:$16 sps:$4 sm:$0xff]  }
 0x107   :  { %5610 = vmatpush1.bf16.msra.mxu1 %v8087_v50  ;;  %v8165_v50 = vld [vmem:[%s11882_s1 + $0x7c8] ss:$16 sps:$4 sm:$0xff]  }
 0x108   :  { %5159 = vmatpush1.bf16.msra.mxu0 %v8084_v48  ;;  %5611 = vmatprep.subr.bf16.mxu1 %v8095_v27  ;;  %v8162_v48 = vld [vmem:[%s11882_s1 + $0xbc0] ss:$16 sps:$4 sm:$0xff]   ;;  %v10089_v27 = vrot.slane %v891_v47, %v9186_v49  ;;  %v8243_v47 = vld [vmem:[%s11882_s1 + $0x968] ss:$16 sps:$4 sm:$0xff]  }
 0x109   :  { %5160 = vmatprep.subr.bf16.mxu0 %v8092_v51  ;;  %v8170_v51 = vld [vmem:[%s11882_s1 + $0xbe4] ss:$16 sps:$4 sm:$0xff]  }
 0x10b   :  { %5612 = vmatpush1.bf16.msra.mxu1 %v8093_v53  ;;  %v8171_v53 = vld [vmem:[%s11882_s1 + $0x7e8] ss:$16 sps:$4 sm:$0xff]  }
 0x10c   :  { %5161 = vmatpush1.bf16.msra.mxu0 %v8090_v52  ;;  %5613 = vmatprep.subr.bf16.mxu1 %v8101_v10  ;;  %v8168_v52 = vld [vmem:[%s11882_s1 + $0xbe0] ss:$16 sps:$4 sm:$0xff]   ;;  %v8179_v10 = vld [vmem:[%s11882_s1 + $0x80c] ss:$16 sps:$4 sm:$0xff]  }
 0x10d   :  { %5162 = vmatprep.subr.bf16.mxu0 %v8098_v54  ;;  %v8176_v54 = vld [vmem:[%s11882_s1 + $0xc04] ss:$16 sps:$4 sm:$0xff]  }
 0x10f   :  { %5614 = vmatpush1.bf16.msra.mxu1 %v8099_v56  ;;  %v10107_v56 = vcombine.high %v9895_v45, %v9895_v45 }
 0x110   :  { %5163 = vmatpush1.bf16.msra.mxu0 %v8096_v55  ;;  %5615 = vmatprep.subr.bf16.mxu1 %v8107_v58  ;;  %v907_v55 = vcombine.high %v10089_v27, %v10089_v27  ;;  %v8177_v58 = vld [vmem:[%s11882_s1 + $0x808] ss:$16 sps:$4 sm:$0xff]  }
 0x111   :  { %5164 = vmatprep.subr.bf16.mxu0 %v8104_v57  ;;  %v8174_v57 = vld [vmem:[%s11882_s1 + $0xc00] ss:$16 sps:$4 sm:$0xff]  }
 0x113   :  { %5616 = vmatpush1.bf16.msra.mxu1 %v8105_v60  ;;  %v8185_v60 = vld [vmem:[%s11882_s1 + $0x82c] ss:$16 sps:$4 sm:$0xff]  }
 0x114   :  { %5165 = vmatpush1.bf16.msra.mxu0 %v8102_v59  ;;  %5617 = vmatprep.subr.bf16.mxu1 %v8113_v62  ;;  %v8182_v59 = vld [vmem:[%s11882_s1 + $0xc24] ss:$16 sps:$4 sm:$0xff]   ;;  %v8180_v62 = vld [vmem:[%s11882_s1 + $0xc20] ss:$16 sps:$4 sm:$0xff]  }
 0x115   :  { %5166 = vmatprep.subr.bf16.mxu0 %v8110_v61  ;;  %v9974_v4 = vpop.f32.mrb[0].mxu1  ;;  %v10122_v61 = vrot.slane %v907_v55, %v9186_v49  ;;  %v8260_v55 = vld [vmem:[%s11882_s1 + $0xdc4] ss:$16 sps:$4 sm:$0xff]  }
 0x116   :  { %v9976_v5 = vpop.f32.mrb[1].mxu1 }
 0x117   :  { %v4989_v6 = vpop.f32.mrb[2].mxu1  ;;  %5618 = vmatpush1.bf16.msra.mxu1 %v8111_v1  ;;  %v8188_v1 = vld [vmem:[%s11882_s1 + $0xc44] ss:$16 sps:$4 sm:$0xff]  }
 0x118   :  { %5167 = vmatpush1.bf16.msra.mxu0 %v8108_v63  ;;  %v4990_v9 = vpop.f32.mrb[3].mxu1  ;;  %5619 = vmatprep.subr.bf16.mxu1 %v8119_v3  ;;  %v8183_v63 = vld [vmem:[%s11882_s1 + $0x828] ss:$16 sps:$4 sm:$0xff]   ;;  %v8194_v6 = vld [vmem:[%s11882_s1 + $0xc64] ss:$16 sps:$4 sm:$0xff]  }
 0x119   :  { %5168 = vmatprep.subr.bf16.mxu0 %v8116_v2  ;;  %v8186_v2 = vld [vmem:[%s11882_s1 + $0xc40] ss:$16 sps:$4 sm:$0xff]   ;;  %v8189_v3 = vld [vmem:[%s11882_s1 + $0x848] ss:$16 sps:$4 sm:$0xff]   ;;  %v8200_v9 = vld [vmem:[%s11882_s1 + $0xc84] ss:$16 sps:$4 sm:$0xff]  }
 0x11b   :  { %5620 = vmatpush1.bf16.msra.mxu1 %v8117_v8  ;;  %v8195_v8 = vld [vmem:[%s11882_s1 + $0x868] ss:$16 sps:$4 sm:$0xff]  }
 0x11c   :  { %5169 = vmatpush1.bf16.msra.mxu0 %v8114_v7  ;;  %5621 = vmatprep.subr.bf16.mxu1 %v8125_v13  ;;  %v8192_v7 = vld [vmem:[%s11882_s1 + $0xc60] ss:$16 sps:$4 sm:$0xff]  }
 0x11d   :  { %5170 = vmatprep.subr.bf16.mxu0 %v8122_v11  ;;  %v8203_v11 = vld [vmem:[%s11882_s1 + $0x88c] ss:$16 sps:$4 sm:$0xff]   ;;  %v8198_v13 = vld [vmem:[%s11882_s1 + $0xc80] ss:$16 sps:$4 sm:$0xff]  }
 0x11f   :  { %5622 = vmatpush1.bf16.msra.mxu1 %v8123_v15  ;;  %v8206_v15 = vld [vmem:[%s11882_s1 + $0xca4] ss:$16 sps:$4 sm:$0xff]  }
 0x120   :  { %5171 = vmatpush1.bf16.msra.mxu0 %v8120_v14  ;;  %5623 = vmatprep.subr.bf16.mxu1 %v8131_v17  ;;  %v8201_v14 = vld [vmem:[%s11882_s1 + $0x888] ss:$16 sps:$4 sm:$0xff]   ;;  %v8204_v17 = vld [vmem:[%s11882_s1 + $0xca0] ss:$16 sps:$4 sm:$0xff]  }
 0x121   :  { %5172 = vmatprep.subr.bf16.mxu0 %v8128_v16  ;;  %v8209_v16 = vld [vmem:[%s11882_s1 + $0x8ac] ss:$16 sps:$4 sm:$0xff]  }
 0x123   :  { %5624 = vmatpush1.bf16.msra.mxu1 %v8129_v20  ;;  %v8212_v20 = vld [vmem:[%s11882_s1 + $0xcc4] ss:$16 sps:$4 sm:$0xff]  }
 0x124   :  { %5173 = vmatpush1.bf16.msra.mxu0 %v8126_v19  ;;  %5625 = vmatprep.subr.bf16.mxu1 %v8137_v23  ;;  %v8207_v19 = vld [vmem:[%s11882_s1 + $0x8a8] ss:$16 sps:$4 sm:$0xff]   ;;  %v8210_v23 = vld [vmem:[%s11882_s1 + $0xcc0] ss:$16 sps:$4 sm:$0xff]  }
 0x125   :  { %5174 = vmatprep.subr.bf16.mxu0 %v8134_v21  ;;  %v8215_v21 = vld [vmem:[%s11882_s1 + $0x8cc] ss:$16 sps:$4 sm:$0xff]  }
 0x127   :  { %5626 = vmatpush1.bf16.msra.mxu1 %v8135_v26  ;;  %v8218_v26 = vld [vmem:[%s11882_s1 + $0xce4] ss:$16 sps:$4 sm:$0xff]  }
 0x128   :  { %5175 = vmatpush1.bf16.msra.mxu0 %v8132_v25  ;;  %5627 = vmatprep.subr.bf16.mxu1 %v8143_v29  ;;  %v8213_v25 = vld [vmem:[%s11882_s1 + $0x8c8] ss:$16 sps:$4 sm:$0xff]   ;;  %v8216_v29 = vld [vmem:[%s11882_s1 + $0xce0] ss:$16 sps:$4 sm:$0xff]  }
 0x129   :  { %5176 = vmatprep.subr.bf16.mxu0 %v8140_v28  ;;  %v8221_v28 = vld [vmem:[%s11882_s1 + $0x8ec] ss:$16 sps:$4 sm:$0xff]  }
 0x12b   :  { %5628 = vmatpush1.bf16.msra.mxu1 %v8141_v32  ;;  %v8224_v32 = vld [vmem:[%s11882_s1 + $0xd04] ss:$16 sps:$4 sm:$0xff]  }
 0x12c   :  { %5177 = vmatpush1.bf16.msra.mxu0 %v8138_v31  ;;  %5629 = vmatprep.subr.bf16.mxu1 %v8149_v12  ;;  %v8219_v31 = vld [vmem:[%s11882_s1 + $0x8e8] ss:$16 sps:$4 sm:$0xff]   ;;  %v8222_v12 = vld [vmem:[%s11882_s1 + $0xd00] ss:$16 sps:$4 sm:$0xff]  }
 0x12d   :  { %5178 = vmatprep.subr.bf16.mxu0 %v8146_v33  ;;  %v8227_v33 = vld [vmem:[%s11882_s1 + $0x90c] ss:$16 sps:$4 sm:$0xff]  }
 0x12f   :  { %5630 = vmatpush1.bf16.msra.mxu1 %v8147_v35  ;;  %v8230_v35 = vld [vmem:[%s11882_s1 + $0xd24] ss:$16 sps:$4 sm:$0xff]  }
 0x130   :  { %5179 = vmatpush1.bf16.msra.mxu0 %v8144_v34  ;;  %5631 = vmatprep.subr.bf16.mxu1 %v8155_v37  ;;  %v8225_v34 = vld [vmem:[%s11882_s1 + $0x908] ss:$16 sps:$4 sm:$0xff]   ;;  %v8228_v37 = vld [vmem:[%s11882_s1 + $0xd20] ss:$16 sps:$4 sm:$0xff]  }
 0x131   :  { %5180 = vmatprep.subr.bf16.mxu0 %v8152_v0  ;;  %v8233_v0 = vld [vmem:[%s11882_s1 + $0x92c] ss:$16 sps:$4 sm:$0xff]  }
 0x133   :  { %5632 = vmatpush1.bf16.msra.mxu1 %v8153_v40  ;;  %v8236_v40 = vld [vmem:[%s11882_s1 + $0xd44] ss:$16 sps:$4 sm:$0xff]  }
 0x134   :  { %5181 = vmatpush1.bf16.msra.mxu0 %v8150_v38  ;;  %5633 = vmatprep.subr.bf16.mxu1 %v8161_v43  ;;  %v8231_v38 = vld [vmem:[%s11882_s1 + $0x928] ss:$16 sps:$4 sm:$0xff]   ;;  %v8234_v43 = vld [vmem:[%s11882_s1 + $0xd40] ss:$16 sps:$4 sm:$0xff]  }
 0x135   :  { %5182 = vmatprep.subr.bf16.mxu0 %v8158_v41  ;;  %v8239_v41 = vld [vmem:[%s11882_s1 + $0x94c] ss:$16 sps:$4 sm:$0xff]  }
 0x137   :  { %5634 = vmatpush1.bf16.msra.mxu1 %v8159_v44  ;;  %v8242_v44 = vld [vmem:[%s11882_s1 + $0xd64] ss:$16 sps:$4 sm:$0xff]  }
 0x138   :  { %5183 = vmatpush1.bf16.msra.mxu0 %v8156_v18  ;;  %5635 = vmatprep.subr.bf16.mxu1 %v8167_v22  ;;  %v8237_v18 = vld [vmem:[%s11882_s1 + $0x948] ss:$16 sps:$4 sm:$0xff]   ;;  %v8240_v22 = vld [vmem:[%s11882_s1 + $0xd60] ss:$16 sps:$4 sm:$0xff]  }
 0x139   :  { %5184 = vmatprep.subr.bf16.mxu0 %v8164_v46  ;;  %v8245_v46 = vld [vmem:[%s11882_s1 + $0x96c] ss:$16 sps:$4 sm:$0xff]  }
 0x13b   :  { %5636 = vmatpush1.bf16.msra.mxu1 %v8165_v50  ;;  %v8251_v50 = vld [vmem:[%s11882_s1 + $0x98c] ss:$16 sps:$4 sm:$0xff]  }
 0x13c   :  { %5185 = vmatpush1.bf16.msra.mxu0 %v8162_v48  ;;  %5637 = vmatprep.subr.bf16.mxu1 %v8173_v24  ;;  %v8248_v48 = vld [vmem:[%s11882_s1 + $0xd84] ss:$16 sps:$4 sm:$0xff]   ;;  %v8249_v24 = vld [vmem:[%s11882_s1 + $0x988] ss:$16 sps:$4 sm:$0xff]  }
 0x13d   :  { %5186 = vmatprep.subr.bf16.mxu0 %v8170_v51  ;;  %v8246_v51 = vld [vmem:[%s11882_s1 + $0xd80] ss:$16 sps:$4 sm:$0xff]  }
 0x13f   :  { %5638 = vmatpush1.bf16.msra.mxu1 %v8171_v53  ;;  %v8257_v53 = vld [vmem:[%s11882_s1 + $0x9ac] ss:$16 sps:$4 sm:$0xff]  }
 0x140   :  { %5187 = vmatpush1.bf16.msra.mxu0 %v8168_v52  ;;  %5648 = vmatprep.subr.bf16.mxu1 %v8179_v10  ;;  %v8254_v52 = vld [vmem:[%s11882_s1 + $0xda4] ss:$16 sps:$4 sm:$0xff]   ;;  %v8255_v10 = vld [vmem:[%s11882_s1 + $0x9a8] ss:$16 sps:$4 sm:$0xff]  }
 0x141   :  { %5197 = vmatprep.subr.bf16.mxu0 %v8176_v54  ;;  %v8252_v54 = vld [vmem:[%s11882_s1 + $0xda0] ss:$16 sps:$4 sm:$0xff]  }
 0x142   :  { %5640 = vmatmul.mubr.bf16.vlgmr.msra.gmra.mrb[4].mxu1 %v9692_v36  ;;  %v8191_v36 = vld [vmem:[%s11882_s1 + $0x84c] ss:$16 sps:$4 sm:$0xff]  }
 0x143   :  { %5189 = vmatmul.mubr.bf16.vlgmr.msra.gmra.mrb[0].mxu0 %v10107_v56  ;;  %5649 = vmatpush1.bf16.msra.mxu1 %v8177_v58  ;;  %v8258_v58 = vld [vmem:[%s11882_s1 + $0xdc0] ss:$16 sps:$4 sm:$0xff]  }
 0x144   :  { %5198 = vmatpush1.bf16.msra.mxu0 %v8174_v57  ;;  %5650 = vmatprep.subr.bf16.mxu1 %v8185_v60  ;;  %v8263_v57 = vld [vmem:[%s11882_s1 + $0x9cc] ss:$16 sps:$4 sm:$0xff]   ;;  %v8266_v60 = vld [vmem:[%s11882_s1 + $0xde4] ss:$16 sps:$4 sm:$0xff]  }
 0x145   :  { %5199 = vmatprep.subr.bf16.mxu0 %v8182_v59  ;;  %5229 = vmatprep.mubr.bf16.mxu0 %v10122_v61  ;;  %v8261_v59 = vld [vmem:[%s11882_s1 + $0x9c8] ss:$16 sps:$4 sm:$0xff]  }
 0x146   :  { %5680 = vmatprep.mubr.bf16.mxu1 %v9704_v39  ;;  %v8197_v39 = vld [vmem:[%s11882_s1 + $0x86c] ss:$16 sps:$4 sm:$0xff]  }
 0x147   :  { %5651 = vmatpush1.bf16.msra.mxu1 %v8183_v63  ;;  %v8264_v63 = vld [vmem:[%s11882_s1 + $0xde0] ss:$16 sps:$4 sm:$0xff]  }
 0x148   :  { %5200 = vmatpush1.bf16.msra.mxu0 %v8180_v62  ;;  %5652 = vmatprep.subr.bf16.mxu1 %v8191_v36  ;;  %v8269_v62 = vld [vmem:[%s11882_s1 + $0x9ec] ss:$16 sps:$4 sm:$0xff]   ;;  %v8273_v36 = vld [vmem:[%s11882_s1 + $0xe04] ss:$16 sps:$4 sm:$0xff]  }
 0x149   :  { %5201 = vmatprep.subr.bf16.mxu0 %v8188_v1  ;;  %v8267_v1 = vld [vmem:[%s11882_s1 + $0x9e8] ss:$16 sps:$4 sm:$0xff]  }
 0x14b   :  { %5653 = vmatpush1.bf16.msra.mxu1 %v8189_v3  ;;  %v10310_v3 = vrot.slane %v10089_v27, %v9186_v49  ;;  %v8282_v27 = vld [vmem:[%s11882_s1 + $0xa2c] ss:$16 sps:$4 sm:$0xff]  }
 0x14c   :  { %5202 = vmatpush1.bf16.msra.mxu0 %v8186_v2  ;;  %5654 = vmatprep.subr.bf16.mxu1 %v8197_v39  ;;  %v8276_v2 = vld [vmem:[%s11882_s1 + $0xa0c] ss:$16 sps:$4 sm:$0xff]   ;;  %v8274_v39 = vld [vmem:[%s11882_s1 + $0xa08] ss:$16 sps:$4 sm:$0xff]  }
 0x14d   :  { %5203 = vmatprep.subr.bf16.mxu0 %v8194_v6  ;;  %v8271_v6 = vld [vmem:[%s11882_s1 + $0xe00] ss:$16 sps:$4 sm:$0xff]  }
 0x14f   :  { %5655 = vmatpush1.bf16.msra.mxu1 %v8195_v8  ;;  %v10326_v8 = vcombine.high %v10122_v61, %v10122_v61 }
 0x150   :  { %5204 = vmatpush1.bf16.msra.mxu0 %v8192_v7  ;;  %5656 = vmatprep.subr.bf16.mxu1 %v8203_v11  ;;  %v8279_v7 = vld [vmem:[%s11882_s1 + $0xe24] ss:$16 sps:$4 sm:$0xff]   ;;  %v8280_v11 = vld [vmem:[%s11882_s1 + $0xa28] ss:$16 sps:$4 sm:$0xff]  }
 0x151   :  { %5205 = vmatprep.subr.bf16.mxu0 %v8200_v9  ;;  %v8277_v9 = vld [vmem:[%s11882_s1 + $0xe20] ss:$16 sps:$4 sm:$0xff]  }
 0x153   :  { %5657 = vmatpush1.bf16.msra.mxu1 %v8201_v14  ;;  %v8283_v14 = vld [vmem:[%s11882_s1 + $0xe40] ss:$16 sps:$4 sm:$0xff]  }
 0x154   :  { %5206 = vmatpush1.bf16.msra.mxu0 %v8198_v13  ;;  %5658 = vmatprep.subr.bf16.mxu1 %v8209_v16  ;;  %v8285_v13 = vld [vmem:[%s11882_s1 + $0xe44] ss:$16 sps:$4 sm:$0xff]  }
 0x155   :  { %5207 = vmatprep.subr.bf16.mxu0 %v8206_v15  ;;  %v8286_v15 = vld [vmem:[%s11882_s1 + $0xa48] ss:$16 sps:$4 sm:$0xff]   ;;  %v8291_v16 = vld [vmem:[%s11882_s1 + $0xe64] ss:$16 sps:$4 sm:$0xff]  }
 0x157   :  { %5659 = vmatpush1.bf16.msra.mxu1 %v8207_v19  ;;  %v8292_v19 = vld [vmem:[%s11882_s1 + $0xa68] ss:$16 sps:$4 sm:$0xff]  }
 0x158   :  { %5208 = vmatpush1.bf16.msra.mxu0 %v8204_v17  ;;  %5660 = vmatprep.subr.bf16.mxu1 %v8215_v21  ;;  %v8289_v17 = vld [vmem:[%s11882_s1 + $0xe60] ss:$16 sps:$4 sm:$0xff]   ;;  %v8300_v21 = vld [vmem:[%s11882_s1 + $0xa8c] ss:$16 sps:$4 sm:$0xff]  }
 0x159   :  { %5209 = vmatprep.subr.bf16.mxu0 %v8212_v20  ;;  %v8297_v20 = vld [vmem:[%s11882_s1 + $0xe84] ss:$16 sps:$4 sm:$0xff]  }
 0x15b   :  { %5661 = vmatpush1.bf16.msra.mxu1 %v8213_v25  ;;  %v8298_v25 = vld [vmem:[%s11882_s1 + $0xa88] ss:$16 sps:$4 sm:$0xff]  }
 0x15c   :  { %5210 = vmatpush1.bf16.msra.mxu0 %v8210_v23  ;;  %5662 = vmatprep.subr.bf16.mxu1 %v8221_v28  ;;  %v8295_v23 = vld [vmem:[%s11882_s1 + $0xe80] ss:$16 sps:$4 sm:$0xff]   ;;  %v8306_v28 = vld [vmem:[%s11882_s1 + $0xaac] ss:$16 sps:$4 sm:$0xff]  }
 0x15d   :  { %5211 = vmatprep.subr.bf16.mxu0 %v8218_v26  ;;  %v8303_v26 = vld [vmem:[%s11882_s1 + $0xea4] ss:$16 sps:$4 sm:$0xff]  }
 0x15f   :  { %5663 = vmatpush1.bf16.msra.mxu1 %v8219_v31  ;;  %v8304_v31 = vld [vmem:[%s11882_s1 + $0xaa8] ss:$16 sps:$4 sm:$0xff]  }
 0x160   :  { %5212 = vmatpush1.bf16.msra.mxu0 %v8216_v29  ;;  %5664 = vmatprep.subr.bf16.mxu1 %v8227_v33  ;;  %v8301_v29 = vld [vmem:[%s11882_s1 + $0xea0] ss:$16 sps:$4 sm:$0xff]   ;;  %v8312_v33 = vld [vmem:[%s11882_s1 + $0xacc] ss:$16 sps:$4 sm:$0xff]  }
 0x161   :  { %5213 = vmatprep.subr.bf16.mxu0 %v8224_v32  ;;  %v8309_v32 = vld [vmem:[%s11882_s1 + $0xec4] ss:$16 sps:$4 sm:$0xff]  }
 0x163   :  { %5665 = vmatpush1.bf16.msra.mxu1 %v8225_v34  ;;  %v8310_v34 = vld [vmem:[%s11882_s1 + $0xac8] ss:$16 sps:$4 sm:$0xff]  }
 0x164   :  { %5214 = vmatpush1.bf16.msra.mxu0 %v8222_v12  ;;  %5666 = vmatprep.subr.bf16.mxu1 %v8233_v0  ;;  %v8307_v12 = vld [vmem:[%s11882_s1 + $0xec0] ss:$16 sps:$4 sm:$0xff]   ;;  %v8318_v0 = vld [vmem:[%s11882_s1 + $0xaec] ss:$16 sps:$4 sm:$0xff]  }
 0x165   :  { %5215 = vmatprep.subr.bf16.mxu0 %v8230_v35  ;;  %v8315_v35 = vld [vmem:[%s11882_s1 + $0xee4] ss:$16 sps:$4 sm:$0xff]  }
 0x167   :  { %5667 = vmatpush1.bf16.msra.mxu1 %v8231_v38  ;;  %v8316_v38 = vld [vmem:[%s11882_s1 + $0xae8] ss:$16 sps:$4 sm:$0xff]  }
 0x168   :  { %5216 = vmatpush1.bf16.msra.mxu0 %v8228_v37  ;;  %5668 = vmatprep.subr.bf16.mxu1 %v8239_v41  ;;  %v8313_v37 = vld [vmem:[%s11882_s1 + $0xee0] ss:$16 sps:$4 sm:$0xff]   ;;  %v8324_v41 = vld [vmem:[%s11882_s1 + $0xb0c] ss:$16 sps:$4 sm:$0xff]  }
 0x169   :  { %5217 = vmatprep.subr.bf16.mxu0 %v8236_v40  ;;  %v8321_v40 = vld [vmem:[%s11882_s1 + $0xf04] ss:$16 sps:$4 sm:$0xff]  }
 0x16b   :  { %5669 = vmatpush1.bf16.msra.mxu1 %v8237_v18  ;;  %v8322_v18 = vld [vmem:[%s11882_s1 + $0xb08] ss:$16 sps:$4 sm:$0xff]  }
 0x16c   :  { %5218 = vmatpush1.bf16.msra.mxu0 %v8234_v43  ;;  %5670 = vmatprep.subr.bf16.mxu1 %v8245_v46  ;;  %v8319_v43 = vld [vmem:[%s11882_s1 + $0xf00] ss:$16 sps:$4 sm:$0xff]   ;;  %v8330_v46 = vld [vmem:[%s11882_s1 + $0xb2c] ss:$16 sps:$4 sm:$0xff]  }
 0x16d   :  { %5219 = vmatprep.subr.bf16.mxu0 %v8242_v44  ;;  %v8327_v44 = vld [vmem:[%s11882_s1 + $0xf24] ss:$16 sps:$4 sm:$0xff]  }
 0x16f   :  { %5671 = vmatpush1.bf16.msra.mxu1 %v8243_v47  ;;  %v8328_v47 = vld [vmem:[%s11882_s1 + $0xb28] ss:$16 sps:$4 sm:$0xff]  }
 0x170   :  { %5220 = vmatpush1.bf16.msra.mxu0 %v8240_v22  ;;  %5672 = vmatprep.subr.bf16.mxu1 %v8251_v50  ;;  %v8325_v22 = vld [vmem:[%s11882_s1 + $0xf20] ss:$16 sps:$4 sm:$0xff]   ;;  %v8336_v50 = vld [vmem:[%s11882_s1 + $0xb4c] ss:$16 sps:$4 sm:$0xff]  }
 0x171   :  { %5221 = vmatprep.subr.bf16.mxu0 %v8248_v48  ;;  %v8333_v48 = vld [vmem:[%s11882_s1 + $0xf44] ss:$16 sps:$4 sm:$0xff]  }
 0x173   :  { %5673 = vmatpush1.bf16.msra.mxu1 %v8249_v24  ;;  %v8334_v24 = vld [vmem:[%s11882_s1 + $0xb48] ss:$16 sps:$4 sm:$0xff]  }
 0x174   :  { %5222 = vmatpush1.bf16.msra.mxu0 %v8246_v51  ;;  %5674 = vmatprep.subr.bf16.mxu1 %v8257_v53  ;;  %v8331_v51 = vld [vmem:[%s11882_s1 + $0xf40] ss:$16 sps:$4 sm:$0xff]   ;;  %v8342_v53 = vld [vmem:[%s11882_s1 + $0xb6c] ss:$16 sps:$4 sm:$0xff]  }
 0x175   :  { %5223 = vmatprep.subr.bf16.mxu0 %v8254_v52  ;;  %v8339_v52 = vld [vmem:[%s11882_s1 + $0xf64] ss:$16 sps:$4 sm:$0xff]  }
 0x177   :  { %5675 = vmatpush1.bf16.msra.mxu1 %v8255_v10  ;;  %v8340_v10 = vld [vmem:[%s11882_s1 + $0xb68] ss:$16 sps:$4 sm:$0xff]  }
 0x178   :  { %5224 = vmatpush1.bf16.msra.mxu0 %v8252_v54  ;;  %5676 = vmatprep.subr.bf16.mxu1 %v8263_v57  ;;  %v8337_v54 = vld [vmem:[%s11882_s1 + $0xf60] ss:$16 sps:$4 sm:$0xff]   ;;  %v8348_v57 = vld [vmem:[%s11882_s1 + $0xb8c] ss:$16 sps:$4 sm:$0xff]  }
 0x179   :  { %5225 = vmatprep.subr.bf16.mxu0 %v8260_v55  ;;  %v8345_v55 = vld [vmem:[%s11882_s1 + $0xf84] ss:$16 sps:$4 sm:$0xff]  }
 0x17b   :  { %5677 = vmatpush1.bf16.msra.mxu1 %v8261_v59  ;;  %v8346_v59 = vld [vmem:[%s11882_s1 + $0xb88] ss:$16 sps:$4 sm:$0xff]  }
 0x17c   :  { %5226 = vmatpush1.bf16.msra.mxu0 %v8258_v58  ;;  %5678 = vmatprep.subr.bf16.mxu1 %v8269_v62  ;;  %v8343_v58 = vld [vmem:[%s11882_s1 + $0xf80] ss:$16 sps:$4 sm:$0xff]   ;;  %v8354_v62 = vld [vmem:[%s11882_s1 + $0xbac] ss:$16 sps:$4 sm:$0xff]  }
 0x17d   :  { %5227 = vmatprep.subr.bf16.mxu0 %v8266_v60  ;;  %v8351_v60 = vld [vmem:[%s11882_s1 + $0xfa4] ss:$16 sps:$4 sm:$0xff]  }
 0x17f   :  { %5679 = vmatpush1.bf16.msra.mxu1 %v8267_v1  ;;  %v8352_v1 = vld [vmem:[%s11882_s1 + $0xba8] ss:$16 sps:$4 sm:$0xff]  }
 0x180   :  { %5228 = vmatpush1.bf16.msra.mxu0 %v8264_v63  ;;  %5689 = vmatprep.subr.bf16.mxu1 %v8276_v2  ;;  %v8349_v63 = vld [vmem:[%s11882_s1 + $0xfa0] ss:$16 sps:$4 sm:$0xff]   ;;  %v8360_v2 = vld [vmem:[%s11882_s1 + $0xbcc] ss:$16 sps:$4 sm:$0xff]  }
 0x181   :  { %5238 = vmatprep.subr.bf16.mxu0 %v8273_v36  ;;  %v8357_v36 = vld [vmem:[%s11882_s1 + $0xfc4] ss:$16 sps:$4 sm:$0xff]  }
 0x182   :  { %5681 = vmatmul.mubr.bf16.vlgmr.msra.gmra.mrb[4].mxu1 %v9895_v45  ;;  %v8288_v45 = vld [vmem:[%s11882_s1 + $0xa4c] ss:$16 sps:$4 sm:$0xff]  }
 0x183   :  { %5230 = vmatmul.mubr.bf16.vlgmr.msra.gmra.mrb[0].mxu0 %v10310_v3  ;;  %5690 = vmatpush1.bf16.msra.mxu1 %v8274_v39  ;;  %v8355_v39 = vld [vmem:[%s11882_s1 + $0xfc0] ss:$16 sps:$4 sm:$0xff]  }
 0x184   :  { %5239 = vmatpush1.bf16.msra.mxu0 %v8271_v6  ;;  %5691 = vmatprep.subr.bf16.mxu1 %v8282_v27  ;;  %v10491_v6 = vld [vmem:[%s11881_s0 + $0x10] sm:$0xff] }
 0x185   :  { %5240 = vmatprep.subr.bf16.mxu0 %v8279_v7  ;;  %5270 = vmatprep.mubr.bf16.mxu0 %v10326_v8  ;;  %v8358_v7 = vld [vmem:[%s11882_s1 + $0xbc8] ss:$16 sps:$4 sm:$0xff]   ;;  %v8363_v27 = vld [vmem:[%s11882_s1 + $0xfe4] ss:$16 sps:$4 sm:$0xff]  }
 0x186   :  { %5721 = vmatprep.mubr.bf16.mxu1 %v9908_v30  ;;  %v8294_v30 = vld [vmem:[%s11882_s1 + $0xa6c] ss:$16 sps:$4 sm:$0xff]  }
 0x187   :  { %5692 = vmatpush1.bf16.msra.mxu1 %v8280_v11  ;;  %v10507_v11 = vrot.slane %v10491_v6, %v9186_v49 }
 0x188   :  { %5241 = vmatpush1.bf16.msra.mxu0 %v8277_v9  ;;  %5693 = vmatprep.subr.bf16.mxu1 %v8288_v45  ;;  %v8366_v9 = vld [vmem:[%s11882_s1 + $0xbec] ss:$16 sps:$4 sm:$0xff]   ;;  %v8364_v45 = vld [vmem:[%s11882_s1 + $0xbe8] ss:$16 sps:$4 sm:$0xff]  }
 0x189   :  { %5242 = vmatprep.subr.bf16.mxu0 %v8285_v13  ;;  %v8361_v13 = vld [vmem:[%s11882_s1 + $0xfe0] ss:$16 sps:$4 sm:$0xff]  }
 0x18b   :  { %5694 = vmatpush1.bf16.msra.mxu1 %v8286_v15  ;;  %v8372_v15 = vld [vmem:[%s11882_s1 + $0xc0c] ss:$16 sps:$4 sm:$0xff]  }
 0x18c   :  { %5243 = vmatpush1.bf16.msra.mxu0 %v8283_v14  ;;  %5695 = vmatprep.subr.bf16.mxu1 %v8294_v30  ;;  %v8369_v14 = vld [vmem:[%s11882_s1 + $0x1004] ss:$16 sps:$4 sm:$0xff]   ;;  %v10525_v30 = vcombine.high %v10310_v3, %v10310_v3 }
 0x18d   :  { %5244 = vmatprep.subr.bf16.mxu0 %v8291_v16  ;;  %v955_v16 = vcombine.high %v10507_v11, %v10507_v11 }
 0x18f   :  { %5696 = vmatpush1.bf16.msra.mxu1 %v8292_v19  ;;  %v8370_v19 = vld [vmem:[%s11882_s1 + $0xc08] ss:$16 sps:$4 sm:$0xff]  }
 0x190   :  { %5245 = vmatpush1.bf16.msra.mxu0 %v8289_v17  ;;  %5697 = vmatprep.subr.bf16.mxu1 %v8300_v21  ;;  %v8367_v17 = vld [vmem:[%s11882_s1 + $0x1000] ss:$16 sps:$4 sm:$0xff]   ;;  %v8378_v21 = vld [vmem:[%s11882_s1 + $0xc2c] ss:$16 sps:$4 sm:$0xff]  }
 0x191   :  { %5246 = vmatprep.subr.bf16.mxu0 %v8297_v20  ;;  %v8375_v20 = vld [vmem:[%s11882_s1 + $0x1024] ss:$16 sps:$4 sm:$0xff]  }
 0x193   :  { %5698 = vmatpush1.bf16.msra.mxu1 %v8298_v25  ;;  %v8373_v25 = vld [vmem:[%s11882_s1 + $0x1020] ss:$16 sps:$4 sm:$0xff]  }
 0x194   :  { %5247 = vmatpush1.bf16.msra.mxu0 %v8295_v23  ;;  %5699 = vmatprep.subr.bf16.mxu1 %v8306_v28  ;;  %v10540_v23 = vrot.slane %v955_v16, %v9186_v49  ;;  %v8381_v28 = vld [vmem:[%s11882_s1 + $0x1044] ss:$16 sps:$4 sm:$0xff]   ;;  %v8448_v16 = vld [vmem:[%s11882_s1 + $0xda8] ss:$16 sps:$4 sm:$0xff]  }
 0x195   :  { %5248 = vmatprep.subr.bf16.mxu0 %v8303_v26  ;;  %v8376_v26 = vld [vmem:[%s11882_s1 + $0xc28] ss:$16 sps:$4 sm:$0xff]  }
 0x197   :  { %5700 = vmatpush1.bf16.msra.mxu1 %v8304_v31  ;;  %v8382_v31 = vld [vmem:[%s11882_s1 + $0xc48] ss:$16 sps:$4 sm:$0xff]  }
 0x198   :  { %5249 = vmatpush1.bf16.msra.mxu0 %v8301_v29  ;;  %5701 = vmatprep.subr.bf16.mxu1 %v8312_v33  ;;  %v8379_v29 = vld [vmem:[%s11882_s1 + $0x1040] ss:$16 sps:$4 sm:$0xff]  }
 0x199   :  { %5250 = vmatprep.subr.bf16.mxu0 %v8309_v32  ;;  %v8387_v32 = vld [vmem:[%s11882_s1 + $0x1064] ss:$16 sps:$4 sm:$0xff]   ;;  %v8385_v33 = vld [vmem:[%s11882_s1 + $0x1060] ss:$16 sps:$4 sm:$0xff]  }
 0x19b   :  { %5702 = vmatpush1.bf16.msra.mxu1 %v8310_v34  ;;  %v8393_v34 = vld [vmem:[%s11882_s1 + $0x1084] ss:$16 sps:$4 sm:$0xff]  }
 0x19c   :  { %5251 = vmatpush1.bf16.msra.mxu0 %v8307_v12  ;;  %5703 = vmatprep.subr.bf16.mxu1 %v8318_v0  ;;  %v8388_v12 = vld [vmem:[%s11882_s1 + $0xc68] ss:$16 sps:$4 sm:$0xff]   ;;  %v8391_v0 = vld [vmem:[%s11882_s1 + $0x1080] ss:$16 sps:$4 sm:$0xff]  }
 0x19d   :  { %5252 = vmatprep.subr.bf16.mxu0 %v8315_v35  ;;  %v8396_v35 = vld [vmem:[%s11882_s1 + $0xc8c] ss:$16 sps:$4 sm:$0xff]  }
 0x19f   :  { %5704 = vmatpush1.bf16.msra.mxu1 %v8316_v38  ;;  %v8399_v38 = vld [vmem:[%s11882_s1 + $0x10a4] ss:$16 sps:$4 sm:$0xff]  }
 0x1a0   :  { %5253 = vmatpush1.bf16.msra.mxu0 %v8313_v37  ;;  %5705 = vmatprep.subr.bf16.mxu1 %v8324_v41  ;;  %v8394_v37 = vld [vmem:[%s11882_s1 + $0xc88] ss:$16 sps:$4 sm:$0xff]   ;;  %v8397_v41 = vld [vmem:[%s11882_s1 + $0x10a0] ss:$16 sps:$4 sm:$0xff]  }
 0x1a1   :  { %5254 = vmatprep.subr.bf16.mxu0 %v8321_v40  ;;  %v8402_v40 = vld [vmem:[%s11882_s1 + $0xcac] ss:$16 sps:$4 sm:$0xff]  }
 0x1a3   :  { %5706 = vmatpush1.bf16.msra.mxu1 %v8322_v18  ;;  %v8405_v18 = vld [vmem:[%s11882_s1 + $0x10c4] ss:$16 sps:$4 sm:$0xff]  }
 0x1a4   :  { %5255 = vmatpush1.bf16.msra.mxu0 %v8319_v43  ;;  %5707 = vmatprep.subr.bf16.mxu1 %v8330_v46  ;;  %v8400_v43 = vld [vmem:[%s11882_s1 + $0xca8] ss:$16 sps:$4 sm:$0xff]   ;;  %v8403_v46 = vld [vmem:[%s11882_s1 + $0x10c0] ss:$16 sps:$4 sm:$0xff]  }
 0x1a5   :  { %5256 = vmatprep.subr.bf16.mxu0 %v8327_v44  ;;  %v8408_v44 = vld [vmem:[%s11882_s1 + $0xccc] ss:$16 sps:$4 sm:$0xff]  }
 0x1a7   :  { %5708 = vmatpush1.bf16.msra.mxu1 %v8328_v47  ;;  %v8411_v47 = vld [vmem:[%s11882_s1 + $0x10e4] ss:$16 sps:$4 sm:$0xff]  }
 0x1a8   :  { %5257 = vmatpush1.bf16.msra.mxu0 %v8325_v22  ;;  %5709 = vmatprep.subr.bf16.mxu1 %v8336_v50  ;;  %v8406_v22 = vld [vmem:[%s11882_s1 + $0xcc8] ss:$16 sps:$4 sm:$0xff]   ;;  %v8409_v50 = vld [vmem:[%s11882_s1 + $0x10e0] ss:$16 sps:$4 sm:$0xff]  }
 0x1a9   :  { %5258 = vmatprep.subr.bf16.mxu0 %v8333_v48  ;;  %v8414_v48 = vld [vmem:[%s11882_s1 + $0xcec] ss:$16 sps:$4 sm:$0xff]  }
 0x1ab   :  { %5710 = vmatpush1.bf16.msra.mxu1 %v8334_v24  ;;  %v8417_v24 = vld [vmem:[%s11882_s1 + $0x1104] ss:$16 sps:$4 sm:$0xff]  }
 0x1ac   :  { %5259 = vmatpush1.bf16.msra.mxu0 %v8331_v51  ;;  %5711 = vmatprep.subr.bf16.mxu1 %v8342_v53  ;;  %v8412_v51 = vld [vmem:[%s11882_s1 + $0xce8] ss:$16 sps:$4 sm:$0xff]   ;;  %v8415_v53 = vld [vmem:[%s11882_s1 + $0x1100] ss:$16 sps:$4 sm:$0xff]  }
 0x1ad   :  { %5260 = vmatprep.subr.bf16.mxu0 %v8339_v52  ;;  %v8420_v52 = vld [vmem:[%s11882_s1 + $0xd0c] ss:$16 sps:$4 sm:$0xff]  }
 0x1af   :  { %5712 = vmatpush1.bf16.msra.mxu1 %v8340_v10  ;;  %v8423_v10 = vld [vmem:[%s11882_s1 + $0x1124] ss:$16 sps:$4 sm:$0xff]  }
 0x1b0   :  { %5261 = vmatpush1.bf16.msra.mxu0 %v8337_v54  ;;  %5713 = vmatprep.subr.bf16.mxu1 %v8348_v57  ;;  %v8418_v54 = vld [vmem:[%s11882_s1 + $0xd08] ss:$16 sps:$4 sm:$0xff]   ;;  %v8421_v57 = vld [vmem:[%s11882_s1 + $0x1120] ss:$16 sps:$4 sm:$0xff]  }
 0x1b1   :  { %5262 = vmatprep.subr.bf16.mxu0 %v8345_v55  ;;  %v8426_v55 = vld [vmem:[%s11882_s1 + $0xd2c] ss:$16 sps:$4 sm:$0xff]  }
 0x1b3   :  { %5714 = vmatpush1.bf16.msra.mxu1 %v8346_v59  ;;  %v8429_v59 = vld [vmem:[%s11882_s1 + $0x1144] ss:$16 sps:$4 sm:$0xff]  }
 0x1b4   :  { %5263 = vmatpush1.bf16.msra.mxu0 %v8343_v58  ;;  %5715 = vmatprep.subr.bf16.mxu1 %v8354_v62  ;;  %v8424_v58 = vld [vmem:[%s11882_s1 + $0xd28] ss:$16 sps:$4 sm:$0xff]   ;;  %v8427_v62 = vld [vmem:[%s11882_s1 + $0x1140] ss:$16 sps:$4 sm:$0xff]  }
 0x1b5   :  { %5264 = vmatprep.subr.bf16.mxu0 %v8351_v60  ;;  %v8432_v60 = vld [vmem:[%s11882_s1 + $0xd4c] ss:$16 sps:$4 sm:$0xff]  }
 0x1b7   :  { %5716 = vmatpush1.bf16.msra.mxu1 %v8352_v1  ;;  %v8435_v1 = vld [vmem:[%s11882_s1 + $0x1164] ss:$16 sps:$4 sm:$0xff]  }
 0x1b8   :  { %5265 = vmatpush1.bf16.msra.mxu0 %v8349_v63  ;;  %5717 = vmatprep.subr.bf16.mxu1 %v8360_v2  ;;  %v8430_v63 = vld [vmem:[%s11882_s1 + $0xd48] ss:$16 sps:$4 sm:$0xff]   ;;  %v8433_v2 = vld [vmem:[%s11882_s1 + $0x1160] ss:$16 sps:$4 sm:$0xff]  }
 0x1b9   :  { %5266 = vmatprep.subr.bf16.mxu0 %v8357_v36  ;;  %v8438_v36 = vld [vmem:[%s11882_s1 + $0xd6c] ss:$16 sps:$4 sm:$0xff]  }
 0x1bb   :  { %5718 = vmatpush1.bf16.msra.mxu1 %v8358_v7  ;;  %v8441_v7 = vld [vmem:[%s11882_s1 + $0x1184] ss:$16 sps:$4 sm:$0xff]  }
 0x1bc   :  { %5267 = vmatpush1.bf16.msra.mxu0 %v8355_v39  ;;  %5719 = vmatprep.subr.bf16.mxu1 %v8366_v9  ;;  %v8436_v39 = vld [vmem:[%s11882_s1 + $0xd68] ss:$16 sps:$4 sm:$0xff]   ;;  %v8439_v9 = vld [vmem:[%s11882_s1 + $0x1180] ss:$16 sps:$4 sm:$0xff]  }
 0x1bd   :  { %5268 = vmatprep.subr.bf16.mxu0 %v8363_v27  ;;  %v8444_v27 = vld [vmem:[%s11882_s1 + $0xd8c] ss:$16 sps:$4 sm:$0xff]  }
 0x1bf   :  { %5720 = vmatpush1.bf16.msra.mxu1 %v8364_v45  ;;  %v8447_v45 = vld [vmem:[%s11882_s1 + $0x11a4] ss:$16 sps:$4 sm:$0xff]  }
 0x1c0   :  { %5269 = vmatpush1.bf16.msra.mxu0 %v8361_v13  ;;  %5730 = vmatprep.subr.bf16.mxu1 %v8372_v15  ;;  %v8442_v13 = vld [vmem:[%s11882_s1 + $0xd88] ss:$16 sps:$4 sm:$0xff]   ;;  %v8445_v15 = vld [vmem:[%s11882_s1 + $0x11a0] ss:$16 sps:$4 sm:$0xff]  }
 0x1c1   :  { %5279 = vmatprep.subr.bf16.mxu0 %v8369_v14  ;;  %v8450_v14 = vld [vmem:[%s11882_s1 + $0xdac] ss:$16 sps:$4 sm:$0xff]  }
 0x1c2   :  { %5722 = vmatmul.mubr.bf16.vlgmr.msra.gmra.mrb[4].mxu1 %v10107_v56  ;;  %v8384_v56 = vld [vmem:[%s11882_s1 + $0xc4c] ss:$16 sps:$4 sm:$0xff]  }
 0x1c3   :  { %5271 = vmatmul.mubr.bf16.vlgmr.msra.gmra.mrb[0].mxu0 %v10525_v30  ;;  %5731 = vmatpush1.bf16.msra.mxu1 %v8370_v19  ;;  %v8456_v19 = vld [vmem:[%s11882_s1 + $0xdcc] ss:$16 sps:$4 sm:$0xff]  }
 0x1c4   :  { %5280 = vmatpush1.bf16.msra.mxu0 %v8367_v17  ;;  %5732 = vmatprep.subr.bf16.mxu1 %v8378_v21  ;;  %v8453_v17 = vld [vmem:[%s11882_s1 + $0x11c4] ss:$16 sps:$4 sm:$0xff]   ;;  %v8454_v21 = vld [vmem:[%s11882_s1 + $0xdc8] ss:$16 sps:$4 sm:$0xff]  }
 0x1c5   :  { %5281 = vmatprep.subr.bf16.mxu0 %v8375_v20  ;;  %5311 = vmatprep.mubr.bf16.mxu0 %v10540_v23  ;;  %v8451_v20 = vld [vmem:[%s11882_s1 + $0x11c0] ss:$16 sps:$4 sm:$0xff]  }
 0x1c6   :  { %5762 = vmatprep.mubr.bf16.mxu1 %v10122_v61  ;;  %v8390_v61 = vld [vmem:[%s11882_s1 + $0xc6c] ss:$16 sps:$4 sm:$0xff]  }
 0x1c7   :  { %5733 = vmatpush1.bf16.msra.mxu1 %v8376_v26  ;;  %v8462_v26 = vld [vmem:[%s11882_s1 + $0xdec] ss:$16 sps:$4 sm:$0xff]  }
 0x1c8   :  { %5282 = vmatpush1.bf16.msra.mxu0 %v8373_v25  ;;  %5734 = vmatprep.subr.bf16.mxu1 %v8384_v56  ;;  %v8459_v25 = vld [vmem:[%s11882_s1 + $0x11e4] ss:$16 sps:$4 sm:$0xff]  }
 0x1c9   :  { %5283 = vmatprep.subr.bf16.mxu0 %v8381_v28 }
 0x1cb   :  { %5735 = vmatpush1.bf16.msra.mxu1 %v8382_v31 }
 0x1cc   :  { %5284 = vmatpush1.bf16.msra.mxu0 %v8379_v29  ;;  %5736 = vmatprep.subr.bf16.mxu1 %v8390_v61 }
 0x1cd   :  { %5285 = vmatprep.subr.bf16.mxu0 %v8387_v32 }
 0x1cf   :  { %5737 = vmatpush1.bf16.msra.mxu1 %v8388_v12 }
 0x1d0   :  { %5286 = vmatpush1.bf16.msra.mxu0 %v8385_v33  ;;  %5738 = vmatprep.subr.bf16.mxu1 %v8396_v35 }
 0x1d1   :  { %5287 = vmatprep.subr.bf16.mxu0 %v8393_v34 }
 0x1d3   :  { %5739 = vmatpush1.bf16.msra.mxu1 %v8394_v37 }
 0x1d4   :  { %5288 = vmatpush1.bf16.msra.mxu0 %v8391_v0  ;;  %5740 = vmatprep.subr.bf16.mxu1 %v8402_v40 }
 0x1d5   :  { %5289 = vmatprep.subr.bf16.mxu0 %v8399_v38 }
 0x1d7   :  { %5741 = vmatpush1.bf16.msra.mxu1 %v8400_v43 }
 0x1d8   :  { %5290 = vmatpush1.bf16.msra.mxu0 %v8397_v41  ;;  %5742 = vmatprep.subr.bf16.mxu1 %v8408_v44 }
 0x1d9   :  { %5291 = vmatprep.subr.bf16.mxu0 %v8405_v18 }
 0x1db   :  { %5743 = vmatpush1.bf16.msra.mxu1 %v8406_v22 }
 0x1dc   :  { %5292 = vmatpush1.bf16.msra.mxu0 %v8403_v46  ;;  %5744 = vmatprep.subr.bf16.mxu1 %v8414_v48 }
 0x1dd   :  { %5293 = vmatprep.subr.bf16.mxu0 %v8411_v47 }
 0x1df   :  { %5745 = vmatpush1.bf16.msra.mxu1 %v8412_v51 }
 0x1e0   :  { %5294 = vmatpush1.bf16.msra.mxu0 %v8409_v50  ;;  %5746 = vmatprep.subr.bf16.mxu1 %v8420_v52 }
 0x1e1   :  { %5295 = vmatprep.subr.bf16.mxu0 %v8417_v24 }
 0x1e3   :  { %5747 = vmatpush1.bf16.msra.mxu1 %v8418_v54 }
 0x1e4   :  { %5296 = vmatpush1.bf16.msra.mxu0 %v8415_v53  ;;  %5748 = vmatprep.subr.bf16.mxu1 %v8426_v55 }
 0x1e5   :  { %5297 = vmatprep.subr.bf16.mxu0 %v8423_v10 }
 0x1e7   :  { %5749 = vmatpush1.bf16.msra.mxu1 %v8424_v58 }
 0x1e8   :  { %5298 = vmatpush1.bf16.msra.mxu0 %v8421_v57  ;;  %5750 = vmatprep.subr.bf16.mxu1 %v8432_v60 }
 0x1e9   :  { %5299 = vmatprep.subr.bf16.mxu0 %v8429_v59 }
 0x1eb   :  { %5751 = vmatpush1.bf16.msra.mxu1 %v8430_v63 }
 0x1ec   :  { %5300 = vmatpush1.bf16.msra.mxu0 %v8427_v62  ;;  %5752 = vmatprep.subr.bf16.mxu1 %v8438_v36 }
 0x1ed   :  { %5301 = vmatprep.subr.bf16.mxu0 %v8435_v1 }
 0x1ef   :  { %5753 = vmatpush1.bf16.msra.mxu1 %v8436_v39 }
 0x1f0   :  { %5302 = vmatpush1.bf16.msra.mxu0 %v8433_v2  ;;  %5754 = vmatprep.subr.bf16.mxu1 %v8444_v27 }
 0x1f1   :  { %5303 = vmatprep.subr.bf16.mxu0 %v8441_v7 }
 0x1f3   :  { %5755 = vmatpush1.bf16.msra.mxu1 %v8442_v13 }
 0x1f4   :  { %5304 = vmatpush1.bf16.msra.mxu0 %v8439_v9  ;;  %5756 = vmatprep.subr.bf16.mxu1 %v8450_v14 }
 0x1f5   :  { %5305 = vmatprep.subr.bf16.mxu0 %v8447_v45 }
 0x1f7   :  { %5757 = vmatpush1.bf16.msra.mxu1 %v8448_v16 }
 0x1f8   :  { %5306 = vmatpush1.bf16.msra.mxu0 %v8445_v15  ;;  %5758 = vmatprep.subr.bf16.mxu1 %v8456_v19 }
 0x1f9   :  { %5307 = vmatprep.subr.bf16.mxu0 %v8453_v17 }
 0x1fa   :  { %12 = vsyncpa [#allocation3], 0  ;;  %v8457_v28 = vld [vmem:[%s11882_s1 + $0x11e0] ss:$16 sps:$4 sm:$0xff]   ;;  %v8460_v56 = vld [vmem:[%s11882_s1 + $0xde8] ss:$16 sps:$4 sm:$0xff]   ;;  %v10728_v32 = vrot.slane %v10507_v11, %v9186_v49  ;;  %v10744_v34 = vcombine.high %v10540_v23, %v10540_v23 }
 0x1fb   :  { %5759 = vmatpush1.bf16.msra.mxu1 %v8454_v21  ;;  %v8465_v29 = vld [vmem:[%s11882_s1 + $0x1204] ss:$16 sps:$4 sm:$0xff]   ;;  %v8468_v31 = vld [vmem:[%s11882_s1 + $0xe0c] ss:$16 sps:$4 sm:$0xff]   ;;  %v8463_v61 = vld [vmem:[%s11882_s1 + $0x1200] ss:$16 sps:$4 sm:$0xff]  }
 0x1fc   :  { %5308 = vmatpush1.bf16.msra.mxu0 %v8451_v20  ;;  %5760 = vmatprep.subr.bf16.mxu1 %v8462_v26  ;;  %v8466_v33 = vld [vmem:[%s11882_s1 + $0xe08] ss:$16 sps:$4 sm:$0xff]   ;;  %v8471_v12 = vld [vmem:[%s11882_s1 + $0x1224] ss:$16 sps:$4 sm:$0xff]   ;;  %v8474_v11 = vld [vmem:[%s11882_s1 + $0xe2c] ss:$16 sps:$4 sm:$0xff]  }
 0x1fd   :  { %5309 = vmatprep.subr.bf16.mxu0 %v8459_v25  ;;  %v8469_v35 = vld [vmem:[%s11882_s1 + $0x1220] ss:$16 sps:$4 sm:$0xff]   ;;  %v8472_v0 = vld [vmem:[%s11882_s1 + $0xe28] ss:$16 sps:$4 sm:$0xff]   ;;  %v8477_v37 = vld [vmem:[%s11882_s1 + $0x1244] ss:$16 sps:$4 sm:$0xff]  }
 0x1fe   :  { %v8475_v38 = vld [vmem:[%s11882_s1 + $0x1240] ss:$16 sps:$4 sm:$0xff]   ;;  %v8478_v40 = vld [vmem:[%s11882_s1 + $0xe48] ss:$16 sps:$4 sm:$0xff]   ;;  %v8483_v41 = vld [vmem:[%s11882_s1 + $0x1264] ss:$16 sps:$4 sm:$0xff]  }
 0x1ff   :  { %5761 = vmatpush1.bf16.msra.mxu1 %v8460_v56  ;;  %v8481_v43 = vld [vmem:[%s11882_s1 + $0x1260] ss:$16 sps:$4 sm:$0xff]   ;;  %v8484_v18 = vld [vmem:[%s11882_s1 + $0xe68] ss:$16 sps:$4 sm:$0xff]   ;;  %v8489_v44 = vld [vmem:[%s11882_s1 + $0x1284] ss:$16 sps:$4 sm:$0xff]  }
 0x200   :  { %5310 = vmatpush1.bf16.msra.mxu0 %v8457_v28  ;;  %5771 = vmatprep.subr.bf16.mxu1 %v8468_v31  ;;  %v8492_v46 = vld [vmem:[%s11882_s1 + $0xe8c] ss:$16 sps:$4 sm:$0xff]   ;;  %v8487_v22 = vld [vmem:[%s11882_s1 + $0x1280] ss:$16 sps:$4 sm:$0xff]   ;;  %v8490_v47 = vld [vmem:[%s11882_s1 + $0xe88] ss:$16 sps:$4 sm:$0xff]  }
 0x201   :  { %5320 = vmatprep.subr.bf16.mxu0 %v8465_v29  ;;  %v8495_v48 = vld [vmem:[%s11882_s1 + $0x12a4] ss:$16 sps:$4 sm:$0xff]   ;;  %v8498_v50 = vld [vmem:[%s11882_s1 + $0xeac] ss:$16 sps:$4 sm:$0xff]   ;;  %v8493_v51 = vld [vmem:[%s11882_s1 + $0x12a0] ss:$16 sps:$4 sm:$0xff]  }
 0x202   :  { %5763 = vmatmul.mubr.bf16.vlgmr.msra.gmra.mrb[4].mxu1 %v10310_v3  ;;  %v8480_v3 = vld [vmem:[%s11882_s1 + $0xe4c] ss:$16 sps:$4 sm:$0xff]   ;;  %v8496_v24 = vld [vmem:[%s11882_s1 + $0xea8] ss:$16 sps:$4 sm:$0xff]   ;;  %v8501_v52 = vld [vmem:[%s11882_s1 + $0x12c4] ss:$16 sps:$4 sm:$0xff]  }
 0x203   :  { %5312 = vmatmul.mubr.bf16.vlgmr.msra.gmra.mrb[0].mxu0 %v10728_v32  ;;  %5772 = vmatpush1.bf16.msra.mxu1 %v8466_v33  ;;  %v8504_v53 = vld [vmem:[%s11882_s1 + $0xecc] ss:$16 sps:$4 sm:$0xff]   ;;  %v8499_v54 = vld [vmem:[%s11882_s1 + $0x12c0] ss:$16 sps:$4 sm:$0xff]   ;;  %v8502_v10 = vld [vmem:[%s11882_s1 + $0xec8] ss:$16 sps:$4 sm:$0xff]   ;;  %v940_v33 = vcombine.high %v10491_v6, %v10491_v6 }
 0x204   :  { %5321 = vmatpush1.bf16.msra.mxu0 %v8463_v61  ;;  %5773 = vmatprep.subr.bf16.mxu1 %v8474_v11  ;;  %v8507_v55 = vld [vmem:[%s11882_s1 + $0x12e4] ss:$16 sps:$4 sm:$0xff]   ;;  %v8510_v57 = vld [vmem:[%s11882_s1 + $0xeec] ss:$16 sps:$4 sm:$0xff]   ;;  %v8505_v58 = vld [vmem:[%s11882_s1 + $0x12e0] ss:$16 sps:$4 sm:$0xff]  }
 0x205   :  { %5322 = vmatprep.subr.bf16.mxu0 %v8471_v12  ;;  %5352 = vmatprep.mubr.bf16.mxu0 %v10744_v34  ;;  %v8508_v59 = vld [vmem:[%s11882_s1 + $0xee8] ss:$16 sps:$4 sm:$0xff]   ;;  %v8513_v60 = vld [vmem:[%s11882_s1 + $0x1304] ss:$16 sps:$4 sm:$0xff]   ;;  %v8516_v62 = vld [vmem:[%s11882_s1 + $0xf0c] ss:$16 sps:$4 sm:$0xff]  }
 0x206   :  { %5803 = vmatprep.mubr.bf16.mxu1 %v10326_v8  ;;  %v8486_v8 = vld [vmem:[%s11882_s1 + $0xe6c] ss:$16 sps:$4 sm:$0xff]   ;;  %v8511_v63 = vld [vmem:[%s11882_s1 + $0x1300] ss:$16 sps:$4 sm:$0xff]   ;;  %v8514_v1 = vld [vmem:[%s11882_s1 + $0xf08] ss:$16 sps:$4 sm:$0xff]  }
 0x207   :  { %5774 = vmatpush1.bf16.msra.mxu1 %v8472_v0  ;;  %v8519_v36 = vld [vmem:[%s11882_s1 + $0x1324] ss:$16 sps:$4 sm:$0xff]   ;;  %v8522_v2 = vld [vmem:[%s11882_s1 + $0xf2c] ss:$16 sps:$4 sm:$0xff]   ;;  %v8517_v39 = vld [vmem:[%s11882_s1 + $0x1320] ss:$16 sps:$4 sm:$0xff]   ;;  %v10921_v0 = vrot.slane %v940_v33, %v9186_v49 }
 0x208   :  { %5323 = vmatpush1.bf16.msra.mxu0 %v8469_v35  ;;  %5775 = vmatprep.subr.bf16.mxu1 %v8480_v3  ;;  %v8520_v7 = vld [vmem:[%s11882_s1 + $0xf28] ss:$16 sps:$4 sm:$0xff]   ;;  %v8525_v27 = vld [vmem:[%s11882_s1 + $0x1344] ss:$16 sps:$4 sm:$0xff]   ;;  %v8528_v9 = vld [vmem:[%s11882_s1 + $0xf4c] ss:$16 sps:$4 sm:$0xff]  }
 0x209   :  { %5324 = vmatprep.subr.bf16.mxu0 %v8477_v37  ;;  %v8523_v13 = vld [vmem:[%s11882_s1 + $0x1340] ss:$16 sps:$4 sm:$0xff]   ;;  %v8526_v45 = vld [vmem:[%s11882_s1 + $0xf48] ss:$16 sps:$4 sm:$0xff]   ;;  %v8531_v14 = vld [vmem:[%s11882_s1 + $0x1364] ss:$16 sps:$4 sm:$0xff]  }
 0x20a   :  { %v8534_v15 = vld [vmem:[%s11882_s1 + $0xf6c] ss:$16 sps:$4 sm:$0xff]   ;;  %v8529_v16 = vld [vmem:[%s11882_s1 + $0x1360] ss:$16 sps:$4 sm:$0xff]   ;;  %v8532_v17 = vld [vmem:[%s11882_s1 + $0xf68] ss:$16 sps:$4 sm:$0xff]  }
 0x20b   :  { %5776 = vmatpush1.bf16.msra.mxu1 %v8478_v40  ;;  %v8537_v19 = vld [vmem:[%s11882_s1 + $0x1384] ss:$16 sps:$4 sm:$0xff]   ;;  %v8540_v20 = vld [vmem:[%s11882_s1 + $0xf8c] ss:$16 sps:$4 sm:$0xff]   ;;  %v8535_v21 = vld [vmem:[%s11882_s1 + $0x1380] ss:$16 sps:$4 sm:$0xff]  }
 0x20c   :  { %5325 = vmatpush1.bf16.msra.mxu0 %v8475_v38  ;;  %5777 = vmatprep.subr.bf16.mxu1 %v8486_v8  ;;  %v8538_v25 = vld [vmem:[%s11882_s1 + $0xf88] ss:$16 sps:$4 sm:$0xff]   ;;  %v8543_v26 = vld [vmem:[%s11882_s1 + $0x13a4] ss:$16 sps:$4 sm:$0xff]   ;;  %v8546_v28 = vld [vmem:[%s11882_s1 + $0xfac] ss:$16 sps:$4 sm:$0xff]   ;;  %v10939_v8 = vcombine.high %v10728_v32, %v10728_v32 }
 0x20d   :  { %5326 = vmatprep.subr.bf16.mxu0 %v8483_v41  ;;  %v8541_v56 = vld [vmem:[%s11882_s1 + $0x13a0] ss:$16 sps:$4 sm:$0xff]   ;;  %v8544_v29 = vld [vmem:[%s11882_s1 + $0xfa8] ss:$16 sps:$4 sm:$0xff]   ;;  %v8549_v31 = vld [vmem:[%s11882_s1 + $0x13c4] ss:$16 sps:$4 sm:$0xff]   ;;  %v956_v41 = vcombine.high %v10921_v0, %v10921_v0 }
 0x20e   :  { %v8552_v61 = vld [vmem:[%s11882_s1 + $0xfcc] ss:$16 sps:$4 sm:$0xff]   ;;  %v8547_v12 = vld [vmem:[%s11882_s1 + $0x13c0] ss:$16 sps:$4 sm:$0xff]   ;;  %v8550_v11 = vld [vmem:[%s11882_s1 + $0xfc8] ss:$16 sps:$4 sm:$0xff]  }
 0x20f   :  { %5778 = vmatpush1.bf16.msra.mxu1 %v8484_v18  ;;  %v8555_v35 = vld [vmem:[%s11882_s1 + $0x13e4] ss:$16 sps:$4 sm:$0xff]   ;;  %v8558_v6 = vld [vmem:[%s11882_s1 + $0xfec] ss:$16 sps:$4 sm:$0xff]   ;;  %v8553_v37 = vld [vmem:[%s11882_s1 + $0x13e0] ss:$16 sps:$4 sm:$0xff]  }
 0x210   :  { %5327 = vmatpush1.bf16.msra.mxu0 %v8481_v43  ;;  %5779 = vmatprep.subr.bf16.mxu1 %v8492_v46  ;;  %v8556_v3 = vld [vmem:[%s11882_s1 + $0xfe8] ss:$16 sps:$4 sm:$0xff]   ;;  %v8561_v38 = vld [vmem:[%s11882_s1 + $0x1404] ss:$16 sps:$4 sm:$0xff]   ;;  %v8564_v40 = vld [vmem:[%s11882_s1 + $0x100c] ss:$16 sps:$4 sm:$0xff]  }
 0x211   :  { %5328 = vmatprep.subr.bf16.mxu0 %v8489_v44  ;;  %v8559_v43 = vld [vmem:[%s11882_s1 + $0x1400] ss:$16 sps:$4 sm:$0xff]   ;;  %v8562_v18 = vld [vmem:[%s11882_s1 + $0x1008] ss:$16 sps:$4 sm:$0xff]   ;;  %v8567_v44 = vld [vmem:[%s11882_s1 + $0x1424] ss:$16 sps:$4 sm:$0xff]  }
 0x212   :  { %v8570_v46 = vld [vmem:[%s11882_s1 + $0x102c] ss:$16 sps:$4 sm:$0xff]   ;;  %v8628_v33 = vld [vmem:[%s11882_s1 + $0x1168] ss:$16 sps:$4 sm:$0xff]   ;;  %vm4947_vm0 = vcmask 523264   ;;  %s9010_s18 = smov [#allocation2]  }
 0x213   :  { %5780 = vmatpush1.bf16.msra.mxu1 %v8490_v47  ;;  %v8565_v47 = vld [vmem:[%s11882_s1 + $0x1420] ss:$16 sps:$4 sm:$0xff]   ;;  %s6690_s19 = sshll.u32 %s9010_s18, 4  ;;  %vm6682_vm1 = vcmask 41984   ;;  %s6691_s19 = int_to_ptr.vmem [resolvable:$true] %s6690_s19 }
 0x214   :  { %5329 = vmatpush1.bf16.msra.mxu0 %v8487_v22  ;;  %5781 = vmatprep.subr.bf16.mxu1 %v8498_v50  ;;  %v10954_v22 = vrot.slane %v956_v41, %v9186_v49  ;;  %v8573_v50 = vld [vmem:[%s11882_s1 + $0x1444] ss:$16 sps:$4 sm:$0xff]   ;;  %s8984_s20 = scalar_lea.vmem %s6691_s19, 32  ;;  %p8989_p1 = scmp.lt.s32.totalorder %s6691_s19, %s6691_s19 }
 0x215   :  { %5330 = vmatprep.subr.bf16.mxu0 %v8495_v48  ;;  %v8568_v48 = vld [vmem:[%s11882_s1 + $0x1028] ss:$16 sps:$4 sm:$0xff]   ;;  %v8645_v41 = vld [vmem:[%s11882_s1 + $0x15c4] ss:$16 sps:$4 sm:$0xff]   ;;  %p8985_p0 = scmp.ne.s32.totalorder %s6691_s19, %s8984_s20  ;;  %p8990_p2 = scmp.lt.s32.totalorder %s8984_s20, %s8984_s20 }
 0x217   :  { %5782 = vmatpush1.bf16.msra.mxu1 %v8496_v24  ;;  %v8574_v24 = vld [vmem:[%s11882_s1 + $0x1048] ss:$16 sps:$4 sm:$0xff]   ;;  %p8991_p3 = por %p8990_p2, %p8989_p1 }
 0x218   :  { %5331 = vmatpush1.bf16.msra.mxu0 %v8493_v51  ;;  %5783 = vmatprep.subr.bf16.mxu1 %v8504_v53  ;;  %v8571_v51 = vld [vmem:[%s11882_s1 + $0x1440] ss:$16 sps:$4 sm:$0xff]  }
 0x219   :  { %5332 = vmatprep.subr.bf16.mxu0 %v8501_v52  ;;  %v8579_v52 = vld [vmem:[%s11882_s1 + $0x1464] ss:$16 sps:$4 sm:$0xff]   ;;  %v8577_v53 = vld [vmem:[%s11882_s1 + $0x1460] ss:$16 sps:$4 sm:$0xff]   ;;  %p8992_p4 = pnand %p8991_p3, %p8985_p0 }
 0x21b   :  { %5784 = vmatpush1.bf16.msra.mxu1 %v8502_v10  ;;  %v8585_v10 = vld [vmem:[%s11882_s1 + $0x1484] ss:$16 sps:$4 sm:$0xff]  }
 0x21c   :  { %5333 = vmatpush1.bf16.msra.mxu0 %v8499_v54  ;;  %5785 = vmatprep.subr.bf16.mxu1 %v8510_v57  ;;  %v8580_v54 = vld [vmem:[%s11882_s1 + $0x1068] ss:$16 sps:$4 sm:$0xff]   ;;  %v8583_v57 = vld [vmem:[%s11882_s1 + $0x1480] ss:$16 sps:$4 sm:$0xff]  }
 0x21d   :  { %5334 = vmatprep.subr.bf16.mxu0 %v8507_v55  ;;  %v8588_v55 = vld [vmem:[%s11882_s1 + $0x108c] ss:$16 sps:$4 sm:$0xff]  }
 0x21f   :  { %5786 = vmatpush1.bf16.msra.mxu1 %v8508_v59  ;;  %v8591_v59 = vld [vmem:[%s11882_s1 + $0x14a4] ss:$16 sps:$4 sm:$0xff]  }
 0x220   :  { %5335 = vmatpush1.bf16.msra.mxu0 %v8505_v58  ;;  %5787 = vmatprep.subr.bf16.mxu1 %v8516_v62  ;;  %v8586_v58 = vld [vmem:[%s11882_s1 + $0x1088] ss:$16 sps:$4 sm:$0xff]   ;;  %v8589_v62 = vld [vmem:[%s11882_s1 + $0x14a0] ss:$16 sps:$4 sm:$0xff]  }
 0x221   :  { %5336 = vmatprep.subr.bf16.mxu0 %v8513_v60  ;;  %v8594_v60 = vld [vmem:[%s11882_s1 + $0x10ac] ss:$16 sps:$4 sm:$0xff]  }
 0x223   :  { %5788 = vmatpush1.bf16.msra.mxu1 %v8514_v1  ;;  %v8597_v1 = vld [vmem:[%s11882_s1 + $0x14c4] ss:$16 sps:$4 sm:$0xff]  }
 0x224   :  { %5337 = vmatpush1.bf16.msra.mxu0 %v8511_v63  ;;  %5789 = vmatprep.subr.bf16.mxu1 %v8522_v2  ;;  %v8592_v63 = vld [vmem:[%s11882_s1 + $0x10a8] ss:$16 sps:$4 sm:$0xff]   ;;  %v8595_v2 = vld [vmem:[%s11882_s1 + $0x14c0] ss:$16 sps:$4 sm:$0xff]  }
 0x225   :  { %5338 = vmatprep.subr.bf16.mxu0 %v8519_v36  ;;  %v8600_v36 = vld [vmem:[%s11882_s1 + $0x10cc] ss:$16 sps:$4 sm:$0xff]  }
 0x227   :  { %5790 = vmatpush1.bf16.msra.mxu1 %v8520_v7  ;;  %v8603_v7 = vld [vmem:[%s11882_s1 + $0x14e4] ss:$16 sps:$4 sm:$0xff]  }
 0x228   :  { %5339 = vmatpush1.bf16.msra.mxu0 %v8517_v39  ;;  %5791 = vmatprep.subr.bf16.mxu1 %v8528_v9  ;;  %v8598_v39 = vld [vmem:[%s11882_s1 + $0x10c8] ss:$16 sps:$4 sm:$0xff]   ;;  %v8601_v9 = vld [vmem:[%s11882_s1 + $0x14e0] ss:$16 sps:$4 sm:$0xff]  }
 0x229   :  { %5340 = vmatprep.subr.bf16.mxu0 %v8525_v27  ;;  %v8606_v27 = vld [vmem:[%s11882_s1 + $0x10ec] ss:$16 sps:$4 sm:$0xff]  }
 0x22b   :  { %5792 = vmatpush1.bf16.msra.mxu1 %v8526_v45  ;;  %v8609_v45 = vld [vmem:[%s11882_s1 + $0x1504] ss:$16 sps:$4 sm:$0xff]  }
 0x22c   :  { %5341 = vmatpush1.bf16.msra.mxu0 %v8523_v13  ;;  %5793 = vmatprep.subr.bf16.mxu1 %v8534_v15  ;;  %v8604_v13 = vld [vmem:[%s11882_s1 + $0x10e8] ss:$16 sps:$4 sm:$0xff]   ;;  %v8607_v15 = vld [vmem:[%s11882_s1 + $0x1500] ss:$16 sps:$4 sm:$0xff]  }
 0x22d   :  { %5342 = vmatprep.subr.bf16.mxu0 %v8531_v14  ;;  %v8612_v14 = vld [vmem:[%s11882_s1 + $0x110c] ss:$16 sps:$4 sm:$0xff]  }
 0x22f   :  { %5794 = vmatpush1.bf16.msra.mxu1 %v8532_v17  ;;  %v8615_v17 = vld [vmem:[%s11882_s1 + $0x1524] ss:$16 sps:$4 sm:$0xff]  }
 0x230   :  { %5343 = vmatpush1.bf16.msra.mxu0 %v8529_v16  ;;  %5795 = vmatprep.subr.bf16.mxu1 %v8540_v20  ;;  %v8610_v16 = vld [vmem:[%s11882_s1 + $0x1108] ss:$16 sps:$4 sm:$0xff]   ;;  %v8613_v20 = vld [vmem:[%s11882_s1 + $0x1520] ss:$16 sps:$4 sm:$0xff]  }
 0x231   :  { %5344 = vmatprep.subr.bf16.mxu0 %v8537_v19  ;;  %v8618_v19 = vld [vmem:[%s11882_s1 + $0x112c] ss:$16 sps:$4 sm:$0xff]  }
 0x233   :  { %5796 = vmatpush1.bf16.msra.mxu1 %v8538_v25  ;;  %v8621_v25 = vld [vmem:[%s11882_s1 + $0x1544] ss:$16 sps:$4 sm:$0xff]  }
 0x234   :  { %5345 = vmatpush1.bf16.msra.mxu0 %v8535_v21  ;;  %5797 = vmatprep.subr.bf16.mxu1 %v8546_v28  ;;  %v8616_v21 = vld [vmem:[%s11882_s1 + $0x1128] ss:$16 sps:$4 sm:$0xff]   ;;  %v8619_v28 = vld [vmem:[%s11882_s1 + $0x1540] ss:$16 sps:$4 sm:$0xff]  }
 0x235   :  { %5346 = vmatprep.subr.bf16.mxu0 %v8543_v26  ;;  %v8624_v26 = vld [vmem:[%s11882_s1 + $0x114c] ss:$16 sps:$4 sm:$0xff]  }
 0x237   :  { %5798 = vmatpush1.bf16.msra.mxu1 %v8544_v29  ;;  %v8627_v29 = vld [vmem:[%s11882_s1 + $0x1564] ss:$16 sps:$4 sm:$0xff]  }
 0x238   :  { %5347 = vmatpush1.bf16.msra.mxu0 %v8541_v56  ;;  %5799 = vmatprep.subr.bf16.mxu1 %v8552_v61  ;;  %v8622_v56 = vld [vmem:[%s11882_s1 + $0x1148] ss:$16 sps:$4 sm:$0xff]   ;;  %v8625_v61 = vld [vmem:[%s11882_s1 + $0x1560] ss:$16 sps:$4 sm:$0xff]  }
 0x239   :  { %5348 = vmatprep.subr.bf16.mxu0 %v8549_v31  ;;  %v8630_v31 = vld [vmem:[%s11882_s1 + $0x116c] ss:$16 sps:$4 sm:$0xff]  }
 0x23b   :  { %5800 = vmatpush1.bf16.msra.mxu1 %v8550_v11  ;;  %v8636_v11 = vld [vmem:[%s11882_s1 + $0x118c] ss:$16 sps:$4 sm:$0xff]  }
 0x23c   :  { %5349 = vmatpush1.bf16.msra.mxu0 %v8547_v12  ;;  %5801 = vmatprep.subr.bf16.mxu1 %v8558_v6  ;;  %v8633_v12 = vld [vmem:[%s11882_s1 + $0x1584] ss:$16 sps:$4 sm:$0xff]   ;;  %v8634_v6 = vld [vmem:[%s11882_s1 + $0x1188] ss:$16 sps:$4 sm:$0xff]  }
 0x23d   :  { %5350 = vmatprep.subr.bf16.mxu0 %v8555_v35  ;;  %v8631_v35 = vld [vmem:[%s11882_s1 + $0x1580] ss:$16 sps:$4 sm:$0xff]  }
 0x23f   :  { %5802 = vmatpush1.bf16.msra.mxu1 %v8556_v3  ;;  %v8642_v3 = vld [vmem:[%s11882_s1 + $0x11ac] ss:$16 sps:$4 sm:$0xff]  }
 0x240   :  { %5351 = vmatpush1.bf16.msra.mxu0 %v8553_v37  ;;  %5812 = vmatprep.subr.bf16.mxu1 %v8564_v40  ;;  %v8639_v37 = vld [vmem:[%s11882_s1 + $0x15a4] ss:$16 sps:$4 sm:$0xff]   ;;  %v8640_v40 = vld [vmem:[%s11882_s1 + $0x11a8] ss:$16 sps:$4 sm:$0xff]  }
 0x241   :  { %5361 = vmatprep.subr.bf16.mxu0 %v8561_v38  ;;  %v8637_v38 = vld [vmem:[%s11882_s1 + $0x15a0] ss:$16 sps:$4 sm:$0xff]  }
 0x242   :  { %5804 = vmatmul.mubr.bf16.vlgmr.msra.gmra.mrb[4].mxu1 %v10525_v30  ;;  %v8576_v30 = vld [vmem:[%s11882_s1 + $0x104c] ss:$16 sps:$4 sm:$0xff]  }
 0x243   :  { %5353 = vmatmul.mubr.bf16.vlgmr.msra.gmra.mrb[0].mxu0 %v10939_v8  ;;  %5813 = vmatpush1.bf16.msra.mxu1 %v8562_v18  ;;  %v8643_v18 = vld [vmem:[%s11882_s1 + $0x15c0] ss:$16 sps:$4 sm:$0xff]  }
 0x244   :  { %5362 = vmatpush1.bf16.msra.mxu0 %v8559_v43  ;;  %5814 = vmatprep.subr.bf16.mxu1 %v8570_v46  ;;  %v8648_v43 = vld [vmem:[%s11882_s1 + $0x11cc] ss:$16 sps:$4 sm:$0xff]   ;;  %v8651_v46 = vld [vmem:[%s11882_s1 + $0x15e4] ss:$16 sps:$4 sm:$0xff]  }
 0x245   :  { %5363 = vmatprep.subr.bf16.mxu0 %v8567_v44  ;;  %5393 = vmatprep.mubr.bf16.mxu0 %v10954_v22  ;;  %v8646_v44 = vld [vmem:[%s11882_s1 + $0x11c8] ss:$16 sps:$4 sm:$0xff]  }
 0x246   :  { %5844 = vmatprep.mubr.bf16.mxu1 %v10540_v23  ;;  %v8582_v23 = vld [vmem:[%s11882_s1 + $0x106c] ss:$16 sps:$4 sm:$0xff]  }
 0x247   :  { %5815 = vmatpush1.bf16.msra.mxu1 %v8568_v48  ;;  %v8649_v48 = vld [vmem:[%s11882_s1 + $0x15e0] ss:$16 sps:$4 sm:$0xff]  }
 0x248   :  { %5364 = vmatpush1.bf16.msra.mxu0 %v8565_v47  ;;  %5816 = vmatprep.subr.bf16.mxu1 %v8576_v30  ;;  %v8654_v47 = vld [vmem:[%s11882_s1 + $0x11ec] ss:$16 sps:$4 sm:$0xff]   ;;  %v8658_v30 = vld [vmem:[%s11882_s1 + $0x1604] ss:$16 sps:$4 sm:$0xff]  }
 0x249   :  { %5365 = vmatprep.subr.bf16.mxu0 %v8573_v50  ;;  %v8652_v50 = vld [vmem:[%s11882_s1 + $0x11e8] ss:$16 sps:$4 sm:$0xff]  }
 0x24b   :  { %5817 = vmatpush1.bf16.msra.mxu1 %v8574_v24  ;;  %v11142_v24 = vrot.slane %v10921_v0, %v9186_v49  ;;  %v8667_v0 = vld [vmem:[%s11882_s1 + $0x122c] ss:$16 sps:$4 sm:$0xff]  }
 0x24c   :  { %5366 = vmatpush1.bf16.msra.mxu0 %v8571_v51  ;;  %5818 = vmatprep.subr.bf16.mxu1 %v8582_v23  ;;  %v8661_v51 = vld [vmem:[%s11882_s1 + $0x120c] ss:$16 sps:$4 sm:$0xff]   ;;  %v8659_v23 = vld [vmem:[%s11882_s1 + $0x1208] ss:$16 sps:$4 sm:$0xff]  }
 0x24d   :  { %5367 = vmatprep.subr.bf16.mxu0 %v8579_v52  ;;  %v8656_v52 = vld [vmem:[%s11882_s1 + $0x1600] ss:$16 sps:$4 sm:$0xff]  }
 0x24f   :  { %5819 = vmatpush1.bf16.msra.mxu1 %v8580_v54  ;;  %v11158_v54 = vcombine.high %v10954_v22, %v10954_v22 }
 0x250   :  { %5368 = vmatpush1.bf16.msra.mxu0 %v8577_v53  ;;  %5820 = vmatprep.subr.bf16.mxu1 %v8588_v55  ;;  %v8664_v53 = vld [vmem:[%s11882_s1 + $0x1624] ss:$16 sps:$4 sm:$0xff]   ;;  %v8665_v55 = vld [vmem:[%s11882_s1 + $0x1228] ss:$16 sps:$4 sm:$0xff]  }
 0x251   :  { %5369 = vmatprep.subr.bf16.mxu0 %v8585_v10  ;;  %v8662_v10 = vld [vmem:[%s11882_s1 + $0x1620] ss:$16 sps:$4 sm:$0xff]  }
 0x253   :  { %5821 = vmatpush1.bf16.msra.mxu1 %v8586_v58  ;;  %v8668_v58 = vld [vmem:[%s11882_s1 + $0x1640] ss:$16 sps:$4 sm:$0xff]  }
 0x254   :  { %5370 = vmatpush1.bf16.msra.mxu0 %v8583_v57  ;;  %5822 = vmatprep.subr.bf16.mxu1 %v8594_v60  ;;  %v8670_v57 = vld [vmem:[%s11882_s1 + $0x1644] ss:$16 sps:$4 sm:$0xff]  }
 0x255   :  { %5371 = vmatprep.subr.bf16.mxu0 %v8591_v59  ;;  %v8671_v59 = vld [vmem:[%s11882_s1 + $0x1248] ss:$16 sps:$4 sm:$0xff]   ;;  %v8676_v60 = vld [vmem:[%s11882_s1 + $0x1664] ss:$16 sps:$4 sm:$0xff]  }
 0x257   :  { %5823 = vmatpush1.bf16.msra.mxu1 %v8592_v63  ;;  %v8677_v63 = vld [vmem:[%s11882_s1 + $0x1268] ss:$16 sps:$4 sm:$0xff]  }
 0x258   :  { %5372 = vmatpush1.bf16.msra.mxu0 %v8589_v62  ;;  %5824 = vmatprep.subr.bf16.mxu1 %v8600_v36  ;;  %v8674_v62 = vld [vmem:[%s11882_s1 + $0x1660] ss:$16 sps:$4 sm:$0xff]   ;;  %v8685_v36 = vld [vmem:[%s11882_s1 + $0x128c] ss:$16 sps:$4 sm:$0xff]  }
 0x259   :  { %5373 = vmatprep.subr.bf16.mxu0 %v8597_v1  ;;  %v8682_v1 = vld [vmem:[%s11882_s1 + $0x1684] ss:$16 sps:$4 sm:$0xff]  }
 0x25b   :  { %5825 = vmatpush1.bf16.msra.mxu1 %v8598_v39  ;;  %v8683_v39 = vld [vmem:[%s11882_s1 + $0x1288] ss:$16 sps:$4 sm:$0xff]  }
 0x25c   :  { %5374 = vmatpush1.bf16.msra.mxu0 %v8595_v2  ;;  %5826 = vmatprep.subr.bf16.mxu1 %v8606_v27  ;;  %v8680_v2 = vld [vmem:[%s11882_s1 + $0x1680] ss:$16 sps:$4 sm:$0xff]   ;;  %v8691_v27 = vld [vmem:[%s11882_s1 + $0x12ac] ss:$16 sps:$4 sm:$0xff]  }
 0x25d   :  { %5375 = vmatprep.subr.bf16.mxu0 %v8603_v7  ;;  %v8688_v7 = vld [vmem:[%s11882_s1 + $0x16a4] ss:$16 sps:$4 sm:$0xff]  }
 0x25f   :  { %5827 = vmatpush1.bf16.msra.mxu1 %v8604_v13  ;;  %v8689_v13 = vld [vmem:[%s11882_s1 + $0x12a8] ss:$16 sps:$4 sm:$0xff]  }
 0x260   :  { %5376 = vmatpush1.bf16.msra.mxu0 %v8601_v9  ;;  %5828 = vmatprep.subr.bf16.mxu1 %v8612_v14  ;;  %v8686_v9 = vld [vmem:[%s11882_s1 + $0x16a0] ss:$16 sps:$4 sm:$0xff]   ;;  %v8697_v14 = vld [vmem:[%s11882_s1 + $0x12cc] ss:$16 sps:$4 sm:$0xff]  }
 0x261   :  { %5377 = vmatprep.subr.bf16.mxu0 %v8609_v45  ;;  %v8694_v45 = vld [vmem:[%s11882_s1 + $0x16c4] ss:$16 sps:$4 sm:$0xff]  }
 0x263   :  { %5829 = vmatpush1.bf16.msra.mxu1 %v8610_v16  ;;  %v8695_v16 = vld [vmem:[%s11882_s1 + $0x12c8] ss:$16 sps:$4 sm:$0xff]  }
 0x264   :  { %5378 = vmatpush1.bf16.msra.mxu0 %v8607_v15  ;;  %5830 = vmatprep.subr.bf16.mxu1 %v8618_v19  ;;  %v8692_v15 = vld [vmem:[%s11882_s1 + $0x16c0] ss:$16 sps:$4 sm:$0xff]   ;;  %v8703_v19 = vld [vmem:[%s11882_s1 + $0x12ec] ss:$16 sps:$4 sm:$0xff]  }
 0x265   :  { %5379 = vmatprep.subr.bf16.mxu0 %v8615_v17  ;;  %v8700_v17 = vld [vmem:[%s11882_s1 + $0x16e4] ss:$16 sps:$4 sm:$0xff]  }
 0x267   :  { %5831 = vmatpush1.bf16.msra.mxu1 %v8616_v21  ;;  %v8701_v21 = vld [vmem:[%s11882_s1 + $0x12e8] ss:$16 sps:$4 sm:$0xff]  }
 0x268   :  { %5380 = vmatpush1.bf16.msra.mxu0 %v8613_v20  ;;  %5832 = vmatprep.subr.bf16.mxu1 %v8624_v26  ;;  %v8698_v20 = vld [vmem:[%s11882_s1 + $0x16e0] ss:$16 sps:$4 sm:$0xff]   ;;  %v8709_v26 = vld [vmem:[%s11882_s1 + $0x130c] ss:$16 sps:$4 sm:$0xff]  }
 0x269   :  { %5381 = vmatprep.subr.bf16.mxu0 %v8621_v25  ;;  %v8706_v25 = vld [vmem:[%s11882_s1 + $0x1704] ss:$16 sps:$4 sm:$0xff]  }
 0x26b   :  { %5833 = vmatpush1.bf16.msra.mxu1 %v8622_v56  ;;  %v8707_v56 = vld [vmem:[%s11882_s1 + $0x1308] ss:$16 sps:$4 sm:$0xff]  }
 0x26c   :  { %5382 = vmatpush1.bf16.msra.mxu0 %v8619_v28  ;;  %5834 = vmatprep.subr.bf16.mxu1 %v8630_v31  ;;  %v8704_v28 = vld [vmem:[%s11882_s1 + $0x1700] ss:$16 sps:$4 sm:$0xff]   ;;  %v8715_v31 = vld [vmem:[%s11882_s1 + $0x132c] ss:$16 sps:$4 sm:$0xff]  }
 0x26d   :  { %5383 = vmatprep.subr.bf16.mxu0 %v8627_v29  ;;  %v8712_v29 = vld [vmem:[%s11882_s1 + $0x1724] ss:$16 sps:$4 sm:$0xff]  }
 0x26f   :  { %5835 = vmatpush1.bf16.msra.mxu1 %v8628_v33  ;;  %v8713_v33 = vld [vmem:[%s11882_s1 + $0x1328] ss:$16 sps:$4 sm:$0xff]  }
 0x270   :  { %5384 = vmatpush1.bf16.msra.mxu0 %v8625_v61  ;;  %5836 = vmatprep.subr.bf16.mxu1 %v8636_v11  ;;  %v8710_v61 = vld [vmem:[%s11882_s1 + $0x1720] ss:$16 sps:$4 sm:$0xff]   ;;  %v8721_v11 = vld [vmem:[%s11882_s1 + $0x134c] ss:$16 sps:$4 sm:$0xff]  }
 0x271   :  { %5385 = vmatprep.subr.bf16.mxu0 %v8633_v12  ;;  %v8718_v12 = vld [vmem:[%s11882_s1 + $0x1744] ss:$16 sps:$4 sm:$0xff]  }
 0x273   :  { %5837 = vmatpush1.bf16.msra.mxu1 %v8634_v6  ;;  %v8719_v6 = vld [vmem:[%s11882_s1 + $0x1348] ss:$16 sps:$4 sm:$0xff]  }
 0x274   :  { %5386 = vmatpush1.bf16.msra.mxu0 %v8631_v35  ;;  %5838 = vmatprep.subr.bf16.mxu1 %v8642_v3  ;;  %v8716_v35 = vld [vmem:[%s11882_s1 + $0x1740] ss:$16 sps:$4 sm:$0xff]   ;;  %v8727_v3 = vld [vmem:[%s11882_s1 + $0x136c] ss:$16 sps:$4 sm:$0xff]  }
 0x275   :  { %5387 = vmatprep.subr.bf16.mxu0 %v8639_v37  ;;  %v8724_v37 = vld [vmem:[%s11882_s1 + $0x1764] ss:$16 sps:$4 sm:$0xff]  }
 0x277   :  { %5839 = vmatpush1.bf16.msra.mxu1 %v8640_v40  ;;  %v8725_v40 = vld [vmem:[%s11882_s1 + $0x1368] ss:$16 sps:$4 sm:$0xff]  }
 0x278   :  { %5388 = vmatpush1.bf16.msra.mxu0 %v8637_v38  ;;  %5840 = vmatprep.subr.bf16.mxu1 %v8648_v43  ;;  %v8722_v38 = vld [vmem:[%s11882_s1 + $0x1760] ss:$16 sps:$4 sm:$0xff]   ;;  %v8733_v43 = vld [vmem:[%s11882_s1 + $0x138c] ss:$16 sps:$4 sm:$0xff]  }
 0x279   :  { %5389 = vmatprep.subr.bf16.mxu0 %v8645_v41  ;;  %v8730_v41 = vld [vmem:[%s11882_s1 + $0x1784] ss:$16 sps:$4 sm:$0xff]  }
 0x27b   :  { %5841 = vmatpush1.bf16.msra.mxu1 %v8646_v44  ;;  %v8731_v44 = vld [vmem:[%s11882_s1 + $0x1388] ss:$16 sps:$4 sm:$0xff]  }
 0x27c   :  { %5390 = vmatpush1.bf16.msra.mxu0 %v8643_v18  ;;  %5842 = vmatprep.subr.bf16.mxu1 %v8654_v47  ;;  %v8728_v18 = vld [vmem:[%s11882_s1 + $0x1780] ss:$16 sps:$4 sm:$0xff]   ;;  %v8739_v47 = vld [vmem:[%s11882_s1 + $0x13ac] ss:$16 sps:$4 sm:$0xff]  }
 0x27d   :  { %5391 = vmatprep.subr.bf16.mxu0 %v8651_v46  ;;  %v8736_v46 = vld [vmem:[%s11882_s1 + $0x17a4] ss:$16 sps:$4 sm:$0xff]  }
 0x27f   :  { %5843 = vmatpush1.bf16.msra.mxu1 %v8652_v50  ;;  %v8737_v50 = vld [vmem:[%s11882_s1 + $0x13a8] ss:$16 sps:$4 sm:$0xff]  }
 0x280   :  { %5392 = vmatpush1.bf16.msra.mxu0 %v8649_v48  ;;  %5853 = vmatprep.subr.bf16.mxu1 %v8661_v51  ;;  %v8734_v48 = vld [vmem:[%s11882_s1 + $0x17a0] ss:$16 sps:$4 sm:$0xff]   ;;  %v8745_v51 = vld [vmem:[%s11882_s1 + $0x13cc] ss:$16 sps:$4 sm:$0xff]  }
 0x281   :  { %5402 = vmatprep.subr.bf16.mxu0 %v8658_v30  ;;  %v8742_v30 = vld [vmem:[%s11882_s1 + $0x17c4] ss:$16 sps:$4 sm:$0xff]  }
 0x282   :  { %5845 = vmatmul.mubr.bf16.vlgmr.msra.gmra.mrb[4].mxu1 %v10728_v32  ;;  %v8673_v32 = vld [vmem:[%s11882_s1 + $0x124c] ss:$16 sps:$4 sm:$0xff]  }
 0x283   :  { %5394 = vmatmul.mubr.bf16.vlgmr.msra.gmra.mrb[0].mxu0 %v11142_v24  ;;  %5854 = vmatpush1.bf16.msra.mxu1 %v8659_v23  ;;  %v8743_v23 = vld [vmem:[%s11882_s1 + $0x13c8] ss:$16 sps:$4 sm:$0xff]  }
 0x284   :  { %5403 = vmatpush1.bf16.msra.mxu0 %v8656_v52  ;;  %5855 = vmatprep.subr.bf16.mxu1 %v8667_v0  ;;  %v8740_v52 = vld [vmem:[%s11882_s1 + $0x17c0] ss:$16 sps:$4 sm:$0xff]   ;;  %v8751_v0 = vld [vmem:[%s11882_s1 + $0x13ec] ss:$16 sps:$4 sm:$0xff]  }
 0x285   :  { %5404 = vmatprep.subr.bf16.mxu0 %v8664_v53  ;;  %5434 = vmatprep.mubr.bf16.mxu0 %v11158_v54  ;;  %v8748_v53 = vld [vmem:[%s11882_s1 + $0x17e4] ss:$16 sps:$4 sm:$0xff]  }
 0x286   :  { %5885 = vmatprep.mubr.bf16.mxu1 %v10744_v34  ;;  %v8679_v34 = vld [vmem:[%s11882_s1 + $0x126c] ss:$16 sps:$4 sm:$0xff]  }
 0x287   :  { %5856 = vmatpush1.bf16.msra.mxu1 %v8665_v55  ;;  %v8749_v55 = vld [vmem:[%s11882_s1 + $0x13e8] ss:$16 sps:$4 sm:$0xff]  }
 0x288   :  { %5405 = vmatpush1.bf16.msra.mxu0 %v8662_v10  ;;  %5857 = vmatprep.subr.bf16.mxu1 %v8673_v32  ;;  %v8746_v10 = vld [vmem:[%s11882_s1 + $0x17e0] ss:$16 sps:$4 sm:$0xff]   ;;  %v8757_v32 = vld [vmem:[%s11882_s1 + $0x140c] ss:$16 sps:$4 sm:$0xff]  }
 0x289   :  { %5406 = vmatprep.subr.bf16.mxu0 %v8670_v57  ;;  %v8754_v57 = vld [vmem:[%s11882_s1 + $0x1804] ss:$16 sps:$4 sm:$0xff]  }
 0x28b   :  { %5858 = vmatpush1.bf16.msra.mxu1 %v8671_v59  ;;  %v8752_v59 = vld [vmem:[%s11882_s1 + $0x1800] ss:$16 sps:$4 sm:$0xff]  }
 0x28c   :  { %5407 = vmatpush1.bf16.msra.mxu0 %v8668_v58  ;;  %5859 = vmatprep.subr.bf16.mxu1 %v8679_v34  ;;  %v11346_v58 = vcombine.high %v11142_v24, %v11142_v24  ;;  %v8760_v34 = vld [vmem:[%s11882_s1 + $0x1824] ss:$16 sps:$4 sm:$0xff]  }
 0x28d   :  { %5408 = vmatprep.subr.bf16.mxu0 %v8676_v60  ;;  %v8755_v60 = vld [vmem:[%s11882_s1 + $0x1408] ss:$16 sps:$4 sm:$0xff]  }
 0x28f   :  { %5860 = vmatpush1.bf16.msra.mxu1 %v8677_v63  ;;  %v8758_v63 = vld [vmem:[%s11882_s1 + $0x1820] ss:$16 sps:$4 sm:$0xff]  }
 0x290   :  { %5409 = vmatpush1.bf16.msra.mxu0 %v8674_v62  ;;  %5861 = vmatprep.subr.bf16.mxu1 %v8685_v36  ;;  %v8763_v62 = vld [vmem:[%s11882_s1 + $0x142c] ss:$16 sps:$4 sm:$0xff]   ;;  %v8766_v36 = vld [vmem:[%s11882_s1 + $0x1844] ss:$16 sps:$4 sm:$0xff]  }
 0x291   :  { %5410 = vmatprep.subr.bf16.mxu0 %v8682_v1  ;;  %v8761_v1 = vld [vmem:[%s11882_s1 + $0x1428] ss:$16 sps:$4 sm:$0xff]  }
 0x293   :  { %5862 = vmatpush1.bf16.msra.mxu1 %v8683_v39  ;;  %v8764_v39 = vld [vmem:[%s11882_s1 + $0x1840] ss:$16 sps:$4 sm:$0xff]  }
 0x294   :  { %5411 = vmatpush1.bf16.msra.mxu0 %v8680_v2  ;;  %5863 = vmatprep.subr.bf16.mxu1 %v8691_v27  ;;  %v9009_v2 = vmov 0   ;;  %v8772_v27 = vld [vmem:[%s11882_s1 + $0x1864] ss:$16 sps:$4 sm:$0xff]  }
 0x295   :  { %5412 = vmatprep.subr.bf16.mxu0 %v8688_v7  ;;  %v8767_v7 = vld [vmem:[%s11882_s1 + $0x1448] ss:$16 sps:$4 sm:$0xff]  }
 0x297   :  { %5864 = vmatpush1.bf16.msra.mxu1 %v8689_v13  ;;  %v8773_v13 = vld [vmem:[%s11882_s1 + $0x1468] ss:$16 sps:$4 sm:$0xff]  }
 0x298   :  { %5413 = vmatpush1.bf16.msra.mxu0 %v8686_v9  ;;  %5865 = vmatprep.subr.bf16.mxu1 %v8697_v14  ;;  %v8770_v9 = vld [vmem:[%s11882_s1 + $0x1860] ss:$16 sps:$4 sm:$0xff]   ;;  %v8778_v14 = vld [vmem:[%s11882_s1 + $0x148c] ss:$16 sps:$4 sm:$0xff]  }
 0x299   :  { %5414 = vmatprep.subr.bf16.mxu0 %v8694_v45  ;;  %v6698_v45 = vld.sshfl [vmem:[%s11881_s0 + $0x18] sm:$0x1 pattern:$0x75316420] }
 0x29b   :  { %5866 = vmatpush1.bf16.msra.mxu1 %v8695_v16  ;;  %v1002_v16 = vrot.slane %v6698_v45, %v9186_v49  ;;  %v8856_v49 = vld [vmem:[%s11882_s1 + $0x182c] ss:$16 sps:$4 sm:$0xff]   ;;  %v8899_v45 = vld [vmem:[%s11884_s3 + $0x90] ss:$8 sps:$4 sm:$0xff]  }
 0x29c   :  { %5415 = vmatpush1.bf16.msra.mxu0 %v8692_v15  ;;  %5867 = vmatprep.subr.bf16.mxu1 %v8703_v19  ;;  %v8850_v15 = vld [vmem:[%s11882_s1 + $0x180c] ss:$16 sps:$4 sm:$0xff]   ;;  %v8848_v19 = vld [vmem:[%s11882_s1 + $0x1808] ss:$16 sps:$4 sm:$0xff]  }
 0x29d   :  { %5416 = vmatprep.subr.bf16.mxu0 %v8700_v17  ;;  %v8776_v17 = vld [vmem:[%s11882_s1 + $0x1488] ss:$16 sps:$4 sm:$0xff]  }
 0x29f   :  { %5868 = vmatpush1.bf16.msra.mxu1 %v8701_v21  ;;  %v8779_v21 = vld [vmem:[%s11882_s1 + $0x14a8] ss:$16 sps:$4 sm:$0xff]  }
 0x2a0   :  { %5417 = vmatpush1.bf16.msra.mxu0 %v8698_v20  ;;  %5869 = vmatprep.subr.bf16.mxu1 %v8709_v26  ;;  %v8781_v20 = vld [vmem:[%s11882_s1 + $0x14ac] ss:$16 sps:$4 sm:$0xff]  }
 0x2a1   :  { %5418 = vmatprep.subr.bf16.mxu0 %v8706_v25  ;;  %v8854_v25 = vld [vmem:[%s11882_s1 + $0x1828] ss:$16 sps:$4 sm:$0xff]   ;;  %v8784_v26 = vld [vmem:[%s11882_s1 + $0x14cc] ss:$16 sps:$4 sm:$0xff]  }
 0x2a3   :  { %5870 = vmatpush1.bf16.msra.mxu1 %v8707_v56  ;;  %v8782_v56 = vld [vmem:[%s11882_s1 + $0x14c8] ss:$16 sps:$4 sm:$0xff]  }
 0x2a4   :  { %5419 = vmatpush1.bf16.msra.mxu0 %v8704_v28  ;;  %5871 = vmatprep.subr.bf16.mxu1 %v8715_v31  ;;  %v8862_v28 = vld [vmem:[%s11882_s1 + $0x184c] ss:$16 sps:$4 sm:$0xff]  }
 0x2a5   :  { %5420 = vmatprep.subr.bf16.mxu0 %v8712_v29  ;;  %v8860_v29 = vld [vmem:[%s11882_s1 + $0x1848] ss:$16 sps:$4 sm:$0xff]   ;;  %v8787_v31 = vld [vmem:[%s11882_s1 + $0x14ec] ss:$16 sps:$4 sm:$0xff]  }
 0x2a7   :  { %5872 = vmatpush1.bf16.msra.mxu1 %v8713_v33  ;;  %v8785_v33 = vld [vmem:[%s11882_s1 + $0x14e8] ss:$16 sps:$4 sm:$0xff]  }
 0x2a8   :  { %5421 = vmatpush1.bf16.msra.mxu0 %v8710_v61  ;;  %5873 = vmatprep.subr.bf16.mxu1 %v8721_v11  ;;  %v8868_v61 = vld [vmem:[%s11882_s1 + $0x186c] ss:$16 sps:$4 sm:$0xff]  }
 0x2a9   :  { %5422 = vmatprep.subr.bf16.mxu0 %v8718_v12  ;;  %v8866_v12 = vld [vmem:[%s11882_s1 + $0x1868] ss:$16 sps:$4 sm:$0xff]   ;;  %v8790_v11 = vld [vmem:[%s11882_s1 + $0x150c] ss:$16 sps:$4 sm:$0xff]  }
 0x2ab   :  { %5874 = vmatpush1.bf16.msra.mxu1 %v8719_v6  ;;  %v8788_v6 = vld [vmem:[%s11882_s1 + $0x1508] ss:$16 sps:$4 sm:$0xff]  }
 0x2ac   :  { %5423 = vmatpush1.bf16.msra.mxu0 %v8716_v35  ;;  %5875 = vmatprep.subr.bf16.mxu1 %v8727_v3  ;;  %v8874_v35 = vld [vmem:[%s11884_s3 + $0x4] ss:$8 sps:$4 sm:$0xff]  }
 0x2ad   :  { %5424 = vmatprep.subr.bf16.mxu0 %v8724_v37  ;;  %v8872_v37 = vld [vmem:[%s11884_s3] ss:$8 sps:$4 sm:$0xff]   ;;  %v8793_v3 = vld [vmem:[%s11882_s1 + $0x152c] ss:$16 sps:$4 sm:$0xff]  }
 0x2af   :  { %5876 = vmatpush1.bf16.msra.mxu1 %v8725_v40  ;;  %v8791_v40 = vld [vmem:[%s11882_s1 + $0x1528] ss:$16 sps:$4 sm:$0xff]  }
 0x2b0   :  { %5425 = vmatpush1.bf16.msra.mxu0 %v8722_v38  ;;  %5877 = vmatprep.subr.bf16.mxu1 %v8733_v43  ;;  %v8877_v38 = vld [vmem:[%s11884_s3 + $0x14] ss:$8 sps:$4 sm:$0xff]  }
 0x2b1   :  { %5426 = vmatprep.subr.bf16.mxu0 %v8730_v41  ;;  %v8875_v41 = vld [vmem:[%s11884_s3 + $0x10] ss:$8 sps:$4 sm:$0xff]   ;;  %v8796_v43 = vld [vmem:[%s11882_s1 + $0x154c] ss:$16 sps:$4 sm:$0xff]  }
 0x2b3   :  { %5878 = vmatpush1.bf16.msra.mxu1 %v8731_v44  ;;  %v8794_v44 = vld [vmem:[%s11882_s1 + $0x1548] ss:$16 sps:$4 sm:$0xff]  }
 0x2b4   :  { %5427 = vmatpush1.bf16.msra.mxu0 %v8728_v18  ;;  %5879 = vmatprep.subr.bf16.mxu1 %v8739_v47  ;;  %v8880_v18 = vld [vmem:[%s11884_s3 + $0x24] ss:$8 sps:$4 sm:$0xff]  }
 0x2b5   :  { %5428 = vmatprep.subr.bf16.mxu0 %v8736_v46  ;;  %v8878_v46 = vld [vmem:[%s11884_s3 + $0x20] ss:$8 sps:$4 sm:$0xff]   ;;  %v8799_v47 = vld [vmem:[%s11882_s1 + $0x156c] ss:$16 sps:$4 sm:$0xff]  }
 0x2b7   :  { %5880 = vmatpush1.bf16.msra.mxu1 %v8737_v50  ;;  %v8797_v50 = vld [vmem:[%s11882_s1 + $0x1568] ss:$16 sps:$4 sm:$0xff]  }
 0x2b8   :  { %5429 = vmatpush1.bf16.msra.mxu0 %v8734_v48  ;;  %5881 = vmatprep.subr.bf16.mxu1 %v8745_v51  ;;  %v8883_v48 = vld [vmem:[%s11884_s3 + $0x34] ss:$8 sps:$4 sm:$0xff]  }
 0x2b9   :  { %5430 = vmatprep.subr.bf16.mxu0 %v8742_v30  ;;  %v8881_v30 = vld [vmem:[%s11884_s3 + $0x30] ss:$8 sps:$4 sm:$0xff]   ;;  %v8802_v51 = vld [vmem:[%s11882_s1 + $0x158c] ss:$16 sps:$4 sm:$0xff]  }
 0x2bb   :  { %5882 = vmatpush1.bf16.msra.mxu1 %v8743_v23  ;;  %v8800_v23 = vld [vmem:[%s11882_s1 + $0x1588] ss:$16 sps:$4 sm:$0xff]  }
 0x2bc   :  { %5431 = vmatpush1.bf16.msra.mxu0 %v8740_v52  ;;  %5883 = vmatprep.subr.bf16.mxu1 %v8751_v0  ;;  %v8886_v52 = vld [vmem:[%s11884_s3 + $0x44] ss:$8 sps:$4 sm:$0xff]  }
 0x2bd   :  { %5432 = vmatprep.subr.bf16.mxu0 %v8748_v53  ;;  %v8884_v53 = vld [vmem:[%s11884_s3 + $0x40] ss:$8 sps:$4 sm:$0xff]   ;;  %v8805_v0 = vld [vmem:[%s11882_s1 + $0x15ac] ss:$16 sps:$4 sm:$0xff]  }
 0x2bf   :  { %5884 = vmatpush1.bf16.msra.mxu1 %v8749_v55  ;;  %v8803_v55 = vld [vmem:[%s11882_s1 + $0x15a8] ss:$16 sps:$4 sm:$0xff]  }
 0x2c0   :  { %5433 = vmatpush1.bf16.msra.mxu0 %v8746_v10  ;;  %5894 = vmatprep.subr.bf16.mxu1 %v8757_v32  ;;  %v8889_v10 = vld [vmem:[%s11884_s3 + $0x54] ss:$8 sps:$4 sm:$0xff]  }
 0x2c1   :  { %5443 = vmatprep.subr.bf16.mxu0 %v8754_v57  ;;  %v8887_v57 = vld [vmem:[%s11884_s3 + $0x50] ss:$8 sps:$4 sm:$0xff]   ;;  %v8808_v32 = vld [vmem:[%s11882_s1 + $0x15cc] ss:$16 sps:$4 sm:$0xff]  }
 0x2c2   :  { %5886 = vmatmul.mubr.bf16.vlgmr.msra.gmra.mrb[4].mxu1 %v10939_v8  ;;  %v8769_v8 = vld [vmem:[%s11882_s1 + $0x144c] ss:$16 sps:$4 sm:$0xff]  }
 0x2c3   :  { %5435 = vmatmul.mubr.bf16.vlgmr.msra.gmra.mrb[0].mxu0 %v11346_v58  ;;  %5895 = vmatpush1.bf16.msra.mxu1 %v8755_v60  ;;  %v8806_v60 = vld [vmem:[%s11882_s1 + $0x15c8] ss:$16 sps:$4 sm:$0xff]  }
 0x2c4   :  { %5444 = vmatpush1.bf16.msra.mxu0 %v8752_v59  ;;  %5896 = vmatprep.subr.bf16.mxu1 %v8763_v62  ;;  %v8892_v59 = vld [vmem:[%s11884_s3 + $0x64] ss:$8 sps:$4 sm:$0xff]  }
 0x2c5   :  { %5445 = vmatprep.subr.bf16.mxu0 %v8760_v34  ;;  %5475 = vmatprep.mubr.bf16.mxu0 %v9009_v2  ;;  %v8890_v34 = vld [vmem:[%s11884_s3 + $0x60] ss:$8 sps:$4 sm:$0xff]   ;;  %v8811_v62 = vld [vmem:[%s11882_s1 + $0x15ec] ss:$16 sps:$4 sm:$0xff]  }
 0x2c6   :  { %5926 = vmatprep.mubr.bf16.mxu1 %v10954_v22  ;;  %v8775_v22 = vld [vmem:[%s11882_s1 + $0x146c] ss:$16 sps:$4 sm:$0xff]  }
 0x2c7   :  { %5897 = vmatpush1.bf16.msra.mxu1 %v8761_v1  ;;  %v8809_v1 = vld [vmem:[%s11882_s1 + $0x15e8] ss:$16 sps:$4 sm:$0xff]  }
 0x2c8   :  { %5446 = vmatpush1.bf16.msra.mxu0 %v8758_v63  ;;  %5898 = vmatprep.subr.bf16.mxu1 %v8769_v8  ;;  %v8895_v63 = vld [vmem:[%s11884_s3 + $0x74] ss:$8 sps:$4 sm:$0xff]  }
 0x2c9   :  { %5447 = vmatprep.subr.bf16.mxu0 %v8766_v36  ;;  %v8893_v36 = vld [vmem:[%s11884_s3 + $0x70] ss:$8 sps:$4 sm:$0xff]   ;;  %v8814_v8 = vld [vmem:[%s11882_s1 + $0x160c] ss:$16 sps:$4 sm:$0xff]  }
 0x2cb   :  { %5899 = vmatpush1.bf16.msra.mxu1 %v8767_v7  ;;  %v8817_v7 = vld [vmem:[%s11882_s1 + $0x162c] ss:$16 sps:$4 sm:$0xff]  }
 0x2cc   :  { %5448 = vmatpush1.bf16.msra.mxu0 %v8764_v39  ;;  %5900 = vmatprep.subr.bf16.mxu1 %v8775_v22  ;;  %v8812_v39 = vld [vmem:[%s11882_s1 + $0x1608] ss:$16 sps:$4 sm:$0xff]   ;;  %v8901_v22 = vld [vmem:[%s11884_s3 + $0x94] ss:$8 sps:$4 sm:$0xff]  }
 0x2cd   :  { %5449 = vmatprep.subr.bf16.mxu0 %v8772_v27  ;;  %v8896_v27 = vld [vmem:[%s11884_s3 + $0x80] ss:$8 sps:$4 sm:$0xff]  }
 0x2cf   :  { %5901 = vmatpush1.bf16.msra.mxu1 %v8773_v13  ;;  %v8820_v13 = vld [vmem:[%s11882_s1 + $0x164c] ss:$16 sps:$4 sm:$0xff]  }
 0x2d0   :  { %5450 = vmatpush1.bf16.msra.mxu0 %v8770_v9  ;;  %5902 = vmatprep.subr.bf16.mxu1 %v8778_v14  ;;  %v8815_v9 = vld [vmem:[%s11882_s1 + $0x1628] ss:$16 sps:$4 sm:$0xff]   ;;  %v8823_v14 = vld [vmem:[%s11882_s1 + $0x166c] ss:$16 sps:$4 sm:$0xff]  }
 0x2d1   :  { %5976 = vmatprep.subr.bf16.mxu0 %v8850_v15  ;;  %v8902_v15 = vld [vmem:[%s11884_s3 + $0xa0] ss:$8 sps:$4 sm:$0xff]  }
 0x2d3   :  { %7483 = vmatmul.mubr.msk.bf16.vlgmr.msra.gmra.mrb[0].mxu0 %vm4947_vm0, %v1002_v16  ;;  %5903 = vmatpush1.bf16.msra.mxu1 %v8776_v17  ;;  %v8821_v17 = vld [vmem:[%s11882_s1 + $0x1668] ss:$16 sps:$4 sm:$0xff]  }
 0x2d4   :  { %5977 = vmatpush1.bf16.msra.mxu0 %v8848_v19  ;;  %5904 = vmatprep.subr.bf16.mxu1 %v8781_v20  ;;  %v8826_v19 = vld [vmem:[%s11882_s1 + $0x168c] ss:$16 sps:$4 sm:$0xff]   ;;  %v8905_v20 = vld [vmem:[%s11884_s3 + $0xb0] ss:$8 sps:$4 sm:$0xff]  }
 0x2d5   :  { %5978 = vmatprep.subr.bf16.mxu0 %v8856_v49  ;;  %6008 = vmatprep.mubr.bf16.mxu0 %v9009_v2  ;;  %v8898_v2 = vld [vmem:[%s11884_s3 + $0x84] ss:$8 sps:$4 sm:$0xff]  }
 0x2d6   :  { %v8910_v49 = vld [vmem:[%s11884_s3 + $0xc4] ss:$8 sps:$4 sm:$0xff]  }
 0x2d7   :  { %5905 = vmatpush1.bf16.msra.mxu1 %v8779_v21  ;;  %v8824_v21 = vld [vmem:[%s11882_s1 + $0x1688] ss:$16 sps:$4 sm:$0xff]  }
 0x2d8   :  { %5979 = vmatpush1.bf16.msra.mxu0 %v8854_v25  ;;  %5906 = vmatprep.subr.bf16.mxu1 %v8784_v26  ;;  %v8829_v25 = vld [vmem:[%s11882_s1 + $0x16ac] ss:$16 sps:$4 sm:$0xff]   ;;  %v8908_v26 = vld [vmem:[%s11884_s3 + $0xc0] ss:$8 sps:$4 sm:$0xff]  }
 0x2d9   :  { %5980 = vmatprep.subr.bf16.mxu0 %v8862_v28  ;;  %v8913_v28 = vld [vmem:[%s11884_s3 + $0xd4] ss:$8 sps:$4 sm:$0xff]  }
 0x2db   :  { %5907 = vmatpush1.bf16.msra.mxu1 %v8782_v56  ;;  %v8827_v56 = vld [vmem:[%s11882_s1 + $0x16a8] ss:$16 sps:$4 sm:$0xff]  }
 0x2dc   :  { %5981 = vmatpush1.bf16.msra.mxu0 %v8860_v29  ;;  %5908 = vmatprep.subr.bf16.mxu1 %v8787_v31  ;;  %v8832_v29 = vld [vmem:[%s11882_s1 + $0x16cc] ss:$16 sps:$4 sm:$0xff]   ;;  %v8911_v31 = vld [vmem:[%s11884_s3 + $0xd0] ss:$8 sps:$4 sm:$0xff]  }
 0x2dd   :  { %5982 = vmatprep.subr.bf16.mxu0 %v8868_v61  ;;  %v8830_v61 = vld [vmem:[%s11882_s1 + $0x16c8] ss:$16 sps:$4 sm:$0xff]  }
 0x2df   :  { %5909 = vmatpush1.bf16.msra.mxu1 %v8785_v33  ;;  %v8835_v33 = vld [vmem:[%s11882_s1 + $0x16ec] ss:$16 sps:$4 sm:$0xff]  }
 0x2e0   :  { %5983 = vmatpush1.bf16.msra.mxu0 %v8866_v12  ;;  %5910 = vmatprep.subr.bf16.mxu1 %v8790_v11  ;;  %v8833_v12 = vld [vmem:[%s11882_s1 + $0x16e8] ss:$16 sps:$4 sm:$0xff]   ;;  %v8838_v11 = vld [vmem:[%s11882_s1 + $0x170c] ss:$16 sps:$4 sm:$0xff]  }
 0x2e1   :  { %6421 = vmatprep.subr.bf16.mxu0 %v8874_v35  ;;  %v8836_v35 = vld [vmem:[%s11882_s1 + $0x1708] ss:$16 sps:$4 sm:$0xff]  }
 0x2e3   :  { %7484 = vmatmul.mubr.msk.bf16.vlgmr.msra.gmra.mrb[4].mxu0 %vm4947_vm0, %v1002_v16  ;;  %5911 = vmatpush1.bf16.msra.mxu1 %v8788_v6  ;;  %v8907_v16 = vld [vmem:[%s11884_s3 + $0xb4] ss:$8 sps:$4 sm:$0xff]  }
 0x2e4   :  { %6422 = vmatpush1.bf16.msra.mxu0 %v8872_v37  ;;  %5912 = vmatprep.subr.bf16.mxu1 %v8793_v3  ;;  %v8841_v6 = vld [vmem:[%s11882_s1 + $0x172c] ss:$16 sps:$4 sm:$0xff]   ;;  %v8839_v37 = vld [vmem:[%s11882_s1 + $0x1728] ss:$16 sps:$4 sm:$0xff]  }
 0x2e5   :  { %6423 = vmatprep.subr.bf16.mxu0 %v8877_v38  ;;  %v8844_v3 = vld [vmem:[%s11882_s1 + $0x174c] ss:$16 sps:$4 sm:$0xff]  }
 0x2e6   :  { %v8916_v38 = vld [vmem:[%s11884_s3 + $0xe4] ss:$8 sps:$4 sm:$0xff]  }
 0x2e7   :  { %5913 = vmatpush1.bf16.msra.mxu1 %v8791_v40  ;;  %v8914_v40 = vld [vmem:[%s11884_s3 + $0xe0] ss:$8 sps:$4 sm:$0xff]  }
 0x2e8   :  { %6424 = vmatpush1.bf16.msra.mxu0 %v8875_v41  ;;  %5914 = vmatprep.subr.bf16.mxu1 %v8796_v43  ;;  %v8842_v41 = vld [vmem:[%s11882_s1 + $0x1748] ss:$16 sps:$4 sm:$0xff]   ;;  %v8847_v43 = vld [vmem:[%s11882_s1 + $0x176c] ss:$16 sps:$4 sm:$0xff]  }
 0x2e9   :  { %6425 = vmatprep.subr.bf16.mxu0 %v8880_v18  ;;  %v8919_v18 = vld [vmem:[%s11884_s3 + $0xf4] ss:$8 sps:$4 sm:$0xff]  }
 0x2eb   :  { %5915 = vmatpush1.bf16.msra.mxu1 %v8794_v44  ;;  %v8917_v44 = vld [vmem:[%s11884_s3 + $0xf0] ss:$8 sps:$4 sm:$0xff]  }
 0x2ec   :  { %6426 = vmatpush1.bf16.msra.mxu0 %v8878_v46  ;;  %5916 = vmatprep.subr.bf16.mxu1 %v8799_v47  ;;  %v8845_v46 = vld [vmem:[%s11882_s1 + $0x1768] ss:$16 sps:$4 sm:$0xff]   ;;  %v8853_v47 = vld [vmem:[%s11882_s1 + $0x178c] ss:$16 sps:$4 sm:$0xff]  }
 0x2ed   :  { %6427 = vmatprep.subr.bf16.mxu0 %v8883_v48  ;;  %v8922_v48 = vld [vmem:[%s11884_s3 + $0x104] ss:$8 sps:$4 sm:$0xff]  }
 0x2ef   :  { %5917 = vmatpush1.bf16.msra.mxu1 %v8797_v50  ;;  %v8851_v50 = vld [vmem:[%s11882_s1 + $0x1788] ss:$16 sps:$4 sm:$0xff]  }
 0x2f0   :  { %6428 = vmatpush1.bf16.msra.mxu0 %v8881_v30  ;;  %5918 = vmatprep.subr.bf16.mxu1 %v8802_v51  ;;  %v8859_v30 = vld [vmem:[%s11882_s1 + $0x17ac] ss:$16 sps:$4 sm:$0xff]   ;;  %v8857_v51 = vld [vmem:[%s11882_s1 + $0x17a8] ss:$16 sps:$4 sm:$0xff]  }
 0x2f1   :  { %6429 = vmatprep.subr.bf16.mxu0 %v8886_v52  ;;  %v8865_v52 = vld [vmem:[%s11882_s1 + $0x17cc] ss:$16 sps:$4 sm:$0xff]  }
 0x2f3   :  { %5919 = vmatpush1.bf16.msra.mxu1 %v8800_v23  ;;  %v8863_v23 = vld [vmem:[%s11882_s1 + $0x17c8] ss:$16 sps:$4 sm:$0xff]  }
 0x2f4   :  { %6430 = vmatpush1.bf16.msra.mxu0 %v8884_v53  ;;  %5920 = vmatprep.subr.bf16.mxu1 %v8805_v0  ;;  %v8871_v53 = vld [vmem:[%s11882_s1 + $0x17ec] ss:$16 sps:$4 sm:$0xff]   ;;  %v8869_v0 = vld [vmem:[%s11882_s1 + $0x17e8] ss:$16 sps:$4 sm:$0xff]  }
 0x2f5   :  { %6431 = vmatprep.subr.bf16.mxu0 %v8889_v10  ;;  %v820_v10 = vsub.s32 0, %v9168_v42 }
 0x2f7   :  { %5921 = vmatpush1.bf16.msra.mxu1 %v8803_v55  ;;  %v11697_v55 = vld [vmem:[%s11883_s2] sm:$0xf] }
 0x2f8   :  { %6432 = vmatpush1.bf16.msra.mxu0 %v8887_v57  ;;  %5922 = vmatprep.subr.bf16.mxu1 %v8808_v32  ;;  %v824_v57 = vsub.s32 1, %v9168_v42  ;;  %v821_v32 = vrot.slane %v11697_v55, %v820_v10 }
 0x2f9   :  { %6433 = vmatprep.subr.bf16.mxu0 %v8892_v59  ;;  %v8968_v59 = vld [vmem:[%s11886_s5 + $0x40] sm:$0xff]  }
 0x2fb   :  { %5923 = vmatpush1.bf16.msra.mxu1 %v8806_v60  ;;  %v8970_v60 = vld [vmem:[%s11886_s5 + $0x48] sm:$0xff]  }
 0x2fc   :  { %6434 = vmatpush1.bf16.msra.mxu0 %v8890_v34  ;;  %5924 = vmatprep.subr.bf16.mxu1 %v8811_v62  ;;  %v825_v34 = vrot.slane %v11697_v55, %v824_v57  ;;  %v8971_v62 = vld [vmem:[%s11886_s5 + $0x8] sm:$0xff]  }
 0x2fd   :  { %6435 = vmatprep.subr.bf16.mxu0 %v8895_v63  ;;  %v4986_v63 = vadd.f32 %v9974_v4, %v821_v32  ;;  %v8974_v4 = vld [vmem:[%s11886_s5 + $0x58] sm:$0xff]  }
 0x2fe   :  { %v8965_v32 = vld [vmem:[%s11884_s3 + $0x1f0] ss:$8 sps:$4 sm:$0xff]  }
 0x2ff   :  { %5925 = vmatpush1.bf16.msra.mxu1 %v8809_v1  ;;  %v8972_v1 = vld [vmem:[%s11886_s5 + $0x50] sm:$0xff]  }
 0x300   :  { %6436 = vmatpush1.bf16.msra.mxu0 %v8893_v36  ;;  %5935 = vmatprep.subr.bf16.mxu1 %v8814_v8  ;;  %v4988_v36 = vadd.f32 %v9976_v5, %v825_v34  ;;  %v8920_v5 = vld [vmem:[%s11884_s3 + $0x100] ss:$8 sps:$4 sm:$0xff]  }
 0x301   :  { %6437 = vmatprep.subr.bf16.mxu0 %v8898_v2 }
 0x302   :  { %5927 = vmatmul.mubr.bf16.vlgmr.msra.gmra.mrb[4].mxu1 %v11142_v24  ;;  %v8904_v24 = vld [vmem:[%s11884_s3 + $0xa4] ss:$8 sps:$4 sm:$0xff]  }
 0x303   :  { %5936 = vmatpush1.bf16.msra.mxu1 %v8812_v39  ;;  %5967 = vmatprep.mubr.bf16.mxu1 %v11158_v54  ;;  %v8818_v54 = vld [vmem:[%s11882_s1 + $0x1648] ss:$16 sps:$4 sm:$0xff]  }
 0x304   :  { %5937 = vmatprep.subr.bf16.mxu1 %v8817_v7  ;;  %6438 = vmatpush1.bf16.msra.mxu0 %v8896_v27 }
 0x305   :  { %6439 = vmatprep.subr.bf16.mxu0 %v8901_v22  ;;  %v8973_v22 = vld [vmem:[%s11886_s5 + $0x10] sm:$0xff]  }
 0x307   :  { %5938 = vmatpush1.bf16.msra.mxu1 %v8815_v9 }
 0x308   :  { %5939 = vmatprep.subr.bf16.mxu1 %v8820_v13  ;;  %6440 = vmatpush1.bf16.msra.mxu0 %v8899_v45 }
 0x309   :  { %6441 = vmatprep.subr.bf16.mxu0 %v8904_v24 }
 0x30b   :  { %5940 = vmatpush1.bf16.msra.mxu1 %v8818_v54  ;;  %v8975_v54 = vld [vmem:[%s11886_s5 + $0x18] sm:$0xff]  }
 0x30c   :  { %5941 = vmatprep.subr.bf16.mxu1 %v8823_v14  ;;  %6442 = vmatpush1.bf16.msra.mxu0 %v8902_v15  ;;  %v8925_v15 = vld [vmem:[%s11884_s3 + $0x114] ss:$8 sps:$4 sm:$0xff]  }
 0x30d   :  { %6443 = vmatprep.subr.bf16.mxu0 %v8907_v16  ;;  %v8976_v16 = vld [vmem:[%s11886_s5 + $0x60] sm:$0xff]  }
 0x30f   :  { %5942 = vmatpush1.bf16.msra.mxu1 %v8821_v17  ;;  %v8923_v17 = vld [vmem:[%s11884_s3 + $0x110] ss:$8 sps:$4 sm:$0xff]  }
 0x310   :  { %5943 = vmatprep.subr.bf16.mxu1 %v8826_v19  ;;  %6444 = vmatpush1.bf16.msra.mxu0 %v8905_v20  ;;  %v8977_v19 = vld [vmem:[%s11886_s5 + $0x20] sm:$0xff]  }
 0x311   :  { %6445 = vmatprep.subr.bf16.mxu0 %v8910_v49  ;;  %v8928_v20 = vld [vmem:[%s11884_s3 + $0x124] ss:$8 sps:$4 sm:$0xff]  }
 0x312   :  { %v8978_v49 = vld [vmem:[%s11886_s5 + $0x68] sm:$0xff]  }
 0x313   :  { %5944 = vmatpush1.bf16.msra.mxu1 %v8824_v21  ;;  %v8926_v21 = vld [vmem:[%s11884_s3 + $0x120] ss:$8 sps:$4 sm:$0xff]  }
 0x314   :  { %5945 = vmatprep.subr.bf16.mxu1 %v8829_v25  ;;  %6446 = vmatpush1.bf16.msra.mxu0 %v8908_v26  ;;  %v8979_v25 = vld [vmem:[%s11886_s5 + $0x28] sm:$0xff]   ;;  %v8931_v26 = vld [vmem:[%s11884_s3 + $0x134] ss:$8 sps:$4 sm:$0xff]  }
 0x315   :  { %6447 = vmatprep.subr.bf16.mxu0 %v8913_v28 }
 0x317   :  { %5946 = vmatpush1.bf16.msra.mxu1 %v8827_v56 }
 0x318   :  { %5947 = vmatprep.subr.bf16.mxu1 %v8832_v29  ;;  %6448 = vmatpush1.bf16.msra.mxu0 %v8911_v31  ;;  %v8929_v29 = vld [vmem:[%s11884_s3 + $0x130] ss:$8 sps:$4 sm:$0xff]  }
 0x319   :  { %6449 = vmatprep.subr.bf16.mxu0 %v8916_v38  ;;  %v8941_v38 = vld [vmem:[%s11884_s3 + $0x170] ss:$8 sps:$4 sm:$0xff]  }
 0x31b   :  { %5948 = vmatpush1.bf16.msra.mxu1 %v8830_v61  ;;  %v8934_v61 = vld [vmem:[%s11884_s3 + $0x144] ss:$8 sps:$4 sm:$0xff]  }
 0x31c   :  { %5949 = vmatprep.subr.bf16.mxu1 %v8835_v33  ;;  %6450 = vmatpush1.bf16.msra.mxu0 %v8914_v40  ;;  %v8946_v40 = vld [vmem:[%s11884_s3 + $0x184] ss:$8 sps:$4 sm:$0xff]  }
 0x31d   :  { %6451 = vmatprep.subr.bf16.mxu0 %v8919_v18  ;;  %v8947_v18 = vld [vmem:[%s11884_s3 + $0x190] ss:$8 sps:$4 sm:$0xff]  }
 0x31f   :  { %5950 = vmatpush1.bf16.msra.mxu1 %v8833_v12  ;;  %v8932_v12 = vld [vmem:[%s11884_s3 + $0x140] ss:$8 sps:$4 sm:$0xff]  }
 0x320   :  { %5951 = vmatprep.subr.bf16.mxu1 %v8838_v11  ;;  %6452 = vmatpush1.bf16.msra.mxu0 %v8917_v44  ;;  %v8937_v11 = vld [vmem:[%s11884_s3 + $0x154] ss:$8 sps:$4 sm:$0xff]   ;;  %v8952_v44 = vld [vmem:[%s11884_s3 + $0x1a4] ss:$8 sps:$4 sm:$0xff]  }
 0x321   :  { %6462 = vmatprep.subr.bf16.mxu0 %v8922_v48  ;;  %v8953_v48 = vld [vmem:[%s11884_s3 + $0x1b0] ss:$8 sps:$4 sm:$0xff]  }
 0x323   :  { %5952 = vmatpush1.bf16.msra.mxu1 %v8836_v35  ;;  %v8935_v35 = vld [vmem:[%s11884_s3 + $0x150] ss:$8 sps:$4 sm:$0xff]  }
 0x324   :  { %5953 = vmatprep.subr.bf16.mxu1 %v8841_v6  ;;  %v8940_v6 = vld [vmem:[%s11884_s3 + $0x164] ss:$8 sps:$4 sm:$0xff]  }
 0x327   :  { %5954 = vmatpush1.bf16.msra.mxu1 %v8839_v37  ;;  %v8938_v37 = vld [vmem:[%s11884_s3 + $0x160] ss:$8 sps:$4 sm:$0xff]  }
 0x328   :  { %5955 = vmatprep.subr.bf16.mxu1 %v8844_v3  ;;  %v8943_v3 = vld [vmem:[%s11884_s3 + $0x174] ss:$8 sps:$4 sm:$0xff]  }
 0x32b   :  { %5956 = vmatpush1.bf16.msra.mxu1 %v8842_v41  ;;  %v8944_v41 = vld [vmem:[%s11884_s3 + $0x180] ss:$8 sps:$4 sm:$0xff]  }
 0x32c   :  { %5957 = vmatprep.subr.bf16.mxu1 %v8847_v43  ;;  %v8949_v43 = vld [vmem:[%s11884_s3 + $0x194] ss:$8 sps:$4 sm:$0xff]  }
 0x32f   :  { %5958 = vmatpush1.bf16.msra.mxu1 %v8845_v46  ;;  %v8950_v46 = vld [vmem:[%s11884_s3 + $0x1a0] ss:$8 sps:$4 sm:$0xff]  }
 0x330   :  { %5959 = vmatprep.subr.bf16.mxu1 %v8853_v47  ;;  %v8955_v47 = vld [vmem:[%s11884_s3 + $0x1b4] ss:$8 sps:$4 sm:$0xff]  }
 0x333   :  { %5960 = vmatpush1.bf16.msra.mxu1 %v8851_v50  ;;  %v8958_v50 = vld [vmem:[%s11884_s3 + $0x1c4] ss:$8 sps:$4 sm:$0xff]  }
 0x334   :  { %5961 = vmatprep.subr.bf16.mxu1 %v8859_v30  ;;  %v8956_v30 = vld [vmem:[%s11884_s3 + $0x1c0] ss:$8 sps:$4 sm:$0xff]  }
 0x337   :  { %5962 = vmatpush1.bf16.msra.mxu1 %v8857_v51  ;;  %v8961_v51 = vld [vmem:[%s11884_s3 + $0x1d4] ss:$8 sps:$4 sm:$0xff]  }
 0x338   :  { %5963 = vmatprep.subr.bf16.mxu1 %v8865_v52  ;;  %v8959_v52 = vld [vmem:[%s11884_s3 + $0x1d0] ss:$8 sps:$4 sm:$0xff]  }
 0x33b   :  { %5964 = vmatpush1.bf16.msra.mxu1 %v8863_v23  ;;  %v8964_v23 = vld [vmem:[%s11884_s3 + $0x1e4] ss:$8 sps:$4 sm:$0xff]  }
 0x33c   :  { %5965 = vmatprep.subr.bf16.mxu1 %v8871_v53  ;;  %v8962_v53 = vld [vmem:[%s11884_s3 + $0x1e0] ss:$8 sps:$4 sm:$0xff]  }
 0x33f   :  { %5966 = vmatpush1.bf16.msra.mxu1 %v8869_v0  ;;  %v8967_v0 = vld [vmem:[%s11884_s3 + $0x1f4] ss:$8 sps:$4 sm:$0xff]  }
 0x340   :  { %7566 = vmatprep.subr.bf16.mxu1 %v8968_v59  ;;  %v828_v59 = vsub.s32 2, %v9168_v42 }
 0x342   :  { %5968 = vmatmul.mubr.bf16.vlgmr.msra.gmra.mrb[4].mxu1 %v11346_v58  ;;  %v8969_v58 = vld [vmem:[%s11886_s5] sm:$0xff]  }
 0x343   :  { %7567 = vmatpush3.bf16.msra.mxu1 %v8969_v58  ;;  %v832_v58 = vsub.s32 3, %v9168_v42 }
 0x344   :  { %7568 = vmatprep.subr.bf16.mxu1 %v8970_v60  ;;  %v829_v60 = vrot.slane %v11697_v55, %v828_v59 }
 0x345   :  { %v833_v34 = vrot.slane %v11697_v55, %v832_v58  ;;  %v8980_v55 = vld [vmem:[%s11886_s5 + $0x70] sm:$0xff]  }
 0x347   :  { %7569 = vmatpush3.bf16.msra.mxu1 %v8971_v62 }
 0x348   :  { %7570 = vmatprep.subr.bf16.mxu1 %v8972_v1 }
 0x34b   :  { %7571 = vmatpush3.bf16.msra.mxu1 %v8973_v22 }
 0x34c   :  { %7572 = vmatprep.subr.bf16.mxu1 %v8974_v4  ;;  %v8981_v4 = vld [vmem:[%s11886_s5 + $0x30] sm:$0xff]  }
 0x34f   :  { %7573 = vmatpush3.bf16.msra.mxu1 %v8975_v54 }
 0x350   :  { %7574 = vmatprep.subr.bf16.mxu1 %v8976_v16 }
 0x353   :  { %7575 = vmatpush3.bf16.msra.mxu1 %v8977_v19 }
 0x354   :  { %7576 = vmatprep.subr.bf16.mxu1 %v8978_v49 }
 0x357   :  { %7577 = vmatpush3.bf16.msra.mxu1 %v8979_v25 }
 0x358   :  { %7578 = vmatprep.subr.bf16.mxu1 %v8980_v55 }
 0x35b   :  { %7579 = vmatpush3.bf16.msra.mxu1 %v8981_v4 }
 0x3a6   :  { %v5477_v8 = vpop.f32.mrb[0].mxu0 }
 0x3a7   :  { %v7589_v2 = vadd.f32 %v5477_v8, %v4986_v63  ;;  %v5479_v39 = vpop.f32.mrb[1].mxu0 }
 0x3a8   :  { %v7591_v7 = vadd.f32 %v5479_v39, %v4988_v36  ;;  %v5481_v27 = vpop.f32.mrb[2].mxu0 }
 0x3a9   :  { %v6017_v9 = vmax.f32 %v7589_v2, 0.0  ;;  %v5482_v13 = vpop.f32.mrb[3].mxu0 }
 0x3aa   :  { %v6018_v45 = vmax.f32 %v7591_v7, 0.0 }
 0x3ab   :  { %v6021_v14 = vpack.c.bf16 %v6017_v9, %v6017_v9 }
 0x3ac   :  { %v6022_v24 = vpack.c.bf16 %v6018_v45, %v6018_v45  ;;  %v8982_v45 = vld [vmem:[%s11886_s5 + $0x78] sm:$0xff]  }
 0x3ad   :  { %7580 = vmatprep.subr.bf16.mxu1 %v8982_v45 }
 0x3ae   :  { %6453 = vmatprep.mubr.bf16.mxu0 %v6022_v24  ;;  %v8983_v24 = vld [vmem:[%s11886_s5 + $0x38] sm:$0xff]  }
 0x3af   :  { %6454 = vmatmul.mubr.bf16.vlgmr.msra.gmra.mrb[8].mxu0 %v6021_v14  ;;  %7581 = vmatpush3.bf16.msra.mxu1 %v8983_v24 }
 0x3b0   :  { %6463 = vmatpush1.bf16.msra.mxu0 %v8920_v5  ;;  %v6089_v5 = vld [vmem:[%s11885_s4] sm:$0x3] }
 0x3b1   :  { %6464 = vmatprep.subr.bf16.mxu0 %v8925_v15  ;;  %v6094_v54 = vrot.slane %v6089_v5, %v820_v10  ;;  %v6098_v14 = vrot.slane %v6089_v5, %v824_v57  ;;  %v7549_v10 = vld [vmem:[%s11887_s6] ss:$0 sm:$0xff] }
 0x3b4   :  { %6465 = vmatpush1.bf16.msra.mxu0 %v8923_v17 }
 0x3b5   :  { %6466 = vmatprep.subr.bf16.mxu0 %v8928_v20 }
 0x3b6   :  { %v11762_v28 = vpop.f32.mrb[4].mxu0 }
 0x3b7   :  { %v11764_v56 = vpop.f32.mrb[5].mxu0 }
 0x3b8   :  { %6467 = vmatpush1.bf16.msra.mxu0 %v8926_v21  ;;  %v6014_v31 = vpop.f32.mrb[6].mxu0 }
 0x3b9   :  { %6468 = vmatprep.subr.bf16.mxu0 %v8931_v26  ;;  %v6015_v33 = vpop.f32.mrb[7].mxu0 }
 0x3bc   :  { %6469 = vmatpush1.bf16.msra.mxu0 %v8929_v29 }
 0x3bd   :  { %6470 = vmatprep.subr.bf16.mxu0 %v8934_v61 }
 0x3c0   :  { %6471 = vmatpush1.bf16.msra.mxu0 %v8932_v12 }
 0x3c1   :  { %6472 = vmatprep.subr.bf16.mxu0 %v8937_v11 }
 0x3c4   :  { %6473 = vmatpush1.bf16.msra.mxu0 %v8935_v35 }
 0x3c5   :  { %6474 = vmatprep.subr.bf16.mxu0 %v8940_v6 }
 0x3c8   :  { %6475 = vmatpush1.bf16.msra.mxu0 %v8938_v37 }
 0x3c9   :  { %6476 = vmatprep.subr.bf16.mxu0 %v8943_v3 }
 0x3cc   :  { %6477 = vmatpush1.bf16.msra.mxu0 %v8941_v38 }
 0x3cd   :  { %6478 = vmatprep.subr.bf16.mxu0 %v8946_v40 }
 0x3d0   :  { %6479 = vmatpush1.bf16.msra.mxu0 %v8944_v41 }
 0x3d1   :  { %6480 = vmatprep.subr.bf16.mxu0 %v8949_v43 }
 0x3d4   :  { %6481 = vmatpush1.bf16.msra.mxu0 %v8947_v18 }
 0x3d5   :  { %6482 = vmatprep.subr.bf16.mxu0 %v8952_v44 }
 0x3d8   :  { %6483 = vmatpush1.bf16.msra.mxu0 %v8950_v46 }
 0x3d9   :  { %6484 = vmatprep.subr.bf16.mxu0 %v8955_v47 }
 0x3dc   :  { %6485 = vmatpush1.bf16.msra.mxu0 %v8953_v48 }
 0x3dd   :  { %6486 = vmatprep.subr.bf16.mxu0 %v8958_v50 }
 0x3e0   :  { %6487 = vmatpush1.bf16.msra.mxu0 %v8956_v30 }
 0x3e1   :  { %6488 = vmatprep.subr.bf16.mxu0 %v8961_v51 }
 0x3e4   :  { %6489 = vmatpush1.bf16.msra.mxu0 %v8959_v52 }
 0x3e5   :  { %6490 = vmatprep.subr.bf16.mxu0 %v8964_v23 }
 0x3e8   :  { %6491 = vmatpush1.bf16.msra.mxu0 %v8962_v53 }
 0x3e9   :  { %6492 = vmatprep.subr.bf16.mxu0 %v8967_v0 }
 0x3ec   :  { %6493 = vmatpush1.bf16.msra.mxu0 %v8965_v32 }
 0x415   :  { %v5969_v62 = vpop.f32.mrb[4].mxu1 }
 0x416   :  { %v7592_v63 = vadd.f32 %v5969_v62, %v829_v60  ;;  %v5971_v1 = vpop.f32.mrb[5].mxu1 }
 0x417   :  { %v7594_v36 = vadd.f32 %v5971_v1, %v833_v34  ;;  %v5973_v8 = vpop.f32.mrb[6].mxu1 }
 0x418   :  { %v7593_v2 = vadd.f32 %v7592_v63, %v11762_v28  ;;  %v5974_v39 = vpop.f32.mrb[7].mxu1 }
 0x419   :  { %v7595_v7 = vadd.f32 %v7594_v36, %v11764_v56 }
 0x41a   :  { %v6019_v27 = vmax.f32 %v7593_v2, 0.0 }
 0x41b   :  { %v6020_v22 = vmax.f32 %v7595_v7, 0.0 }
 0x41c   :  { %v6023_v13 = vpack.c.bf16 %v6019_v27, %v6019_v27 }
 0x41d   :  { %v6024_v9 = vpack.c.bf16 %v6020_v22, %v6020_v22 }
 0x41f   :  { %6494 = vmatprep.mubr.bf16.mxu0 %v6024_v9 }
 0x420   :  { %6495 = vmatmul.mubr.bf16.vlgmr.msra.gmra.mrb[8].mxu0 %v6023_v13 }
 0x4f3   :  { %v6496_v15 = vpop.f32.mrb[8].mxu0 }
 0x4f4   :  { %v7596_v16 = vadd.f32 %v6496_v15, %v6094_v54  ;;  %v6498_v17 = vpop.f32.mrb[9].mxu0 }
 0x4f5   :  { %v7597_v19 = vadd.f32 %v6498_v17, %v6098_v14  ;;  %v6500_v20 = vpop.f32.mrb[10].mxu0 }
 0x4f6   :  { %v6503_v49 = vmax.f32 %v7596_v16, 0.0  ;;  %v6501_v21 = vpop.f32.mrb[11].mxu0 }
 0x4f7   :  { %v6504_v25 = vmax.f32 %v7597_v19, 0.0 }
 0x4f8   :  { %v6505_v28 = vpack.c.bf16 %v6503_v49, %v6503_v49 }
 0x4f9   :  { %v6506_v26 = vpack.c.bf16 %v6504_v25, %v6504_v25 }
 0x4fb   :  { %6674 = vmatprep.mubr.bf16.mxu1 %v6506_v26 }
 0x4fc   :  { %6675 = vmatmul.mubr.bf16.vlgmr.msra.gmra.mrb[8].mxu1 %v6505_v28 }
 0x5cf   :  { %v7582_v56 = vpop.f32.mrb[8].mxu1 }
 0x5d0   :  { %v7583_v29 = vpop.f32.mrb[9].mxu1 }
 0x5d1   :  { %v7584_v42 = vadd.f32 %v7583_v29, %v7582_v56  ;;  %v7585_v57 = vpop.f32.mrb[10].mxu1 }
 0x5d2   :  { %v7586_v31 = vpop.f32.mrb[11].mxu1 }
 0x5d3   :  { %v6677_v61 = vadd.f32 %v7584_v42, %v7549_v10 }
 0x5d5   :  { %6683 = vst.msk [vmem:[#allocation2] sm:$0x3] %vm6682_vm1, %v6677_v61 }
 0x5d6   :  { %8995 = shalt.err (!%p8992_p4)
}
 0x5d7   :  { %s8996_s6 = scalar_lea.hbm %s11888_s7, 32 }
 0x5d8   :  { %p8997_p5 = scmp.ne.s32.totalorder %s11888_s7, %s8996_s6  ;;  %p9000_p6 = scmp.lt.u32.totalorder %s8996_s6, %s11888_s7 }
 0x5da   :  { %p9002_p7 = pnand %p9000_p6, %p8997_p5 }
 0x5dc   :  { %9005 = shalt.err (!%p9002_p7)
}
 0x5dd   :  { %6693 = dma.vmem_to_hbm [thread:$0]  %s6691_s19, 32, %s11888_s7, [#allocation3]  }
 0x5de   :  { %9006 = dma.done.wait [#allocation3], 32  }
 0x5df   :  { %9007 = vsyncadd [#allocation3], 4294967264 }
 0x5e0   :  { %6697 = vsyncpa [#allocation3], 1 }

</bundles_post_ra>
